<compile_context>
chip_gen: v5e
topology: v5e:2x2
jax: 0.10.0
libtpu: 0.0.40
codegen_flags: <defaults>
</compile_context>

<pallas_src>
import jax
import jax.numpy as jnp
import numpy as np
from jax.experimental import pallas as pl
from jax.experimental.pallas import tpu as pltpu

RES_OUT = 1000
FC3_OUT = 159
FC1_OUT = 512
FC2_OUT = 512
IN_DIM = RES_OUT + FC3_OUT          # 1159

OUT_PAD = 256                        # next multiple of 128 >= 159 (lane-dense stores)
MAX_TB = 512                         # max batch rows per grid step


def _round_up(n, m):
    return ((n + m - 1) // m) * m


def _regression_kernel(x_ref, w1_ref, b1_ref, w2_ref, b2_ref, w3_ref, b3_ref,
                       o_ref):
    # x arrives as f32 straight from HBM; cast to bf16 in VMEM (VPU), no HBM round-trip.
    x = x_ref[...].astype(jnp.bfloat16)

    # fc1 + relu (dropout == identity in eval mode); bf16 MXU inputs, f32 accumulation.
    h1 = jnp.dot(x, w1_ref[...], preferred_element_type=jnp.float32)
    h1 = jnp.maximum(h1 + b1_ref[...], 0.0)

    # fc2 + relu
    h2 = jnp.dot(h1.astype(jnp.bfloat16), w2_ref[...],
                 preferred_element_type=jnp.float32)
    h2 = jnp.maximum(h2 + b2_ref[...], 0.0)

    # fc3 (weight/bias columns >= 159 are zero-padded -> zero outputs there)
    out = jnp.dot(h2.astype(jnp.bfloat16), w3_ref[...],
                  preferred_element_type=jnp.float32)
    o_ref[...] = (out + b3_ref[...]).astype(o_ref.dtype)


def prepare_params(params):
    """One-time weight prep (call once at load time, reuse across forward calls):
    bf16 casts + lane-dense zero-padding of the fc3 output dim (159 -> 256)."""
    w1, b1, w2, b2, w3, b3 = params
    w1_p = w1.astype(jnp.bfloat16)                                   # (1159, 512)
    w2_p = w2.astype(jnp.bfloat16)                                   # (512, 512)
    w3_p = jnp.zeros((FC2_OUT, OUT_PAD), jnp.bfloat16)
    w3_p = w3_p.at[:, :FC3_OUT].set(w3.astype(jnp.bfloat16))         # (512, 256)
    b1_p = b1.reshape(1, FC1_OUT).astype(jnp.float32)
    b2_p = b2.reshape(1, FC2_OUT).astype(jnp.float32)
    b3_p = jnp.zeros((1, OUT_PAD), jnp.float32)
    b3_p = b3_p.at[:, :FC3_OUT].set(b3.reshape(1, FC3_OUT).astype(jnp.float32))
    return w1_p, b1_p, w2_p, b2_p, w3_p, b3_p


@jax.jit
def regression_forward(x, prepared):
    """x: [B, 1159] float32, prepared = prepare_params(raw) -> [B, 159] float32."""
    w1_p, b1_p, w2_p, b2_p, w3_p, b3_p = prepared
    B = x.shape[0]

    # Batch tile: big tiles amortize the per-grid-step overhead; for mid-size
    # batches force >=2 grid steps so the "parallel" axis can use both v7x cores.
    if B <= 8:
        TB = _round_up(max(B, 1), 8)
    else:
        TB = min(MAX_TB, _round_up((B + 1) // 2, 8))
    num_tiles = (B + TB - 1) // TB          # uneven last tile is masked by Pallas

    const = lambda shape: pl.BlockSpec(shape, lambda i: (0, 0))

    out_pad = pl.pallas_call(
        _regression_kernel,
        out_shape=jax.ShapeDtypeStruct((B, OUT_PAD), jnp.float32),
        grid=(num_tiles,),
        in_specs=[
            # x streamed as f32, unpadded: last block dim == full array dim (1159).
            pl.BlockSpec((TB, IN_DIM), lambda i: (i, 0)),
            const((IN_DIM, FC1_OUT)),                      # w1 (resident in VMEM)
            const((1, FC1_OUT)),                           # b1
            const((FC1_OUT, FC2_OUT)),                     # w2
            const((1, FC2_OUT)),                           # b2
            const((FC2_OUT, OUT_PAD)),                     # w3 (zero-padded cols)
            const((1, OUT_PAD)),                           # b3
        ],
        out_specs=pl.BlockSpec((TB, OUT_PAD), lambda i: (i, 0)),
        compiler_params=pltpu.CompilerParams(
            dimension_semantics=("parallel",),
            vmem_limit_bytes=48 << 20,
        ),
    )(x, w1_p, b1_p, w2_p, b2_p, w3_p, b3_p)

    return out_pad[:, :FC3_OUT]


def init_params(key):
    """Deterministic PyTorch-style uniform init; weights stored as [in, out]."""
    def linear(k, fan_in, fan_out):
        kw, kb = jax.random.split(k)
        bound = 1.0 / np.sqrt(fan_in)
        w = jax.random.uniform(kw, (fan_in, fan_out), jnp.float32, -bound, bound)
        b = jax.random.uniform(kb, (1, fan_out), jnp.float32, -bound, bound)
        return w, b

    k1, k2, k3 = jax.random.split(key, 3)
    w1, b1 = linear(k1, IN_DIM, FC1_OUT)
    w2, b2 = linear(k2, FC1_OUT, FC2_OUT)
    w3, b3 = linear(k3, FC2_OUT, FC3_OUT)
    return w1, b1, w2, b2, w3, b3


def reference_forward(x, params):
    w1, b1, w2, b2, w3, b3 = params
    h1 = jnp.maximum(x @ w1 + b1, 0.0)
    h2 = jnp.maximum(h1 @ w2 + b2, 0.0)
    return h2 @ w3 + b3


if __name__ == "__main__":
    key = jax.random.PRNGKey(0)
    kx, kp = jax.random.split(key)

    params = init_params(kp)
    prepared = prepare_params(params)      # one-time weight prep (hoisted per review)

    # Small single-tile check.
    B = 8
    x = jax.random.normal(kx, (B, IN_DIM), dtype=jnp.float32)
    out = jax.block_until_ready(regression_forward(x, prepared))
    ref = reference_forward(x, params)
    # bf16 inputs/weights with f32 accumulation -> relaxed tolerance vs f32 ref.
    np.testing.assert_allclose(np.asarray(out), np.asarray(ref),
                               rtol=3e-2, atol=3e-2)
    assert out.shape == (B, FC3_OUT)

    # Multi-tile + uneven-tail check (2 grid steps, masked last tile).
    B2 = 20
    x2 = jax.random.normal(kx, (B2, IN_DIM), dtype=jnp.float32)
    out2 = jax.block_until_ready(regression_forward(x2, prepared))
    ref2 = reference_forward(x2, params)
    np.testing.assert_allclose(np.asarray(out2), np.asarray(ref2),
                               rtol=3e-2, atol=3e-2)
    assert out2.shape == (B2, FC3_OUT)

    print("KERNEL_OK")
</pallas_src>

<mosaic_0001>
module attributes {stable_mosaic.version = 11 : i64} {
  func.func @_regression_kernel(%arg0: i32, %arg1: memref<8x1159xf32, #tpu.memory_space<vmem>>, %arg2: memref<1159x512xbf16, #tpu.memory_space<vmem>>, %arg3: memref<1x512xf32, #tpu.memory_space<vmem>>, %arg4: memref<512x512xbf16, #tpu.memory_space<vmem>>, %arg5: memref<1x512xf32, #tpu.memory_space<vmem>>, %arg6: memref<512x256xbf16, #tpu.memory_space<vmem>>, %arg7: memref<1x256xf32, #tpu.memory_space<vmem>>, %arg8: memref<8x256xf32, #tpu.memory_space<vmem>>) attributes {dimension_semantics = [#tpu.dimension_semantics<parallel>], iteration_bounds = array<i64: 1>, scalar_prefetch = 0 : i64, scratch_operands = 0 : i64, tpu.core_type = #tpu.core_type<tc>, window_params = [{transform_indices = @transform_0, window_bounds = array<i64: 8, 1159>}, {pipeline_mode = #tpu.pipeline_mode<synchronous>, transform_indices = @transform_1, window_bounds = array<i64: 1159, 512>}, {pipeline_mode = #tpu.pipeline_mode<synchronous>, transform_indices = @transform_2, window_bounds = array<i64: 1, 512>}, {pipeline_mode = #tpu.pipeline_mode<synchronous>, transform_indices = @transform_3, window_bounds = array<i64: 512, 512>}, {pipeline_mode = #tpu.pipeline_mode<synchronous>, transform_indices = @transform_4, window_bounds = array<i64: 1, 512>}, {pipeline_mode = #tpu.pipeline_mode<synchronous>, transform_indices = @transform_5, window_bounds = array<i64: 512, 256>}, {pipeline_mode = #tpu.pipeline_mode<synchronous>, transform_indices = @transform_6, window_bounds = array<i64: 1, 256>}, {transform_indices = @transform_7, window_bounds = array<i64: 8, 256>}]} {
    %c0 = arith.constant 0 : index
    %c0_0 = arith.constant 0 : index
    %0 = vector.load %arg1[%c0, %c0_0] : memref<8x1159xf32, #tpu.memory_space<vmem>>, vector<8x1159xf32>
    %1 = arith.truncf %0 : vector<8x1159xf32> to vector<8x1159xbf16>
    %c0_1 = arith.constant 0 : index
    %c0_2 = arith.constant 0 : index
    %2 = vector.load %arg2[%c0_1, %c0_2] : memref<1159x512xbf16, #tpu.memory_space<vmem>>, vector<1159x512xbf16>
    %cst = arith.constant dense<0.000000e+00> : vector<8x512xf32>
    %3 = tpu.matmul %1, %2, %cst {dimension_numbers = #tpu.dot_dimension_numbers<[1], [0], [0], [1], [0, 0, 1, 1], [], []>} : vector<8x1159xbf16>, vector<1159x512xbf16>, vector<8x512xf32> -> vector<8x512xf32>
    %c0_3 = arith.constant 0 : index
    %c0_4 = arith.constant 0 : index
    %4 = vector.load %arg3[%c0_3, %c0_4] : memref<1x512xf32, #tpu.memory_space<vmem>>, vector<1x512xf32>
    %5 = vector.broadcast %4 : vector<1x512xf32> to vector<8x512xf32>
    %6 = arith.addf %3, %5 : vector<8x512xf32>
    %cst_5 = arith.constant 0.000000e+00 : f32
    %7 = vector.broadcast %cst_5 : f32 to vector<8x512xf32>
    %8 = arith.maximumf %6, %7 : vector<8x512xf32>
    %9 = arith.truncf %8 : vector<8x512xf32> to vector<8x512xbf16>
    %c0_6 = arith.constant 0 : index
    %c0_7 = arith.constant 0 : index
    %10 = vector.load %arg4[%c0_6, %c0_7] : memref<512x512xbf16, #tpu.memory_space<vmem>>, vector<512x512xbf16>
    %cst_8 = arith.constant dense<0.000000e+00> : vector<8x512xf32>
    %11 = tpu.matmul %9, %10, %cst_8 {dimension_numbers = #tpu.dot_dimension_numbers<[1], [0], [0], [1], [0, 0, 1, 1], [], []>} : vector<8x512xbf16>, vector<512x512xbf16>, vector<8x512xf32> -> vector<8x512xf32>
    %c0_9 = arith.constant 0 : index
    %c0_10 = arith.constant 0 : index
    %12 = vector.load %arg5[%c0_9, %c0_10] : memref<1x512xf32, #tpu.memory_space<vmem>>, vector<1x512xf32>
    %13 = vector.broadcast %12 : vector<1x512xf32> to vector<8x512xf32>
    %14 = arith.addf %11, %13 : vector<8x512xf32>
    %cst_11 = arith.constant 0.000000e+00 : f32
    %15 = vector.broadcast %cst_11 : f32 to vector<8x512xf32>
    %16 = arith.maximumf %14, %15 : vector<8x512xf32>
    %17 = arith.truncf %16 : vector<8x512xf32> to vector<8x512xbf16>
    %c0_12 = arith.constant 0 : index
    %c0_13 = arith.constant 0 : index
    %18 = vector.load %arg6[%c0_12, %c0_13] : memref<512x256xbf16, #tpu.memory_space<vmem>>, vector<512x256xbf16>
    %cst_14 = arith.constant dense<0.000000e+00> : vector<8x256xf32>
    %19 = tpu.matmul %17, %18, %cst_14 {dimension_numbers = #tpu.dot_dimension_numbers<[1], [0], [0], [1], [0, 0, 1, 1], [], []>} : vector<8x512xbf16>, vector<512x256xbf16>, vector<8x256xf32> -> vector<8x256xf32>
    %c0_15 = arith.constant 0 : index
    %c0_16 = arith.constant 0 : index
    %20 = vector.load %arg7[%c0_15, %c0_16] : memref<1x256xf32, #tpu.memory_space<vmem>>, vector<1x256xf32>
    %21 = vector.broadcast %20 : vector<1x256xf32> to vector<8x256xf32>
    %22 = arith.addf %19, %21 : vector<8x256xf32>
    %c0_17 = arith.constant 0 : index
    %c0_18 = arith.constant 0 : index
    %23 = vector.load %arg8[%c0_17, %c0_18] : memref<8x256xf32, #tpu.memory_space<vmem>>, vector<8x256xf32>
    tpu.vector_store %arg8[%c0_17, %c0_18], %22 {strides = array<i32>} : memref<8x256xf32, #tpu.memory_space<vmem>>, vector<8x256xf32>,
    return
  }
  func.func @transform_0(%arg0: i32) -> (i32, i32) {
    %c0_i32 = arith.constant 0 : i32
    %c0_i32_0 = arith.constant 0 : i32
    return %arg0, %c0_i32 : i32, i32
  }
  func.func @transform_1(%arg0: i32) -> (i32, i32) {
    %c0_i32 = arith.constant 0 : i32
    %c0_i32_0 = arith.constant 0 : i32
    %c0_i32_1 = arith.constant 0 : i32
    return %c0_i32, %c0_i32_0 : i32, i32
  }
  func.func @transform_2(%arg0: i32) -> (i32, i32) {
    %c0_i32 = arith.constant 0 : i32
    %c0_i32_0 = arith.constant 0 : i32
    %c0_i32_1 = arith.constant 0 : i32
    return %c0_i32, %c0_i32_0 : i32, i32
  }
  func.func @transform_3(%arg0: i32) -> (i32, i32) {
    %c0_i32 = arith.constant 0 : i32
    %c0_i32_0 = arith.constant 0 : i32
    %c0_i32_1 = arith.constant 0 : i32
    return %c0_i32, %c0_i32_0 : i32, i32
  }
  func.func @transform_4(%arg0: i32) -> (i32, i32) {
    %c0_i32 = arith.constant 0 : i32
    %c0_i32_0 = arith.constant 0 : i32
    %c0_i32_1 = arith.constant 0 : i32
    return %c0_i32, %c0_i32_0 : i32, i32
  }
  func.func @transform_5(%arg0: i32) -> (i32, i32) {
    %c0_i32 = arith.constant 0 : i32
    %c0_i32_0 = arith.constant 0 : i32
    %c0_i32_1 = arith.constant 0 : i32
    return %c0_i32, %c0_i32_0 : i32, i32
  }
  func.func @transform_6(%arg0: i32) -> (i32, i32) {
    %c0_i32 = arith.constant 0 : i32
    %c0_i32_0 = arith.constant 0 : i32
    %c0_i32_1 = arith.constant 0 : i32
    return %c0_i32, %c0_i32_0 : i32, i32
  }
  func.func @transform_7(%arg0: i32) -> (i32, i32) {
    %c0_i32 = arith.constant 0 : i32
    %c0_i32_0 = arith.constant 0 : i32
    return %arg0, %c0_i32 : i32, i32
  }
}

</mosaic_0001>

<bundles_post_ra>
// kernel: regression_forward.1
= control target key start
LH: loop header
LB: loop body
LE: loop exit
PB: predicated region body
PF: predicated region fallthrough
CT: control target
= control target key end

     0   :  { %12 = vsyncpa [#allocation3], 0  ;;  %s6859_s0 = inlined_call_operand.hbm [shape: f32[8,1159], index: 0, kind: input, shape index: {}]   ;;  %s6860_s1 = inlined_call_operand.hbm [shape: bf16[1159,512], index: 1, kind: input, shape index: {}]   ;;  %s6861_s2 = inlined_call_operand.hbm [shape: f32[1,512], index: 2, kind: input, shape index: {}]   ;;  %s6862_s3 = inlined_call_operand.hbm [shape: bf16[512,512], index: 3, kind: input, shape index: {}]   ;;  %s6863_s4 = inlined_call_operand.hbm [shape: f32[1,512], index: 4, kind: input, shape index: {}]   ;;  %s6864_s5 = inlined_call_operand.hbm [shape: bf16[512,256], index: 5, kind: input, shape index: {}]   ;;  %s6865_s6 = inlined_call_operand.hbm [shape: f32[1,256], index: 6, kind: input, shape index: {}]   ;;  %s6866_s7 = inlined_call_operand.hbm [shape: f32[8,256], index: 7, kind: output, shape index: {}]  }
   0x1   :  { %13 = vsyncpa [#allocation6], 0 }
   0x2   :  { %14 = vsyncpa [#allocation9], 0 }
   0x3   :  { %15 = vsyncpa [#allocation12], 0  ;;  %s32_s26 = sshll.u32 %s6860_s1, 4  ;;  %s33_s26 = int_to_ptr.hbm [resolvable:$true] %s32_s26 }
   0x4   :  { %16 = vsyncpa [#allocation4], 0  ;;  %s6577_s27 = smov [#allocation5]   ;;  %s56_s8 = sshll.u32 %s6862_s3, 4  ;;  %s57_s8 = int_to_ptr.hbm [resolvable:$true] %s56_s8 }
   0x5   :  { %s34_s28 = sshll.u32 %s6577_s27, 4  ;;  %s6578_s9 = smov 256   ;;  %s35_s28 = int_to_ptr.vmem [resolvable:$true] %s34_s28 }
   0x6   :  { %s6579_s10 = smov 16   ;;  %s6580_s11 = smov [#allocation8]  }
   0x7   :  { %40 = dma.hbm_to_vmem [thread:$0]  %s33_s26, 37120, %s35_s28, [#allocation6], %s6578_s9, %s6578_s9, %s6579_s10  }
   0x8   :  { %s58_s12 = sshll.u32 %s6580_s11, 4  ;;  %s80_s15 = sshll.u32 %s6864_s5, 4  ;;  %s59_s12 = int_to_ptr.vmem [resolvable:$true] %s58_s12  ;;  %s81_s15 = int_to_ptr.hbm [resolvable:$true] %s80_s15 }
   0x9   :  { %64 = dma.hbm_to_vmem [thread:$0]  %s57_s8, 16384, %s59_s12, [#allocation9], %s6578_s9, %s6578_s9, %s6579_s10  }
   0xa   :  { %s6581_s1 = smov [#allocation11]   ;;  %s22_s3 = sshll.u32 %s6859_s0, 4  ;;  %s23_s3 = int_to_ptr.hbm [resolvable:$true] %s22_s3 }
   0xb   :  { %s82_s16 = sshll.u32 %s6581_s1, 4  ;;  %s6582_s19 = smov 128   ;;  %s83_s16 = int_to_ptr.vmem [resolvable:$true] %s82_s16 }
   0xc   :  { %s6583_s20 = smov 8   ;;  %s6584_s21 = smov [#allocation2]  }
   0xd   :  { %88 = dma.hbm_to_vmem [thread:$0]  %s81_s15, 8192, %s83_s16, [#allocation12], %s6582_s19, %s6582_s19, %s6583_s20  }
   0xe   :  { %s24_s22 = sshll.u32 %s6584_s21, 4  ;;  %s46_s5 = sshll.u32 %s6861_s2, 4  ;;  %s25_s22 = int_to_ptr.vmem [resolvable:$true] %s24_s22  ;;  %s47_s5 = int_to_ptr.hbm [resolvable:$true] %s46_s5 }
   0xf   :  { %27 = dma.hbm_to_vmem [thread:$0]  %s23_s3, 1280, %s25_s22, [#allocation3]  }
  0x10   :  { %s70_s27 = sshll.u32 %s6863_s4, 4  ;;  %s6585_s28 = smov [#allocation7]   ;;  %s71_s27 = int_to_ptr.hbm [resolvable:$true] %s70_s27 }
  0x11   :  { %s48_s29 = sshll.u32 %s6585_s28, 4  ;;  %s6586_s0 = smov [#allocation10]   ;;  %s49_s29 = int_to_ptr.vmem [resolvable:$true] %s48_s29 }
  0x12   :  { %51 = dma.hbm_to_vmem [thread:$0]  %s47_s5, 64, %s49_s29, [#allocation6]  }
  0x13   :  { %s72_s30 = sshll.u32 %s6586_s0, 4  ;;  %s94_s10 = sshll.u32 %s6865_s6, 4  ;;  %s73_s30 = int_to_ptr.vmem [resolvable:$true] %s72_s30  ;;  %s95_s10 = int_to_ptr.hbm [resolvable:$true] %s94_s10 }
  0x14   :  { %75 = dma.hbm_to_vmem [thread:$0]  %s71_s27, 64, %s73_s30, [#allocation9]  }
  0x15   :  { %s6587_s2 = smov [#allocation13]  }
  0x16   :  { %s96_s11 = sshll.u32 %s6587_s2, 4  ;;  %s97_s11 = int_to_ptr.vmem [resolvable:$true] %s96_s11 }
  0x17   :  { %99 = dma.hbm_to_vmem [thread:$0]  %s95_s10, 32, %s97_s11, [#allocation12]  }
  0x18   :  { %6567 = dma.done.wait [#allocation3], 1280  }
  0x19   :  { %6568 = vsyncadd [#allocation3], 4294966016 }
  0x1a   :  { %6569 = dma.done.wait [#allocation6], 37184  }
  0x1b   :  { %6570 = vsyncadd [#allocation6], 4294930112 }
  0x1c   :  { %6571 = dma.done.wait [#allocation9], 16448  }
  0x1d   :  { %6572 = vsyncadd [#allocation9], 4294950848 }
  0x1e   :  { %6573 = dma.done.wait [#allocation12], 8224  }
  0x1f   :  { %6574 = vsyncadd [#allocation12], 4294959072  ;;  %v4071_v0 = vld [vmem:[#allocation5 + $0xe0] sm:$0xf]  ;;  %v5911_v1 = vld [vmem:[#allocation5 + $0xec] sm:$0xf0] }
  0x20   :  { %v4199_v2 = vld [vmem:[#allocation5 + $0x1e0] sm:$0xf]  ;;  %v4072_v3 = vor.u32 %v5911_v1, %v4071_v0  ;;  %v5943_v4 = vld [vmem:[#allocation5 + $0x1ec] sm:$0xf0]  ;;  %vm1903_vm0 = vcmask 1042432   ;;  %vm1904_vm1 = vcmask 1043456  }
  0x21   :  { %v4327_v5 = vld [vmem:[#allocation5 + $0x2e0] sm:$0xf]  ;;  %v5975_v6 = vld [vmem:[#allocation5 + $0x2ec] sm:$0xf0]  ;;  %v4200_v7 = vor.u32 %v5943_v4, %v4199_v2  ;;  %vm1899_vm2 = vcmask 56320   ;;  %s6589_s4 = smov [#allocation14]  }
  0x22   :  { %v4328_v8 = vor.u32 %v5975_v6, %v4327_v5  ;;  %v4455_v9 = vld [vmem:[#allocation5 + $0x3e0] sm:$0xf]  ;;  %v6007_v10 = vld [vmem:[#allocation5 + $0x3ec] sm:$0xf0]  ;;  %1919 = vmatpush.bf16.msra.mxu0 %v4072_v3  ;;  %s3942_s6 = sshll.u32 %s6589_s4, 4  ;;  %s3944_s14 = sshll.u32 %s6866_s7, 4  ;;  %s3943_s6 = int_to_ptr.vmem [resolvable:$true] %s3942_s6  ;;  %s3945_s14 = int_to_ptr.hbm [resolvable:$true] %s3944_s14 }
  0x23   :  { %v4055_v11 = vld [vmem:[#allocation5 + $0xc0] sm:$0xf]  ;;  %v4456_v12 = vor.u32 %v6007_v10, %v4455_v9  ;;  %v5907_v13 = vld [vmem:[#allocation5 + $0xcc] sm:$0xf0]  ;;  %1932 = vmatpush.bf16.msra.mxu1 %v4200_v7 }
  0x24   :  { %v4183_v14 = vld [vmem:[#allocation5 + $0x1c0] sm:$0xf]  ;;  %v5939_v15 = vld [vmem:[#allocation5 + $0x1cc] sm:$0xf0]  ;;  %1945 = vmatpush.bf16.msra.mxu2 %v4328_v8  ;;  %v4056_v16 = vor.u32 %v5907_v13, %v4055_v11 }
  0x25   :  { %v4184_v17 = vor.u32 %v5939_v15, %v4183_v14  ;;  %v4311_v18 = vld [vmem:[#allocation5 + $0x2c0] sm:$0xf]  ;;  %v5971_v19 = vld [vmem:[#allocation5 + $0x2cc] sm:$0xf0]  ;;  %1958 = vmatpush.bf16.msra.mxu3 %v4456_v12 }
  0x26   :  { %v4439_v20 = vld [vmem:[#allocation5 + $0x3c0] sm:$0xf]  ;;  %v4312_v21 = vor.u32 %v5971_v19, %v4311_v18  ;;  %v6003_v22 = vld [vmem:[#allocation5 + $0x3cc] sm:$0xf0]  ;;  %1920 = vmatpush.bf16.msra.mxu0 %v4056_v16 }
  0x27   :  { %v4039_v23 = vld [vmem:[#allocation5 + $0xa0] sm:$0xf]  ;;  %v5903_v24 = vld [vmem:[#allocation5 + $0xac] sm:$0xf0]  ;;  %v4440_v25 = vor.u32 %v6003_v22, %v4439_v20  ;;  %1933 = vmatpush.bf16.msra.mxu1 %v4184_v17 }
  0x28   :  { %v4167_v26 = vld [vmem:[#allocation5 + $0x1a0] sm:$0xf]  ;;  %v5935_v27 = vld [vmem:[#allocation5 + $0x1ac] sm:$0xf0]  ;;  %v4040_v29 = vor.u32 %v5903_v24, %v4039_v23  ;;  %1946 = vmatpush.bf16.msra.mxu2 %v4312_v21 }
  0x29   :  { %v4295_v28 = vld [vmem:[#allocation5 + $0x2a0] sm:$0xf]  ;;  %v5967_v30 = vld [vmem:[#allocation5 + $0x2ac] sm:$0xf0]  ;;  %v4168_v33 = vor.u32 %v5935_v27, %v4167_v26  ;;  %1959 = vmatpush.bf16.msra.mxu3 %v4440_v25 }
  0x2a   :  { %v4423_v31 = vld [vmem:[#allocation5 + $0x3a0] sm:$0xf]  ;;  %v5999_v32 = vld [vmem:[#allocation5 + $0x3ac] sm:$0xf0]  ;;  %v4296_v34 = vor.u32 %v5967_v30, %v4295_v28  ;;  %1921 = vmatpush.bf16.msra.mxu0 %v4040_v29 }
  0x2b   :  { %v4023_v35 = vld [vmem:[#allocation5 + $0x80] sm:$0xf]  ;;  %v5899_v36 = vld [vmem:[#allocation5 + $0x8c] sm:$0xf0]  ;;  %v4424_v38 = vor.u32 %v5999_v32, %v4423_v31  ;;  %1934 = vmatpush.bf16.msra.mxu1 %v4168_v33 }
  0x2c   :  { %v4151_v37 = vld [vmem:[#allocation5 + $0x180] sm:$0xf]  ;;  %v5931_v39 = vld [vmem:[#allocation5 + $0x18c] sm:$0xf0]  ;;  %v4024_v44 = vor.u32 %v5899_v36, %v4023_v35  ;;  %1947 = vmatpush.bf16.msra.mxu2 %v4296_v34 }
  0x2d   :  { %v4279_v40 = vld [vmem:[#allocation5 + $0x280] sm:$0xf]  ;;  %v5963_v41 = vld [vmem:[#allocation5 + $0x28c] sm:$0xf0]  ;;  %v4152_v45 = vor.u32 %v5931_v39, %v4151_v37  ;;  %1960 = vmatpush.bf16.msra.mxu3 %v4424_v38 }
  0x2e   :  { %v4407_v42 = vld [vmem:[#allocation5 + $0x380] sm:$0xf]  ;;  %v5995_v43 = vld [vmem:[#allocation5 + $0x38c] sm:$0xf0]  ;;  %v4280_v46 = vor.u32 %v5963_v41, %v4279_v40  ;;  %1922 = vmatpush.bf16.msra.mxu0 %v4024_v44 }
  0x2f   :  { %v4007_v47 = vld [vmem:[#allocation5 + $0x60] sm:$0xf]  ;;  %v5895_v48 = vld [vmem:[#allocation5 + $0x6c] sm:$0xf0]  ;;  %v4408_v50 = vor.u32 %v5995_v43, %v4407_v42  ;;  %1935 = vmatpush.bf16.msra.mxu1 %v4152_v45 }
  0x30   :  { %v4135_v49 = vld [vmem:[#allocation5 + $0x160] sm:$0xf]  ;;  %v5927_v51 = vld [vmem:[#allocation5 + $0x16c] sm:$0xf0]  ;;  %v4008_v56 = vor.u32 %v5895_v48, %v4007_v47  ;;  %1948 = vmatpush.bf16.msra.mxu2 %v4280_v46 }
  0x31   :  { %v4263_v52 = vld [vmem:[#allocation5 + $0x260] sm:$0xf]  ;;  %v5959_v53 = vld [vmem:[#allocation5 + $0x26c] sm:$0xf0]  ;;  %v4136_v57 = vor.u32 %v5927_v51, %v4135_v49  ;;  %1961 = vmatpush.bf16.msra.mxu3 %v4408_v50 }
  0x32   :  { %v4391_v54 = vld [vmem:[#allocation5 + $0x360] sm:$0xf]  ;;  %v5991_v55 = vld [vmem:[#allocation5 + $0x36c] sm:$0xf0]  ;;  %v4264_v58 = vor.u32 %v5959_v53, %v4263_v52  ;;  %1923 = vmatpush.bf16.msra.mxu0 %v4008_v56  ;;  %v130_v52 = vld [vmem:[#allocation2 + $0x8] sm:$0xff] }
  0x33   :  { %v3991_v59 = vld [vmem:[#allocation5 + $0x40] sm:$0xf]  ;;  %v5891_v60 = vld [vmem:[#allocation5 + $0x4c] sm:$0xf0]  ;;  %v4392_v62 = vor.u32 %v5991_v55, %v4391_v54  ;;  %1936 = vmatpush.bf16.msra.mxu1 %v4136_v57  ;;  %v6651_v55 = vpack.c.bf16 %v130_v52, %v130_v52 }
  0x34   :  { %v4119_v61 = vld [vmem:[#allocation5 + $0x140] sm:$0xf]  ;;  %v5923_v63 = vld [vmem:[#allocation5 + $0x14c] sm:$0xf0]  ;;  %v3992_v4 = vor.u32 %v5891_v60, %v3991_v59  ;;  %1949 = vmatpush.bf16.msra.mxu2 %v4264_v58 }
  0x35   :  { %v4247_v0 = vld [vmem:[#allocation5 + $0x240] sm:$0xf]  ;;  %v5955_v1 = vld [vmem:[#allocation5 + $0x24c] sm:$0xf0]  ;;  %v4120_v5 = vor.u32 %v5923_v63, %v4119_v61  ;;  %1962 = vmatpush.bf16.msra.mxu3 %v4392_v62 }
  0x36   :  { %v4375_v2 = vld [vmem:[#allocation5 + $0x340] sm:$0xf]  ;;  %v5987_v3 = vld [vmem:[#allocation5 + $0x34c] sm:$0xf0]  ;;  %v4248_v6 = vor.u32 %v5955_v1, %v4247_v0  ;;  %1924 = vmatpush.bf16.msra.mxu0 %v3992_v4 }
  0x37   :  { %v3975_v7 = vld [vmem:[#allocation5 + $0x20] sm:$0xf]  ;;  %v5887_v8 = vld [vmem:[#allocation5 + $0x2c] sm:$0xf0]  ;;  %v4376_v10 = vor.u32 %v5987_v3, %v4375_v2  ;;  %1937 = vmatpush.bf16.msra.mxu1 %v4120_v5 }
  0x38   :  { %v4103_v9 = vld [vmem:[#allocation5 + $0x120] sm:$0xf]  ;;  %v5919_v11 = vld [vmem:[#allocation5 + $0x12c] sm:$0xf0]  ;;  %v3976_v16 = vor.u32 %v5887_v8, %v3975_v7  ;;  %1950 = vmatpush.bf16.msra.mxu2 %v4248_v6 }
  0x39   :  { %v4231_v12 = vld [vmem:[#allocation5 + $0x220] sm:$0xf]  ;;  %v5951_v13 = vld [vmem:[#allocation5 + $0x22c] sm:$0xf0]  ;;  %v4104_v19 = vor.u32 %v5919_v11, %v4103_v9  ;;  %1963 = vmatpush.bf16.msra.mxu3 %v4376_v10  ;;  %v132_v11 = vld [vmem:[#allocation2 + $0x18] sm:$0xff] }
  0x3a   :  { %v4359_v14 = vld [vmem:[#allocation5 + $0x320] sm:$0xf]  ;;  %v5983_v15 = vld [vmem:[#allocation5 + $0x32c] sm:$0xf0]  ;;  %v4232_v20 = vor.u32 %v5951_v13, %v4231_v12  ;;  %1925 = vmatpush.bf16.msra.mxu0 %v3976_v16 }
  0x3b   :  { %v3959_v17 = vld [vmem:[#allocation5] sm:$0xf]  ;;  %v5883_v18 = vld [vmem:[#allocation5 + $0xc] sm:$0xf0]  ;;  %v4360_v24 = vor.u32 %v5983_v15, %v4359_v14  ;;  %1938 = vmatpush.bf16.msra.mxu1 %v4104_v19 }
  0x3c   :  { %v4087_v21 = vld [vmem:[#allocation5 + $0x100] sm:$0xf]  ;;  %v5915_v22 = vld [vmem:[#allocation5 + $0x10c] sm:$0xf0]  ;;  %v3960_v31 = vor.u32 %v5883_v18, %v3959_v17  ;;  %1951 = vmatpush.bf16.msra.mxu2 %v4232_v20  ;;  %v6659_v17 = vpack.c.bf16 %v132_v11, %v132_v11 }
  0x3d   :  { %v4215_v23 = vld [vmem:[#allocation5 + $0x200] sm:$0xf]  ;;  %v5947_v25 = vld [vmem:[#allocation5 + $0x20c] sm:$0xf0]  ;;  %v4088_v35 = vor.u32 %v5915_v22, %v4087_v21  ;;  %1964 = vmatpush.bf16.msra.mxu3 %v4360_v24 }
  0x3e   :  { %v4343_v26 = vld [vmem:[#allocation5 + $0x300] sm:$0xf]  ;;  %v5979_v27 = vld [vmem:[#allocation5 + $0x30c] sm:$0xf0]  ;;  %v4216_v36 = vor.u32 %v5947_v25, %v4215_v23  ;;  %1926 = vmatpush.bf16.msra.mxu0 %v3960_v31 }
  0x3f   :  { %v4583_v28 = vld [vmem:[#allocation5 + $0x4e0] sm:$0xf]  ;;  %v6039_v29 = vld [vmem:[#allocation5 + $0x4ec] sm:$0xf0]  ;;  %v4344_v39 = vor.u32 %v5979_v27, %v4343_v26  ;;  %1939 = vmatpush.bf16.msra.mxu1 %v4088_v35 }
  0x40   :  { %v4711_v30 = vld [vmem:[#allocation5 + $0x5e0] sm:$0xf]  ;;  %v6071_v32 = vld [vmem:[#allocation5 + $0x5ec] sm:$0xf0]  ;;  %v4584_v40 = vor.u32 %v6039_v29, %v4583_v28  ;;  %1952 = vmatpush.bf16.msra.mxu2 %v4216_v36 }
  0x41   :  { %v4839_v33 = vld [vmem:[#allocation5 + $0x6e0] sm:$0xf]  ;;  %v6103_v34 = vld [vmem:[#allocation5 + $0x6ec] sm:$0xf0]  ;;  %v4712_v41 = vor.u32 %v6071_v32, %v4711_v30  ;;  %1965 = vmatpush.bf16.msra.mxu3 %v4344_v39 }
  0x42   :  { %v4967_v37 = vld [vmem:[#allocation5 + $0x7e0] sm:$0xf]  ;;  %v6135_v38 = vld [vmem:[#allocation5 + $0x7ec] sm:$0xf0]  ;;  %v4840_v42 = vor.u32 %v6103_v34, %v4839_v33  ;;  %1971 = vmatpush.bf16.msrb.mxu0 %v4584_v40  ;;  %1940 = vmatmul.bf16.vlgmr.msra.gmra.mxu1 %v6651_v55 }
  0x43   :  { %v4567_v43 = vld [vmem:[#allocation5 + $0x4c0] sm:$0xf]  ;;  %v6035_v44 = vld [vmem:[#allocation5 + $0x4cc] sm:$0xf0]  ;;  %v4968_v46 = vor.u32 %v6135_v38, %v4967_v37  ;;  %1984 = vmatpush.bf16.msrb.mxu1 %v4712_v41 }
  0x44   :  { %v4695_v45 = vld [vmem:[#allocation5 + $0x5c0] sm:$0xf]  ;;  %v6067_v47 = vld [vmem:[#allocation5 + $0x5cc] sm:$0xf0]  ;;  %v4568_v53 = vor.u32 %v6035_v44, %v4567_v43  ;;  %1997 = vmatpush.bf16.msrb.mxu2 %v4840_v42  ;;  %1966 = vmatmul.bf16.vlgmr.msra.gmra.mxu3 %v6659_v17 }
  0x45   :  { %v4823_v48 = vld [vmem:[#allocation5 + $0x6c0] sm:$0xf]  ;;  %v6099_v49 = vld [vmem:[#allocation5 + $0x6cc] sm:$0xf0]  ;;  %v4696_v56 = vor.u32 %v6067_v47, %v4695_v45  ;;  %2010 = vmatpush.bf16.msrb.mxu3 %v4968_v46 }
  0x46   :  { %v4951_v50 = vld [vmem:[#allocation5 + $0x7c0] sm:$0xf]  ;;  %v6131_v51 = vld [vmem:[#allocation5 + $0x7cc] sm:$0xf0]  ;;  %v4824_v57 = vor.u32 %v6099_v49, %v4823_v48  ;;  %1972 = vmatpush.bf16.msrb.mxu0 %v4568_v53 }
  0x47   :  { %v4551_v54 = vld [vmem:[#allocation5 + $0x4a0] sm:$0xf]  ;;  %v6031_v58 = vld [vmem:[#allocation5 + $0x4ac] sm:$0xf0]  ;;  %v4952_v61 = vor.u32 %v6131_v51, %v4951_v50  ;;  %1985 = vmatpush.bf16.msrb.mxu1 %v4696_v56 }
  0x48   :  { %v4679_v59 = vld [vmem:[#allocation5 + $0x5a0] sm:$0xf]  ;;  %v6063_v60 = vld [vmem:[#allocation5 + $0x5ac] sm:$0xf0]  ;;  %v4552_v4 = vor.u32 %v6031_v58, %v4551_v54  ;;  %1998 = vmatpush.bf16.msrb.mxu2 %v4824_v57 }
  0x49   :  { %v4807_v62 = vld [vmem:[#allocation5 + $0x6a0] sm:$0xf]  ;;  %v6095_v63 = vld [vmem:[#allocation5 + $0x6ac] sm:$0xf0]  ;;  %v4680_v7 = vor.u32 %v6063_v60, %v4679_v59  ;;  %2011 = vmatpush.bf16.msrb.mxu3 %v4952_v61 }
  0x4a   :  { %v131_v0 = vld [vmem:[#allocation2 + $0x10] sm:$0xff]  ;;  %v6127_v2 = vld [vmem:[#allocation5 + $0x7ac] sm:$0xf0]  ;;  %v4808_v8 = vor.u32 %v6095_v63, %v4807_v62  ;;  %1973 = vmatpush.bf16.msrb.mxu0 %v4552_v4 }
  0x4b   :  { %v4935_v1 = vld [vmem:[#allocation5 + $0x7a0] sm:$0xf]  ;;  %v6654_v3 = vpack.c.bf16 %v131_v0, %v131_v0  ;;  %v6027_v6 = vld [vmem:[#allocation5 + $0x48c] sm:$0xf0]  ;;  %1986 = vmatpush.bf16.msrb.mxu1 %v4680_v7 }
  0x4c   :  { %v4535_v5 = vld [vmem:[#allocation5 + $0x480] sm:$0xf]  ;;  %v129_v10 = vld [vmem:[#allocation2] sm:$0xff]  ;;  %v4936_v12 = vor.u32 %v6127_v2, %v4935_v1  ;;  %1999 = vmatpush.bf16.msrb.mxu2 %v4808_v8  ;;  %v6588_v8 = vmov 65535  }
  0x4d   :  { %v4663_v9 = vld [vmem:[#allocation5 + $0x580] sm:$0xf]  ;;  %v6059_v13 = vld [vmem:[#allocation5 + $0x58c] sm:$0xf0]  ;;  %1953 = vmatmul.bf16.vlgmr.msra.gmra.mxu2 %v6654_v3  ;;  %v6657_v16 = vpack.c.bf16 %v129_v10, %v129_v10  ;;  %v4536_v20 = vor.u32 %v6027_v6, %v4535_v5 }
  0x4e   :  { %v4791_v14 = vld [vmem:[#allocation5 + $0x680] sm:$0xf]  ;;  %v6091_v15 = vld [vmem:[#allocation5 + $0x68c] sm:$0xf0]  ;;  %v4664_v21 = vor.u32 %v6059_v13, %v4663_v9  ;;  %2012 = vmatpush.bf16.msrb.mxu3 %v4936_v12  ;;  %v1905_v9 = vsel %vm1903_vm0, 4294967295, %v6588_v8 }
  0x4f   :  { %v4919_v18 = vld [vmem:[#allocation5 + $0x780] sm:$0xf]  ;;  %v6123_v19 = vld [vmem:[#allocation5 + $0x78c] sm:$0xf0]  ;;  %v4792_v22 = vor.u32 %v6091_v15, %v4791_v14  ;;  %1927 = vmatmul.bf16.vlgmr.msra.gmra.mxu0 %v6657_v16  ;;  %v5909_v12 = vld [vmem:[#allocation5 + $0xe4] sm:$0xf] }
  0x50   :  { %v4519_v23 = vld [vmem:[#allocation5 + $0x460] sm:$0xf]  ;;  %v6023_v24 = vld [vmem:[#allocation5 + $0x46c] sm:$0xf0]  ;;  %v4920_v26 = vor.u32 %v6123_v19, %v4919_v18  ;;  %1974 = vmatpush.bf16.msrb.mxu0 %v4536_v20  ;;  %1987 = vmatpush.bf16.msrb.mxu1 %v4664_v21  ;;  %v4073_v14 = vld [vmem:[#allocation5 + $0xf0] sm:$0xf0] }
  0x51   :  { %v4647_v25 = vld [vmem:[#allocation5 + $0x560] sm:$0xf]  ;;  %v6055_v27 = vld [vmem:[#allocation5 + $0x56c] sm:$0xf0]  ;;  %v4520_v32 = vor.u32 %v6023_v24, %v4519_v23  ;;  %2000 = vmatpush.bf16.msrb.mxu2 %v4792_v22  ;;  %v5941_v15 = vld [vmem:[#allocation5 + $0x1e4] sm:$0xf] }
  0x52   :  { %v4775_v28 = vld [vmem:[#allocation5 + $0x660] sm:$0xf]  ;;  %v6087_v29 = vld [vmem:[#allocation5 + $0x66c] sm:$0xf0]  ;;  %v4648_v33 = vor.u32 %v6055_v27, %v4647_v25  ;;  %2013 = vmatpush.bf16.msrb.mxu3 %v4920_v26  ;;  %v4201_v18 = vld [vmem:[#allocation5 + $0x1f0] sm:$0xf0] }
  0x53   :  { %v4903_v30 = vld [vmem:[#allocation5 + $0x760] sm:$0xf]  ;;  %v6119_v31 = vld [vmem:[#allocation5 + $0x76c] sm:$0xf0]  ;;  %v4776_v34 = vor.u32 %v6087_v29, %v4775_v28  ;;  %v6668_v22 = vsel %vm1904_vm1, %v1905_v9, 0  ;;  %v134_v23 = vld [vmem:[#allocation2 + $0x28] sm:$0xff] }
  0x54   :  { %v4503_v35 = vld [vmem:[#allocation5 + $0x440] sm:$0xf]  ;;  %v6019_v36 = vld [vmem:[#allocation5 + $0x44c] sm:$0xf0]  ;;  %v4904_v38 = vor.u32 %v6119_v31, %v4903_v30  ;;  %1975 = vmatpush.bf16.msrb.mxu0 %v4520_v32  ;;  %1988 = vmatpush.bf16.msrb.mxu1 %v4648_v33  ;;  %v5973_v27 = vld [vmem:[#allocation5 + $0x2e4] sm:$0xf]  ;;  %v4076_v30 = vor.u32 %v5909_v12, %v4073_v14  ;;  %v4204_v31 = vor.u32 %v5941_v15, %v4201_v18 }
  0x55   :  { %v4631_v37 = vld [vmem:[#allocation5 + $0x540] sm:$0xf]  ;;  %v6051_v39 = vld [vmem:[#allocation5 + $0x54c] sm:$0xf0]  ;;  %v4504_v44 = vor.u32 %v6019_v36, %v4503_v35  ;;  %2001 = vmatpush.bf16.msrb.mxu2 %v4776_v34  ;;  %v4329_v28 = vld [vmem:[#allocation5 + $0x2f0] sm:$0xf0] }
  0x56   :  { %v4759_v40 = vld [vmem:[#allocation5 + $0x640] sm:$0xf]  ;;  %v6083_v41 = vld [vmem:[#allocation5 + $0x64c] sm:$0xf0]  ;;  %v4632_v46 = vor.u32 %v6051_v39, %v4631_v37  ;;  %2014 = vmatpush.bf16.msrb.mxu3 %v4904_v38  ;;  %v5905_v34 = vld [vmem:[#allocation5 + $0xc4] sm:$0xf] }
  0x57   :  { %v4887_v42 = vld [vmem:[#allocation5 + $0x740] sm:$0xf]  ;;  %v6115_v43 = vld [vmem:[#allocation5 + $0x74c] sm:$0xf0]  ;;  %v4760_v47 = vor.u32 %v6083_v41, %v4759_v40  ;;  %v4057_v36 = vld [vmem:[#allocation5 + $0xd0] sm:$0xf0]  ;;  %v6673_v40 = vpack.c.bf16 %v134_v23, %v134_v23 }
  0x58   :  { %v4487_v45 = vld [vmem:[#allocation5 + $0x420] sm:$0xf]  ;;  %v6015_v48 = vld [vmem:[#allocation5 + $0x42c] sm:$0xf0]  ;;  %v4888_v51 = vor.u32 %v6115_v43, %v4887_v42  ;;  %1976 = vmatpush.bf16.msrb.mxu0 %v4504_v44  ;;  %1989 = vmatpush.bf16.msrb.mxu1 %v4632_v46  ;;  %v5937_v37 = vld [vmem:[#allocation5 + $0x1c4] sm:$0xf]  ;;  %v4332_v43 = vor.u32 %v5973_v27, %v4329_v28 }
  0x59   :  { %v4615_v49 = vld [vmem:[#allocation5 + $0x520] sm:$0xf]  ;;  %v6047_v52 = vld [vmem:[#allocation5 + $0x52c] sm:$0xf0]  ;;  %v4488_v58 = vor.u32 %v6015_v48, %v4487_v45  ;;  %2002 = vmatpush.bf16.msrb.mxu2 %v4760_v47  ;;  %v4185_v38 = vld [vmem:[#allocation5 + $0x1d0] sm:$0xf0]  ;;  %v4060_v47 = vor.u32 %v5905_v34, %v4057_v36 }
  0x5a   :  { %v6663_v50 = vld [vmem:[#allocation5 + $0x900] sm:$0xff]  ;;  %v6079_v54 = vld [vmem:[#allocation5 + $0x62c] sm:$0xf0]  ;;  %v4616_v63 = vor.u32 %v6047_v52, %v4615_v49  ;;  %2015 = vmatpush.bf16.msrb.mxu3 %v4888_v51  ;;  %v136_v42 = vld [vmem:[#allocation2 + $0x38] sm:$0xff]  ;;  %v4188_v48 = vor.u32 %v5937_v37, %v4185_v38 }
  0x5b   :  { %v4743_v53 = vld [vmem:[#allocation5 + $0x620] sm:$0xf]  ;;  %v6111_v57 = vld [vmem:[#allocation5 + $0x72c] sm:$0xf0]  ;;  %v1315_v62 = vunpack.c.l.b16 %v6663_v50  ;;  %v5969_v45 = vld [vmem:[#allocation5 + $0x2c4] sm:$0xf] }
  0x5c   :  { %v4871_v56 = vld [vmem:[#allocation5 + $0x720] sm:$0xf]  ;;  %v6011_v60 = vld [vmem:[#allocation5 + $0x40c] sm:$0xf0]  ;;  %v4744_v0 = vor.u32 %v6079_v54, %v4743_v53  ;;  %1977 = vmatpush.bf16.msrb.mxu0 %v4488_v58  ;;  %1990 = vmatpush.bf16.msrb.mxu1 %v4616_v63  ;;  %v4313_v46 = vld [vmem:[#allocation5 + $0x2d0] sm:$0xf0]  ;;  %v6678_v53 = vpack.c.bf16 %v136_v42, %v136_v42 }
  0x5d   :  { %v4471_v59 = vld [vmem:[#allocation5 + $0x400] sm:$0xf]  ;;  %v6043_v1 = vld [vmem:[#allocation5 + $0x50c] sm:$0xf0]  ;;  %v4872_v5 = vor.u32 %v6111_v57, %v4871_v56  ;;  %v1607_v19 = vpack.c.b16 %v1315_v62, %v1315_v62  ;;  %v5901_v52 = vld [vmem:[#allocation5 + $0xa4] sm:$0xf]  ;;  %v4316_v58 = vor.u32 %v5969_v45, %v4313_v46 }
  0x5e   :  { %v4599_v61 = vld [vmem:[#allocation5 + $0x500] sm:$0xf]  ;;  %v6075_v4 = vld [vmem:[#allocation5 + $0x60c] sm:$0xf0]  ;;  %v4472_v13 = vor.u32 %v6011_v60, %v4471_v59  ;;  %2003 = vmatpush.bf16.msrb.mxu2 %v4744_v0  ;;  %v4041_v54 = vld [vmem:[#allocation5 + $0xb0] sm:$0xf0] }
  0x5f   :  { %v4727_v2 = vld [vmem:[#allocation5 + $0x600] sm:$0xf]  ;;  %v6107_v7 = vld [vmem:[#allocation5 + $0x70c] sm:$0xf0]  ;;  %v4600_v20 = vor.u32 %v6043_v1, %v4599_v61  ;;  %2016 = vmatpush.bf16.msrb.mxu3 %v4872_v5  ;;  %v1908_v35 = vand.u32 %v6668_v22, %v1607_v19  ;;  %v5933_v56 = vld [vmem:[#allocation5 + $0x1a4] sm:$0xf]  ;;  %v4044_v62 = vor.u32 %v5901_v52, %v4041_v54 }
  0x60   :  { %v4855_v6 = vld [vmem:[#allocation5 + $0x700] sm:$0xf]  ;;  %v6167_v11 = vld [vmem:[#allocation5 + $0x8ec] sm:$0xf0]  ;;  %v4728_v21 = vor.u32 %v6075_v4, %v4727_v2  ;;  %1978 = vmatpush.bf16.msrb.mxu0 %v4472_v13  ;;  %v4169_v57 = vld [vmem:[#allocation5 + $0x1b0] sm:$0xf0] }
  0x61   :  { %v5095_v10 = vld [vmem:[#allocation5 + $0x8e0] sm:$0xf]  ;;  %v4856_v25 = vor.u32 %v6107_v7, %v4855_v6  ;;  %v133_v29 = vld [vmem:[#allocation2 + $0x20] sm:$0xff]  ;;  %1991 = vmatpush.bf16.msrb.mxu1 %v4600_v20  ;;  %v5965_v60 = vld [vmem:[#allocation5 + $0x2a4] sm:$0xf]  ;;  %v4172_v63 = vor.u32 %v5933_v56, %v4169_v57 }
  0x62   :  { %v135_v24 = vld [vmem:[#allocation2 + $0x30] sm:$0xff]  ;;  %v5096_v26 = vor.u32 %v6167_v11, %v5095_v10  ;;  %v6163_v33 = vld [vmem:[#allocation5 + $0x8cc] sm:$0xf0]  ;;  %2004 = vmatpush.bf16.msrb.mxu2 %v4728_v21  ;;  %v6675_v41 = vpack.c.bf16 %v133_v29, %v133_v29  ;;  %v4297_v61 = vld [vmem:[#allocation5 + $0x2b0] sm:$0xf0] }
  0x63   :  { %v5079_v32 = vld [vmem:[#allocation5 + $0x8c0] sm:$0xf]  ;;  %v6671_v39 = vpack.c.bf16 %v135_v24, %v135_v24  ;;  %2017 = vmatpush.bf16.msrb.mxu3 %v4856_v25  ;;  %v6159_v51 = vld [vmem:[#allocation5 + $0x8ac] sm:$0xf0]  ;;  %v5897_v2 = vld [vmem:[#allocation5 + $0x84] sm:$0xf]  ;;  %v4300_v7 = vor.u32 %v5965_v60, %v4297_v61 }
  0x64   :  { %2023 = vmatpush.bf16.msra.mxu0 %v5096_v26  ;;  %v5080_v44 = vor.u32 %v6163_v33, %v5079_v32  ;;  %v5063_v49 = vld [vmem:[#allocation5 + $0x8a0] sm:$0xf]  ;;  %1992 = vmatmul.bf16.vlgmr.msrb.gmra.mxu1 %v6673_v40  ;;  %v6155_v1 = vld [vmem:[#allocation5 + $0x88c] sm:$0xf0]  ;;  %v4025_v4 = vld [vmem:[#allocation5 + $0x90] sm:$0xf0] }
  0x65   :  { %2043 = vmatpush.bf16.msra.mxu1 %v1908_v35  ;;  %2005 = vmatmul.bf16.vlgmr.msrb.gmra.mxu2 %v6671_v39  ;;  %v5064_v59 = vor.u32 %v6159_v51, %v5063_v49  ;;  %v5047_v0 = vld [vmem:[#allocation5 + $0x880] sm:$0xf]  ;;  %v5929_v5 = vld [vmem:[#allocation5 + $0x184] sm:$0xf]  ;;  %v4153_v6 = vld [vmem:[#allocation5 + $0x190] sm:$0xf0]  ;;  %v4028_v11 = vor.u32 %v5897_v2, %v4025_v4 }
  0x66   :  { %2049 = vmatpush.bf16.msra.mxu2 %v4076_v30  ;;  %1979 = vmatmul.bf16.vlgmr.msrb.gmra.mxu0 %v6675_v41  ;;  %v5048_v8 = vor.u32 %v6155_v1, %v5047_v0  ;;  %v5961_v9 = vld [vmem:[#allocation5 + $0x284] sm:$0xf]  ;;  %v4281_v10 = vld [vmem:[#allocation5 + $0x290] sm:$0xf0]  ;;  %v4156_v12 = vor.u32 %v5929_v5, %v4153_v6  ;;  %v5031_v13 = vld [vmem:[#allocation5 + $0x860] sm:$0xf] }
  0x67   :  { %2062 = vmatpush.bf16.msra.mxu3 %v4204_v31  ;;  %v6151_v14 = vld [vmem:[#allocation5 + $0x86c] sm:$0xf0]  ;;  %v5893_v15 = vld [vmem:[#allocation5 + $0x64] sm:$0xf]  ;;  %v4009_v18 = vld [vmem:[#allocation5 + $0x70] sm:$0xf0]  ;;  %v4284_v21 = vor.u32 %v5961_v9, %v4281_v10 }
  0x68   :  { %2024 = vmatpush.bf16.msra.mxu0 %v5080_v44  ;;  %2018 = vmatmul.bf16.vlgmr.msrb.gmra.mxu3 %v6678_v53  ;;  %v5925_v19 = vld [vmem:[#allocation5 + $0x164] sm:$0xf]  ;;  %v4137_v20 = vld [vmem:[#allocation5 + $0x170] sm:$0xf0]  ;;  %v5032_v23 = vor.u32 %v6151_v14, %v5031_v13  ;;  %v138_v26 = vld [vmem:[#allocation2 + $0x48] sm:$0xff]  ;;  %v4012_v27 = vor.u32 %v5893_v15, %v4009_v18 }
  0x69   :  { %2075 = vmatpush.bf16.msrb.mxu1 %v4332_v43  ;;  %v5957_v24 = vld [vmem:[#allocation5 + $0x264] sm:$0xf]  ;;  %v4265_v25 = vld [vmem:[#allocation5 + $0x270] sm:$0xf0]  ;;  %v4140_v28 = vor.u32 %v5925_v19, %v4137_v20  ;;  %v5015_v29 = vld [vmem:[#allocation5 + $0x840] sm:$0xf]  ;;  %v6683_v35 = vpack.c.bf16 %v138_v26, %v138_v26 }
  0x6a   :  { %2050 = vmatpush.bf16.msra.mxu2 %v4060_v47  ;;  %v6147_v30 = vld [vmem:[#allocation5 + $0x84c] sm:$0xf0]  ;;  %v5889_v31 = vld [vmem:[#allocation5 + $0x44] sm:$0xf]  ;;  %v3993_v32 = vld [vmem:[#allocation5 + $0x50] sm:$0xf0]  ;;  %v4268_v36 = vor.u32 %v5957_v24, %v4265_v25 }
  0x6b   :  { %2063 = vmatpush.bf16.msra.mxu3 %v4188_v48  ;;  %v5921_v33 = vld [vmem:[#allocation5 + $0x144] sm:$0xf]  ;;  %v4121_v34 = vld [vmem:[#allocation5 + $0x150] sm:$0xf0]  ;;  %v5016_v37 = vor.u32 %v6147_v30, %v5015_v29  ;;  %v3996_v43 = vor.u32 %v5889_v31, %v3993_v32  ;;  %v4999_v45 = vld [vmem:[#allocation5 + $0x820] sm:$0xf] }
  0x6c   :  { %2025 = vmatpush.bf16.msra.mxu0 %v5064_v59  ;;  %v5953_v38 = vld [vmem:[#allocation5 + $0x244] sm:$0xf]  ;;  %v4249_v42 = vld [vmem:[#allocation5 + $0x250] sm:$0xf0]  ;;  %v4124_v44 = vor.u32 %v5921_v33, %v4121_v34  ;;  %v6143_v46 = vld [vmem:[#allocation5 + $0x82c] sm:$0xf0] }
  0x6d   :  { %2076 = vmatpush.bf16.msrb.mxu1 %v4316_v58  ;;  %v5885_v47 = vld [vmem:[#allocation5 + $0x24] sm:$0xf]  ;;  %v3977_v48 = vld [vmem:[#allocation5 + $0x30] sm:$0xf0]  ;;  %v4252_v52 = vor.u32 %v5953_v38, %v4249_v42  ;;  %v5000_v54 = vor.u32 %v6143_v46, %v4999_v45  ;;  %v4983_v58 = vld [vmem:[#allocation5 + $0x800] sm:$0xf] }
  0x6e   :  { %2051 = vmatpush.bf16.msra.mxu2 %v4044_v62  ;;  %v5917_v49 = vld [vmem:[#allocation5 + $0x124] sm:$0xf]  ;;  %v4105_v51 = vld [vmem:[#allocation5 + $0x130] sm:$0xf0]  ;;  %v3980_v59 = vor.u32 %v5885_v47, %v3977_v48  ;;  %v6139_v61 = vld [vmem:[#allocation5 + $0x80c] sm:$0xf0] }
  0x6f   :  { %2064 = vmatpush.bf16.msra.mxu3 %v4172_v63  ;;  %v5949_v56 = vld [vmem:[#allocation5 + $0x224] sm:$0xf]  ;;  %v4233_v57 = vld [vmem:[#allocation5 + $0x230] sm:$0xf0]  ;;  %v4108_v60 = vor.u32 %v5917_v49, %v4105_v51 }
  0x70   :  { %2026 = vmatpush.bf16.msra.mxu0 %v5048_v8  ;;  %v5881_v62 = vld [vmem:[#allocation5 + $0x4] sm:$0xf]  ;;  %v3961_v63 = vld [vmem:[#allocation5 + $0x10] sm:$0xf0]  ;;  %v4984_v8 = vor.u32 %v6139_v61, %v4983_v58 }
  0x71   :  { %2077 = vmatpush.bf16.msrb.mxu1 %v4300_v7  ;;  %v5913_v0 = vld [vmem:[#allocation5 + $0x104] sm:$0xf]  ;;  %v4089_v1 = vld [vmem:[#allocation5 + $0x110] sm:$0xf0]  ;;  %v4236_v7 = vor.u32 %v5949_v56, %v4233_v57 }
  0x72   :  { %2052 = vmatpush.bf16.msra.mxu2 %v4028_v11  ;;  %v6005_v2 = vld [vmem:[#allocation5 + $0x3e4] sm:$0xf]  ;;  %v4457_v4 = vld [vmem:[#allocation5 + $0x3f0] sm:$0xf0]  ;;  %v4092_v13 = vor.u32 %v5913_v0, %v4089_v1 }
  0x73   :  { %2065 = vmatpush.bf16.msra.mxu3 %v4156_v12  ;;  %v6037_v5 = vld [vmem:[#allocation5 + $0x4e4] sm:$0xf]  ;;  %v4585_v6 = vld [vmem:[#allocation5 + $0x4f0] sm:$0xf0]  ;;  %v3964_v12 = vor.u32 %v5881_v62, %v3961_v63  ;;  %v4460_v18 = vor.u32 %v6005_v2, %v4457_v4 }
  0x74   :  { %2027 = vmatpush.bf16.msra.mxu0 %v5032_v23  ;;  %5109 = vmatmul.msk.bf16.vlgmr.msra.gmra.mxu1 %vm1899_vm2, %v6683_v35  ;;  %v6069_v9 = vld [vmem:[#allocation5 + $0x5e4] sm:$0xf]  ;;  %v4713_v10 = vld [vmem:[#allocation5 + $0x5f0] sm:$0xf0]  ;;  %v4588_v19 = vor.u32 %v6037_v5, %v4585_v6 }
  0x75   :  { %2078 = vmatpush.bf16.msrb.mxu1 %v4284_v21  ;;  %v137_v11 = vld [vmem:[#allocation2 + $0x40] sm:$0xff]  ;;  %v5945_v14 = vld [vmem:[#allocation5 + $0x204] sm:$0xf]  ;;  %v4716_v24 = vor.u32 %v6069_v9, %v4713_v10 }
  0x76   :  { %2053 = vmatpush.bf16.msra.mxu2 %v4012_v27  ;;  %v4217_v15 = vld [vmem:[#allocation5 + $0x210] sm:$0xf0]  ;;  %v6101_v20 = vld [vmem:[#allocation5 + $0x6e4] sm:$0xf]  ;;  %v6687_v25 = vpack.c.bf16 %v137_v11, %v137_v11 }
  0x77   :  { %2066 = vmatpush.bf16.msra.mxu3 %v4140_v28  ;;  %v4841_v21 = vld [vmem:[#allocation5 + $0x6f0] sm:$0xf0]  ;;  %v6001_v23 = vld [vmem:[#allocation5 + $0x3c4] sm:$0xf]  ;;  %v4220_v29 = vor.u32 %v5945_v14, %v4217_v15 }
  0x78   :  { %2028 = vmatpush.bf16.msra.mxu0 %v5016_v37  ;;  %v4441_v26 = vld [vmem:[#allocation5 + $0x3d0] sm:$0xf0]  ;;  %v6033_v27 = vld [vmem:[#allocation5 + $0x4c4] sm:$0xf]  ;;  %v4844_v32 = vor.u32 %v6101_v20, %v4841_v21 }
  0x79   :  { %2079 = vmatpush.bf16.msrb.mxu1 %v4268_v36  ;;  %v4569_v28 = vld [vmem:[#allocation5 + $0x4d0] sm:$0xf0]  ;;  %v6065_v30 = vld [vmem:[#allocation5 + $0x5c4] sm:$0xf]  ;;  %v4444_v33 = vor.u32 %v6001_v23, %v4441_v26 }
  0x7a   :  { %2054 = vmatpush.bf16.msra.mxu2 %v3996_v43  ;;  %v4697_v31 = vld [vmem:[#allocation5 + $0x5d0] sm:$0xf0]  ;;  %v4572_v34 = vor.u32 %v6033_v27, %v4569_v28  ;;  %v6097_v36 = vld [vmem:[#allocation5 + $0x6c4] sm:$0xf] }
  0x7b   :  { %2067 = vmatpush.bf16.msra.mxu3 %v4124_v44  ;;  %v4825_v37 = vld [vmem:[#allocation5 + $0x6d0] sm:$0xf0]  ;;  %v5997_v38 = vld [vmem:[#allocation5 + $0x3a4] sm:$0xf]  ;;  %v4700_v42 = vor.u32 %v6065_v30, %v4697_v31 }
  0x7c   :  { %2029 = vmatpush.bf16.msra.mxu0 %v5000_v54  ;;  %v4425_v43 = vld [vmem:[#allocation5 + $0x3b0] sm:$0xf0]  ;;  %v6029_v44 = vld [vmem:[#allocation5 + $0x4a4] sm:$0xf]  ;;  %v4828_v48 = vor.u32 %v6097_v36, %v4825_v37 }
  0x7d   :  { %2080 = vmatpush.bf16.msrb.mxu1 %v4252_v52  ;;  %v4553_v45 = vld [vmem:[#allocation5 + $0x4b0] sm:$0xf0]  ;;  %v6061_v46 = vld [vmem:[#allocation5 + $0x5a4] sm:$0xf]  ;;  %v4428_v49 = vor.u32 %v5997_v38, %v4425_v43 }
  0x7e   :  { %2055 = vmatpush.bf16.msra.mxu2 %v3980_v59  ;;  %v4681_v47 = vld [vmem:[#allocation5 + $0x5b0] sm:$0xf0]  ;;  %v4556_v51 = vor.u32 %v6029_v44, %v4553_v45  ;;  %v6093_v52 = vld [vmem:[#allocation5 + $0x6a4] sm:$0xf]  ;;  %v1316_v44 = vunpack.c.h.b16 %v6663_v50 }
  0x7f   :  { %2068 = vmatpush.bf16.msra.mxu3 %v4108_v60  ;;  %v4809_v54 = vld [vmem:[#allocation5 + $0x6b0] sm:$0xf0]  ;;  %v5993_v56 = vld [vmem:[#allocation5 + $0x384] sm:$0xf]  ;;  %v4684_v57 = vor.u32 %v6061_v46, %v4681_v47 }
  0x80   :  { %2030 = vmatpush.bf16.msra.mxu0 %v4984_v8  ;;  %v4409_v58 = vld [vmem:[#allocation5 + $0x390] sm:$0xf0]  ;;  %v6025_v59 = vld [vmem:[#allocation5 + $0x484] sm:$0xf]  ;;  %v4812_v63 = vor.u32 %v6093_v52, %v4809_v54 }
  0x81   :  { %2081 = vmatpush.bf16.msrb.mxu1 %v4236_v7  ;;  %v4537_v60 = vld [vmem:[#allocation5 + $0x490] sm:$0xf0]  ;;  %v6057_v61 = vld [vmem:[#allocation5 + $0x584] sm:$0xf]  ;;  %v4412_v0 = vor.u32 %v5993_v56, %v4409_v58 }
  0x82   :  { %2056 = vmatpush.bf16.msra.mxu2 %v3964_v12  ;;  %v4665_v62 = vld [vmem:[#allocation5 + $0x590] sm:$0xf0]  ;;  %v4540_v1 = vor.u32 %v6025_v59, %v4537_v60  ;;  %v6089_v2 = vld [vmem:[#allocation5 + $0x684] sm:$0xf] }
  0x83   :  { %2069 = vmatpush.bf16.msra.mxu3 %v4092_v13  ;;  %2031 = vmatmul.bf16.vlgmr.msra.gmra.mxu0 %v6687_v25  ;;  %v4793_v4 = vld [vmem:[#allocation5 + $0x690] sm:$0xf0]  ;;  %v5989_v5 = vld [vmem:[#allocation5 + $0x364] sm:$0xf]  ;;  %v4668_v6 = vor.u32 %v6057_v61, %v4665_v62  ;;  %v1608_v62 = vpack.c.b16 %v1316_v44, %v1316_v44  ;;  %v4175_v44 = vld [vmem:[#allocation5 + $0x1a8] sm:$0xf] }
  0x84   :  { %2088 = vmatpush.bf16.msrb.mxu0 %v4460_v18  ;;  %v4393_v7 = vld [vmem:[#allocation5 + $0x370] sm:$0xf0]  ;;  %v6021_v8 = vld [vmem:[#allocation5 + $0x464] sm:$0xf]  ;;  %v4796_v12 = vor.u32 %v6089_v2, %v4793_v4 }
  0x85   :  { %2082 = vmatpush.bf16.msrb.mxu1 %v4220_v29  ;;  %2057 = vmatmul.bf16.vlgmr.msra.gmra.mxu2 %v6657_v16  ;;  %v4521_v9 = vld [vmem:[#allocation5 + $0x470] sm:$0xf0]  ;;  %v6053_v10 = vld [vmem:[#allocation5 + $0x564] sm:$0xf]  ;;  %v4396_v13 = vor.u32 %v5989_v5, %v4393_v7 }
  0x86   :  { %2101 = vmatpush.bf16.msrb.mxu2 %v4588_v19  ;;  %2070 = vmatmul.bf16.vlgmr.msra.gmra.mxu3 %v6651_v55  ;;  %v4649_v11 = vld [vmem:[#allocation5 + $0x570] sm:$0xf0]  ;;  %v4524_v14 = vor.u32 %v6021_v8, %v4521_v9  ;;  %v6085_v15 = vld [vmem:[#allocation5 + $0x664] sm:$0xf]  ;;  %v4079_v8 = vld [vmem:[#allocation5 + $0xe8] sm:$0xf] }
  0x87   :  { %2114 = vmatpush.bf16.msrb.mxu3 %v4716_v24  ;;  %v4777_v18 = vld [vmem:[#allocation5 + $0x670] sm:$0xf0]  ;;  %v5985_v19 = vld [vmem:[#allocation5 + $0x344] sm:$0xf]  ;;  %v4652_v20 = vor.u32 %v6053_v10, %v4649_v11  ;;  %v5912_v9 = vld [vmem:[#allocation5 + $0xf4] sm:$0xf0] }
  0x88   :  { %2089 = vmatpush.bf16.msrb.mxu0 %v4444_v33  ;;  %2083 = vmatmul.bf16.vlgmr.msrb.gmra.mxu1 %v6654_v3  ;;  %v4377_v21 = vld [vmem:[#allocation5 + $0x350] sm:$0xf0]  ;;  %v6017_v23 = vld [vmem:[#allocation5 + $0x444] sm:$0xf]  ;;  %v4780_v28 = vor.u32 %v6085_v15, %v4777_v18  ;;  %v4207_v10 = vld [vmem:[#allocation5 + $0x1e8] sm:$0xf] }
  0x89   :  { %2127 = vmatpush.bf16.msra.mxu1 %v4844_v32  ;;  %v4505_v24 = vld [vmem:[#allocation5 + $0x450] sm:$0xf0]  ;;  %v6049_v26 = vld [vmem:[#allocation5 + $0x544] sm:$0xf]  ;;  %v4380_v29 = vor.u32 %v5985_v19, %v4377_v21  ;;  %v4080_v21 = vor.u32 %v5912_v9, %v4079_v8  ;;  %v5928_v9 = vld [vmem:[#allocation5 + $0x174] sm:$0xf0] }
  0x8a   :  { %2102 = vmatpush.bf16.msrb.mxu2 %v4572_v34  ;;  %v4633_v27 = vld [vmem:[#allocation5 + $0x550] sm:$0xf0]  ;;  %v4508_v30 = vor.u32 %v6017_v23, %v4505_v24  ;;  %v6081_v31 = vld [vmem:[#allocation5 + $0x644] sm:$0xf] }
  0x8b   :  { %2115 = vmatpush.bf16.msrb.mxu3 %v4700_v42  ;;  %v4761_v32 = vld [vmem:[#allocation5 + $0x650] sm:$0xf0]  ;;  %v5981_v33 = vld [vmem:[#allocation5 + $0x324] sm:$0xf]  ;;  %v4636_v34 = vor.u32 %v6049_v26, %v4633_v27  ;;  %v4063_v26 = vld [vmem:[#allocation5 + $0xc8] sm:$0xf] }
  0x8c   :  { %2090 = vmatpush.bf16.msrb.mxu0 %v4428_v49  ;;  %v4361_v36 = vld [vmem:[#allocation5 + $0x330] sm:$0xf0]  ;;  %v6013_v37 = vld [vmem:[#allocation5 + $0x424] sm:$0xf]  ;;  %v4764_v45 = vor.u32 %v6081_v31, %v4761_v32  ;;  %v5908_v27 = vld [vmem:[#allocation5 + $0xd4] sm:$0xf0] }
  0x8d   :  { %2128 = vmatpush.bf16.msra.mxu1 %v4828_v48  ;;  %v4489_v38 = vld [vmem:[#allocation5 + $0x430] sm:$0xf0]  ;;  %v6045_v42 = vld [vmem:[#allocation5 + $0x524] sm:$0xf]  ;;  %v4364_v47 = vor.u32 %v5981_v33, %v4361_v36  ;;  %v4064_v36 = vor.u32 %v5908_v27, %v4063_v26 }
  0x8e   :  { %2103 = vmatpush.bf16.msrb.mxu2 %v4556_v51  ;;  %v4617_v43 = vld [vmem:[#allocation5 + $0x530] sm:$0xf0]  ;;  %v6077_v46 = vld [vmem:[#allocation5 + $0x624] sm:$0xf]  ;;  %v4492_v48 = vor.u32 %v6013_v37, %v4489_v38 }
  0x8f   :  { %2116 = vmatpush.bf16.msrb.mxu3 %v4684_v57  ;;  %v4745_v49 = vld [vmem:[#allocation5 + $0x630] sm:$0xf0]  ;;  %v5977_v51 = vld [vmem:[#allocation5 + $0x304] sm:$0xf]  ;;  %v4620_v54 = vor.u32 %v6045_v42, %v4617_v43  ;;  %v4047_v42 = vld [vmem:[#allocation5 + $0xa8] sm:$0xf] }
  0x90   :  { %2091 = vmatpush.bf16.msrb.mxu0 %v4412_v0  ;;  %v4345_v52 = vld [vmem:[#allocation5 + $0x310] sm:$0xf0]  ;;  %v6009_v56 = vld [vmem:[#allocation5 + $0x404] sm:$0xf]  ;;  %v4748_v50 = vor.u32 %v6077_v46, %v4745_v49  ;;  %v5904_v43 = vld [vmem:[#allocation5 + $0xb4] sm:$0xf0] }
  0x91   :  { %2129 = vmatpush.bf16.msra.mxu1 %v4812_v63  ;;  %v4473_v57 = vld [vmem:[#allocation5 + $0x410] sm:$0xf0]  ;;  %v6041_v58 = vld [vmem:[#allocation5 + $0x504] sm:$0xf]  ;;  %v5936_v46 = vld [vmem:[#allocation5 + $0x1b4] sm:$0xf0] }
  0x92   :  { %2104 = vmatpush.bf16.msrb.mxu2 %v4540_v1  ;;  %v4601_v59 = vld [vmem:[#allocation5 + $0x510] sm:$0xf0]  ;;  %v6133_v60 = vld [vmem:[#allocation5 + $0x7e4] sm:$0xf]  ;;  %v4348_v1 = vor.u32 %v5977_v51, %v4345_v52  ;;  %v4476_v2 = vor.u32 %v6009_v56, %v4473_v57  ;;  %v4048_v52 = vor.u32 %v5904_v43, %v4047_v42  ;;  %v4031_v57 = vld [vmem:[#allocation5 + $0x88] sm:$0xf] }
  0x93   :  { %2117 = vmatpush.bf16.msrb.mxu3 %v4668_v6  ;;  %v4969_v61 = vld [vmem:[#allocation5 + $0x7f0] sm:$0xf0]  ;;  %v6165_v63 = vld [vmem:[#allocation5 + $0x8e4] sm:$0xf]  ;;  %v4604_v6 = vor.u32 %v6041_v58, %v4601_v59  ;;  %v5900_v58 = vld [vmem:[#allocation5 + $0x94] sm:$0xf0] }
  0x94   :  { %2092 = vmatpush.bf16.msrb.mxu0 %v4396_v13  ;;  %v5097_v0 = vld [vmem:[#allocation5 + $0x8f0] sm:$0xf0]  ;;  %v6073_v4 = vld [vmem:[#allocation5 + $0x604] sm:$0xf]  ;;  %v4972_v7 = vor.u32 %v6133_v60, %v4969_v61  ;;  %v5944_v13 = vld [vmem:[#allocation5 + $0x1f4] sm:$0xf0] }
  0x95   :  { %2130 = vmatpush.bf16.msra.mxu1 %v4796_v12  ;;  %v4729_v5 = vld [vmem:[#allocation5 + $0x610] sm:$0xf0]  ;;  %v5100_v11 = vor.u32 %v6165_v63, %v5097_v0  ;;  %v1911_v12 = vand.u32 %v6668_v22, %v1608_v62  ;;  %v6161_v19 = vld [vmem:[#allocation5 + $0x8c4] sm:$0xf]  ;;  %v4208_v23 = vor.u32 %v5944_v13, %v4207_v10  ;;  %v4159_v59 = vld [vmem:[#allocation5 + $0x188] sm:$0xf] }
  0x96   :  { %2105 = vmatpush.bf16.msrb.mxu2 %v4524_v14  ;;  %v6129_v14 = vld [vmem:[#allocation5 + $0x7c4] sm:$0xf]  ;;  %v4953_v15 = vld [vmem:[#allocation5 + $0x7d0] sm:$0xf0]  ;;  %v4732_v18 = vor.u32 %v6073_v4, %v4729_v5  ;;  %v5932_v61 = vld [vmem:[#allocation5 + $0x194] sm:$0xf0] }
  0x97   :  { %2118 = vmatpush.bf16.msrb.mxu3 %v4652_v20  ;;  %v5081_v20 = vld [vmem:[#allocation5 + $0x8d0] sm:$0xf0]  ;;  %v4956_v24 = vor.u32 %v6129_v14, %v4953_v15  ;;  %v6125_v31 = vld [vmem:[#allocation5 + $0x7a4] sm:$0xf]  ;;  %v4015_v5 = vld [vmem:[#allocation5 + $0x68] sm:$0xf] }
  0x98   :  { %2093 = vmatpush.bf16.msrb.mxu0 %v4380_v29  ;;  %v5084_v29 = vor.u32 %v6161_v19, %v5081_v20  ;;  %v4937_v32 = vld [vmem:[#allocation5 + $0x7b0] sm:$0xf0]  ;;  %v6157_v33 = vld [vmem:[#allocation5 + $0x8a4] sm:$0xf]  ;;  %v3999_v19 = vld [vmem:[#allocation5 + $0x48] sm:$0xf] }
  0x99   :  { %2131 = vmatpush.bf16.msra.mxu1 %v4780_v28  ;;  %v4191_v28 = vld [vmem:[#allocation5 + $0x1c8] sm:$0xf]  ;;  %v4940_v38 = vor.u32 %v6125_v31, %v4937_v32  ;;  %v6153_v49 = vld [vmem:[#allocation5 + $0x884] sm:$0xf]  ;;  %v5049_v51 = vld [vmem:[#allocation5 + $0x890] sm:$0xf0] }
  0x9a   :  { %2106 = vmatpush.bf16.msrb.mxu2 %v4508_v30  ;;  %v5940_v30 = vld [vmem:[#allocation5 + $0x1d4] sm:$0xf0]  ;;  %v5052_v60 = vor.u32 %v6153_v49, %v5049_v51  ;;  %v6117_v62 = vld [vmem:[#allocation5 + $0x764] sm:$0xf]  ;;  %v5033_v0 = vld [vmem:[#allocation5 + $0x870] sm:$0xf0] }
  0x9b   :  { %2119 = vmatpush.bf16.msrb.mxu3 %v4636_v34  ;;  %v5065_v34 = vld [vmem:[#allocation5 + $0x8b0] sm:$0xf0]  ;;  %v4192_v37 = vor.u32 %v5940_v30, %v4191_v28  ;;  %v6149_v63 = vld [vmem:[#allocation5 + $0x864] sm:$0xf]  ;;  %v5892_v20 = vld [vmem:[#allocation5 + $0x54] sm:$0xf0] }
  0x9c   :  { %2094 = vmatpush.bf16.msrb.mxu0 %v4364_v47  ;;  %v6121_v47 = vld [vmem:[#allocation5 + $0x784] sm:$0xf]  ;;  %v5036_v8 = vor.u32 %v6149_v63, %v5033_v0  ;;  %v5017_v13 = vld [vmem:[#allocation5 + $0x850] sm:$0xf0]  ;;  %v4000_v30 = vor.u32 %v5892_v20, %v3999_v19  ;;  %v3983_v31 = vld [vmem:[#allocation5 + $0x28] sm:$0xf] }
  0x9d   :  { %2132 = vmatpush.bf16.msra.mxu1 %v4764_v45  ;;  %v5068_v45 = vor.u32 %v6157_v33, %v5065_v34  ;;  %v6113_v10 = vld [vmem:[#allocation5 + $0x744] sm:$0xf]  ;;  %v4873_v27 = vld [vmem:[#allocation5 + $0x730] sm:$0xf0]  ;;  %v5888_v34 = vld [vmem:[#allocation5 + $0x34] sm:$0xf0] }
  0x9e   :  { %2107 = vmatpush.bf16.msrb.mxu2 %v4492_v48  ;;  %v4921_v48 = vld [vmem:[#allocation5 + $0x790] sm:$0xf0]  ;;  %v6109_v26 = vld [vmem:[#allocation5 + $0x724] sm:$0xf]  ;;  %v4463_v49 = vld [vmem:[#allocation5 + $0x3e8] sm:$0xf] }
  0x9f   :  { %2120 = vmatpush.bf16.msrb.mxu3 %v4620_v54  ;;  %v4176_v54 = vor.u32 %v5936_v46, %v4175_v44  ;;  %v4924_v56 = vor.u32 %v6121_v47, %v4921_v48  ;;  %v6141_v28 = vld [vmem:[#allocation5 + $0x824] sm:$0xf]  ;;  %v4876_v33 = vor.u32 %v6109_v26, %v4873_v27  ;;  %v4857_v43 = vld [vmem:[#allocation5 + $0x710] sm:$0xf0]  ;;  %v4335_v46 = vld [vmem:[#allocation5 + $0x2e8] sm:$0xf]  ;;  %v3984_v48 = vor.u32 %v5888_v34, %v3983_v31 }
  0xa0   :  { %2095 = vmatpush.bf16.msrb.mxu0 %v4348_v1  ;;  %v4032_v1 = vor.u32 %v5900_v58, %v4031_v57  ;;  %v6105_v42 = vld [vmem:[#allocation5 + $0x704] sm:$0xf]  ;;  %v5976_v47 = vld [vmem:[#allocation5 + $0x2f4] sm:$0xf0]  ;;  %v4095_v58 = vld [vmem:[#allocation5 + $0x108] sm:$0xf] }
  0xa1   :  { %2133 = vmatpush.bf16.msra.mxu1 %v4748_v50  ;;  %v4905_v50 = vld [vmem:[#allocation5 + $0x770] sm:$0xf0]  ;;  %v6137_v44 = vld [vmem:[#allocation5 + $0x804] sm:$0xf]  ;;  %v6008_v51 = vld [vmem:[#allocation5 + $0x3f4] sm:$0xf0] }
  0xa2   :  { %2108 = vmatpush.bf16.msrb.mxu2 %v4476_v2  ;;  %v4160_v2 = vor.u32 %v5932_v61, %v4159_v59  ;;  %v4908_v4 = vor.u32 %v6117_v62, %v4905_v50  ;;  %v5884_v57 = vld [vmem:[#allocation5 + $0x14] sm:$0xf0]  ;;  %v4591_v62 = vld [vmem:[#allocation5 + $0x4e8] sm:$0xf]  ;;  %v4464_v63 = vor.u32 %v6008_v51, %v4463_v49 }
  0xa3   :  { %2121 = vmatpush.bf16.msrb.mxu3 %v4604_v6  ;;  %2096 = vmatmul.bf16.vlgmr.msrb.gmra.mxu0 %v6659_v17  ;;  %v5896_v6 = vld [vmem:[#allocation5 + $0x74] sm:$0xf0]  ;;  %v4719_v0 = vld [vmem:[#allocation5 + $0x5e8] sm:$0xf] }
  0xa4   :  { %2140 = vmatpush.bf16.msra.mxu0 %v4972_v7  ;;  %v4143_v7 = vld [vmem:[#allocation5 + $0x168] sm:$0xf]  ;;  %v4016_v14 = vor.u32 %v5896_v6, %v4015_v5  ;;  %v5916_v61 = vld [vmem:[#allocation5 + $0x114] sm:$0xf0] }
  0xa5   :  { %2134 = vmatpush.bf16.msra.mxu1 %v4732_v18  ;;  %2109 = vmatmul.bf16.vlgmr.msrb.gmra.mxu2 %v6675_v41  ;;  %v4144_v15 = vor.u32 %v5928_v9, %v4143_v7  ;;  %v6040_v50 = vld [vmem:[#allocation5 + $0x4f4] sm:$0xf0]  ;;  %v4447_v6 = vld [vmem:[#allocation5 + $0x3c8] sm:$0xf] }
  0xa6   :  { %2153 = vmatpush.bf16.msra.mxu2 %v5100_v11  ;;  %2122 = vmatmul.bf16.vlgmr.msrb.gmra.mxu3 %v6673_v40  ;;  %v4889_v11 = vld [vmem:[#allocation5 + $0x750] sm:$0xf0]  ;;  %v5972_v5 = vld [vmem:[#allocation5 + $0x2d4] sm:$0xf0]  ;;  %v4592_v9 = vor.u32 %v6040_v50, %v4591_v62  ;;  %v4303_v19 = vld [vmem:[#allocation5 + $0x2a8] sm:$0xf] }
  0xa7   :  { %2173 = vmatpush.bf16.msra.mxu3 %v1911_v12  ;;  %v6145_v12 = vld [vmem:[#allocation5 + $0x844] sm:$0xf]  ;;  %v4892_v18 = vor.u32 %v6113_v10, %v4889_v11  ;;  %v6004_v7 = vld [vmem:[#allocation5 + $0x3d4] sm:$0xf0]  ;;  %v4575_v11 = vld [vmem:[#allocation5 + $0x4c8] sm:$0xf] }
  0xa8   :  { %2141 = vmatpush.bf16.msra.mxu0 %v4956_v24  ;;  %2135 = vmatmul.bf16.vlgmr.msra.gmra.mxu1 %v6671_v39  ;;  %v5924_v24 = vld [vmem:[#allocation5 + $0x154] sm:$0xf0]  ;;  %v4559_v27 = vld [vmem:[#allocation5 + $0x4a8] sm:$0xf] }
  0xa9   :  { %2179 = vmatpush.bf16.msrb.mxu1 %v4080_v21  ;;  %v4127_v21 = vld [vmem:[#allocation5 + $0x148] sm:$0xf]  ;;  %v5968_v20 = vld [vmem:[#allocation5 + $0x2b4] sm:$0xf0] }
  0xaa   :  { %2154 = vmatpush.bf16.msra.mxu2 %v5084_v29  ;;  %v5001_v29 = vld [vmem:[#allocation5 + $0x830] sm:$0xf0]  ;;  %v4128_v32 = vor.u32 %v5924_v24, %v4127_v21  ;;  %v4431_v21 = vld [vmem:[#allocation5 + $0x3a8] sm:$0xf]  ;;  %v5964_v34 = vld [vmem:[#allocation5 + $0x294] sm:$0xf0] }
  0xab   :  { %2192 = vmatpush.bf16.msrb.mxu3 %v4208_v23  ;;  %v5020_v23 = vor.u32 %v6145_v12, %v5017_v13  ;;  %v6036_v12 = vld [vmem:[#allocation5 + $0x4d4] sm:$0xf0]  ;;  %v4687_v31 = vld [vmem:[#allocation5 + $0x5a8] sm:$0xf] }
  0xac   :  { %2142 = vmatpush.bf16.msra.mxu0 %v4940_v38  ;;  %v5004_v38 = vor.u32 %v6141_v28, %v5001_v29  ;;  %v4576_v24 = vor.u32 %v6036_v12, %v4575_v11  ;;  %v6032_v28 = vld [vmem:[#allocation5 + $0x4b4] sm:$0xf0]  ;;  %v4304_v29 = vor.u32 %v5968_v20, %v4303_v19  ;;  %v4271_v49 = vld [vmem:[#allocation5 + $0x268] sm:$0xf] }
  0xad   :  { %2180 = vmatpush.bf16.msrb.mxu1 %v4064_v36  ;;  %v4111_v36 = vld [vmem:[#allocation5 + $0x128] sm:$0xf] }
  0xae   :  { %2155 = vmatpush.bf16.msra.mxu2 %v5068_v45  ;;  %v4985_v45 = vld [vmem:[#allocation5 + $0x810] sm:$0xf0]  ;;  %v4655_v62 = vld [vmem:[#allocation5 + $0x568] sm:$0xf] }
  0xaf   :  { %2193 = vmatpush.bf16.msrb.mxu3 %v4192_v37  ;;  %v5920_v37 = vld [vmem:[#allocation5 + $0x134] sm:$0xf0]  ;;  %v4988_v59 = vor.u32 %v6137_v44, %v4985_v45  ;;  %v4639_v11 = vld [vmem:[#allocation5 + $0x548] sm:$0xf] }
  0xb0   :  { %2143 = vmatpush.bf16.msra.mxu0 %v4924_v56  ;;  %v3967_v56 = vld [vmem:[#allocation5 + $0x8] sm:$0xf]  ;;  %v6028_v44 = vld [vmem:[#allocation5 + $0x494] sm:$0xf0] }
  0xb1   :  { %2181 = vmatpush.bf16.msrb.mxu1 %v4048_v52  ;;  %v4112_v52 = vor.u32 %v5920_v37, %v4111_v36  ;;  %v4415_v36 = vld [vmem:[#allocation5 + $0x388] sm:$0xf]  ;;  %v5996_v37 = vld [vmem:[#allocation5 + $0x394] sm:$0xf0] }
  0xb2   :  { %2156 = vmatpush.bf16.msra.mxu2 %v5052_v60  ;;  %v4336_v60 = vor.u32 %v5976_v47, %v4335_v46  ;;  %v4416_v46 = vor.u32 %v5996_v37, %v4415_v36  ;;  %v4671_v47 = vld [vmem:[#allocation5 + $0x588] sm:$0xf]  ;;  %v6048_v37 = vld [vmem:[#allocation5 + $0x534] sm:$0xf0] }
  0xb3   :  { %2194 = vmatpush.bf16.msrb.mxu3 %v4176_v54  ;;  %v4860_v54 = vor.u32 %v6105_v42, %v4857_v43  ;;  %v4543_v43 = vld [vmem:[#allocation5 + $0x488] sm:$0xf] }
  0xb4   :  { %2144 = vmatpush.bf16.msra.mxu0 %v4908_v4  ;;  %v3968_v4 = vor.u32 %v5884_v57, %v3967_v56  ;;  %v5992_v56 = vld [vmem:[#allocation5 + $0x374] sm:$0xf0]  ;;  %v6705_v57 = vld [vmem:[#allocation7] sm:$0xf] }
  0xb5   :  { %2182 = vmatpush.bf16.msrb.mxu1 %v4032_v1  ;;  %v6072_v1 = vld [vmem:[#allocation5 + $0x5f4] sm:$0xf0] }
  0xb6   :  { %2157 = vmatpush.bf16.msra.mxu2 %v5036_v8  ;;  %5110 = vmatmul.msk.bf16.vlgmr.msra.gmra.mxu3 %vm1899_vm2, %v6683_v35  ;;  %v4096_v8 = vor.u32 %v5916_v61, %v4095_v58  ;;  %v4720_v10 = vor.u32 %v6072_v1, %v4719_v0  ;;  %v4544_v58 = vor.u32 %v6028_v44, %v4543_v43  ;;  %v6024_v61 = vld [vmem:[#allocation5 + $0x474] sm:$0xf0]  ;;  %v4255_v1 = vld [vmem:[#allocation5 + $0x248] sm:$0xf] }
  0xb7   :  { %2195 = vmatpush.bf16.msrb.mxu3 %v4160_v2  ;;  %v4319_v2 = vld [vmem:[#allocation5 + $0x2c8] sm:$0xf]  ;;  %v6056_v0 = vld [vmem:[#allocation5 + $0x574] sm:$0xf0] }
  0xb8   :  { %2145 = vmatpush.bf16.msra.mxu0 %v4892_v18  ;;  %v4320_v13 = vor.u32 %v5972_v5, %v4319_v2  ;;  %v6068_v18 = vld [vmem:[#allocation5 + $0x5d4] sm:$0xf0] }
  0xb9   :  { %2183 = vmatpush.bf16.msrb.mxu1 %v4016_v14  ;;  %v4448_v14 = vor.u32 %v6004_v7, %v4447_v6  ;;  %v5956_v2 = vld [vmem:[#allocation5 + $0x254] sm:$0xf0]  ;;  %v441_v6 = vperm.slane %v6705_v57, 0 }
  0xba   :  { %2158 = vmatpush.bf16.msra.mxu2 %v5020_v23  ;;  %v6000_v23 = vld [vmem:[#allocation5 + $0x3b4] sm:$0xf0]  ;;  %v4256_v12 = vor.u32 %v5956_v2, %v4255_v1 }
  0xbb   :  { %2196 = vmatpush.bf16.msrb.mxu3 %v4144_v15  ;;  %v4703_v15 = vld [vmem:[#allocation5 + $0x5c8] sm:$0xf]  ;;  %v5988_v5 = vld [vmem:[#allocation5 + $0x354] sm:$0xf0] }
  0xbc   :  { %2146 = vmatpush.bf16.msra.mxu0 %v4876_v33  ;;  %v4704_v26 = vor.u32 %v6068_v18, %v4703_v15  ;;  %v4287_v33 = vld [vmem:[#allocation5 + $0x288] sm:$0xf]  ;;  %v5952_v18 = vld [vmem:[#allocation5 + $0x234] sm:$0xf0] }
  0xbd   :  { %2184 = vmatpush.bf16.msrb.mxu1 %v4000_v30  ;;  %v4432_v30 = vor.u32 %v6000_v23, %v4431_v21  ;;  %v4288_v45 = vor.u32 %v5964_v34, %v4287_v33  ;;  %v4239_v15 = vld [vmem:[#allocation5 + $0x228] sm:$0xf]  ;;  %v5984_v23 = vld [vmem:[#allocation5 + $0x334] sm:$0xf0] }
  0xbe   :  { %2159 = vmatpush.bf16.msra.mxu2 %v5004_v38  ;;  %v4560_v38 = vor.u32 %v6032_v28, %v4559_v27  ;;  %v4367_v21 = vld [vmem:[#allocation5 + $0x328] sm:$0xf]  ;;  %v4240_v34 = vor.u32 %v5952_v18, %v4239_v15  ;;  %v5974_v18 = vld [vmem:[#allocation5 + $0x2ec] sm:$0xf] }
  0xbf   :  { %2197 = vmatpush.bf16.msrb.mxu3 %v4128_v32  ;;  %v6064_v32 = vld [vmem:[#allocation5 + $0x5b4] sm:$0xf0]  ;;  %v1941_v51 = vpop.f32.mrf.mxu1  ;;  %v4368_v36 = vor.u32 %v5984_v23, %v4367_v21 }
  0xc0   :  { %2147 = vmatpush.bf16.msra.mxu0 %v4860_v54  ;;  %v4688_v42 = vor.u32 %v6064_v32, %v4687_v31  ;;  %v4399_v54 = vld [vmem:[#allocation5 + $0x368] sm:$0xf]  ;;  %v6016_v31 = vld [vmem:[#allocation5 + $0x434] sm:$0xf0] }
  0xc1   :  { %2185 = vmatpush.bf16.msrb.mxu1 %v3984_v48  ;;  %v6060_v48 = vld [vmem:[#allocation5 + $0x594] sm:$0xf0]  ;;  %v4623_v32 = vld [vmem:[#allocation5 + $0x528] sm:$0xf] }
  0xc2   :  { %2160 = vmatpush.bf16.msra.mxu2 %v4988_v59  ;;  %v4672_v59 = vor.u32 %v6060_v48, %v4671_v47  ;;  %v4847_v47 = vld [vmem:[#allocation5 + $0x6e8] sm:$0xf] }
  0xc3   :  { %2198 = vmatpush.bf16.msrb.mxu3 %v4112_v52  ;;  %2148 = vmatmul.bf16.vlgmr.msra.gmra.mxu0 %v6678_v53  ;;  %v5960_v52 = vld [vmem:[#allocation5 + $0x274] sm:$0xf0] }
  0xc4   :  { %2205 = vmatpush.bf16.msrb.mxu0 %v4336_v60  ;;  %v4527_v60 = vld [vmem:[#allocation5 + $0x468] sm:$0xf]  ;;  %v4272_v50 = vor.u32 %v5960_v52, %v4271_v49  ;;  %v6104_v49 = vld [vmem:[#allocation5 + $0x6f4] sm:$0xf0] }
  0xc5   :  { %2186 = vmatpush.bf16.msrb.mxu1 %v3968_v4  ;;  %2161 = vmatmul.bf16.vlgmr.msra.gmra.mxu2 %v6687_v25  ;;  %v4383_v4 = vld [vmem:[#allocation5 + $0x348] sm:$0xf]  ;;  %v4528_v7 = vor.u32 %v6024_v61, %v4527_v60  ;;  %v4848_v2 = vor.u32 %v6104_v49, %v4847_v47  ;;  %v6124_v47 = vld [vmem:[#allocation5 + $0x794] sm:$0xf0] }
  0xc6   :  { %2218 = vmatpush.bf16.msrb.mxu2 %v4464_v63  ;;  %v4400_v63 = vor.u32 %v5992_v56, %v4399_v54  ;;  %v4975_v52 = vld [vmem:[#allocation5 + $0x7e8] sm:$0xf]  ;;  %v6136_v54 = vld [vmem:[#allocation5 + $0x7f4] sm:$0xf0]  ;;  %v4624_v56 = vor.u32 %v6048_v37, %v4623_v32 }
  0xc7   :  { %2199 = vmatpush.bf16.msrb.mxu3 %v4096_v8  ;;  %v4656_v8 = vor.u32 %v6056_v0, %v4655_v62  ;;  %v1943_v20 = vpop.f32.mrf.mxu1  ;;  %v1967_v44 = vpop.f32.mrf.mxu3  ;;  %v6012_v62 = vld [vmem:[#allocation5 + $0x414] sm:$0xf0] }
  0xc8   :  { %2206 = vmatpush.bf16.msrb.mxu0 %v4320_v13  ;;  %2187 = vmatmul.bf16.vlgmr.msrb.gmra.mxu1 %v6657_v16  ;;  %v4384_v13 = vor.u32 %v5988_v5, %v4383_v4  ;;  %v4976_v4 = vor.u32 %v6136_v54, %v4975_v52  ;;  %v5103_v5 = vld [vmem:[#allocation5 + $0x8e8] sm:$0xf]  ;;  %v5966_v52 = vld [vmem:[#allocation5 + $0x2ac] sm:$0xf]  ;;  %v4305_v54 = vld [vmem:[#allocation5 + $0x2b8] sm:$0xf0] }
  0xc9   :  { %2231 = vmatpush.bf16.msra.mxu1 %v4592_v9  ;;  %v4511_v9 = vld [vmem:[#allocation5 + $0x448] sm:$0xf] }
  0xca   :  { %2219 = vmatpush.bf16.msrb.mxu2 %v4448_v14  ;;  %2200 = vmatmul.bf16.vlgmr.msrb.gmra.mxu3 %v6651_v55  ;;  %v6052_v14 = vld [vmem:[#allocation5 + $0x554] sm:$0xf0] }
  0xcb   :  { %2244 = vmatpush.bf16.msra.mxu3 %v4720_v10  ;;  %v6020_v10 = vld [vmem:[#allocation5 + $0x454] sm:$0xf0] }
  0xcc   :  { %2207 = vmatpush.bf16.msrb.mxu0 %v4304_v29  ;;  %v1928_v19 = vpop.f32.mrf.mxu0  ;;  %v4512_v28 = vor.u32 %v6020_v10, %v4511_v9  ;;  %v4640_v29 = vor.u32 %v6052_v14, %v4639_v11  ;;  %v4959_v9 = vld [vmem:[#allocation5 + $0x7c8] sm:$0xf]  ;;  %v6132_v10 = vld [vmem:[#allocation5 + $0x7d4] sm:$0xf0] }
  0xcd   :  { %2232 = vmatpush.bf16.msra.mxu1 %v4576_v24  ;;  %v1929_v24 = vadd.f32 %v1928_v19, %v441_v6  ;;  %v6168_v6 = vld [vmem:[#allocation5 + $0x8f4] sm:$0xf0]  ;;  %v4337_v19 = vld [vmem:[#allocation5 + $0x2f8] sm:$0xf0]  ;;  %v4960_v23 = vor.u32 %v6132_v10, %v4959_v9  ;;  %v5039_v10 = vld [vmem:[#allocation5 + $0x868] sm:$0xf] }
  0xce   :  { %2220 = vmatpush.bf16.msrb.mxu2 %v4432_v30  ;;  %v4495_v30 = vld [vmem:[#allocation5 + $0x428] sm:$0xf]  ;;  %v5104_v14 = vor.u32 %v6168_v6, %v5103_v5  ;;  %v4340_v32 = vor.u32 %v5974_v18, %v4337_v19  ;;  %v5962_v6 = vld [vmem:[#allocation5 + $0x28c] sm:$0xf]  ;;  %v6116_v18 = vld [vmem:[#allocation5 + $0x754] sm:$0xf0] }
  0xcf   :  { %2245 = vmatpush.bf16.msra.mxu3 %v4704_v26  ;;  %v6708_v26 = vld [vmem:[#allocation5 + $0x908] sm:$0xff]  ;;  %v1942_v33 = vadd.f32 %v1941_v51, %v1929_v24  ;;  %v4496_v51 = vor.u32 %v6016_v31, %v4495_v30  ;;  %v1969_v20 = vpop.f32.mrf.mxu3  ;;  %v6128_v31 = vld [vmem:[#allocation5 + $0x7b4] sm:$0xf0] }
  0xd0   :  { %2208 = vmatpush.bf16.msrb.mxu0 %v4288_v45  ;;  %v1954_v27 = vpop.f32.mrf.mxu2  ;;  %v1317_v43 = vunpack.c.l.b16 %v6708_v26  ;;  %v4351_v45 = vld [vmem:[#allocation5 + $0x308] sm:$0xf] }
  0xd1   :  { %2233 = vmatpush.bf16.msra.mxu1 %v4560_v38  ;;  %v4223_v38 = vld [vmem:[#allocation5 + $0x208] sm:$0xf]  ;;  %v1955_v48 = vadd.f32 %v1954_v27, %v1942_v33  ;;  %v6164_v27 = vld [vmem:[#allocation5 + $0x8d4] sm:$0xf0] }
  0xd2   :  { %2221 = vmatpush.bf16.msrb.mxu2 %v4416_v46  ;;  %v5980_v46 = vld [vmem:[#allocation5 + $0x314] sm:$0xf0]  ;;  %v1609_v0 = vpack.c.b16 %v1317_v43, %v1317_v43  ;;  %v5087_v24 = vld [vmem:[#allocation5 + $0x8c8] sm:$0xf] }
  0xd3   :  { %2246 = vmatpush.bf16.msra.mxu3 %v4688_v42  ;;  %v5948_v42 = vld [vmem:[#allocation5 + $0x214] sm:$0xf0]  ;;  %v4352_v61 = vor.u32 %v5980_v46, %v4351_v45  ;;  %v4943_v30 = vld [vmem:[#allocation5 + $0x7a8] sm:$0xf]  ;;  %v5088_v33 = vor.u32 %v6164_v27, %v5087_v24 }
  0xd4   :  { %2209 = vmatpush.bf16.msrb.mxu0 %v4272_v50  ;;  %v4224_v60 = vor.u32 %v5948_v42, %v4223_v38  ;;  %v4607_v50 = vld [vmem:[#allocation5 + $0x508] sm:$0xf]  ;;  %v1930_v1 = vpop.f32.mrf.mxu0  ;;  %v1914_v15 = vand.u32 %v6668_v22, %v1609_v0  ;;  %v4944_v38 = vor.u32 %v6128_v31, %v4943_v30  ;;  %v6160_v43 = vld [vmem:[#allocation5 + $0x8b4] sm:$0xf0]  ;;  %v4308_v0 = vor.u32 %v5966_v52, %v4305_v54 }
  0xd5   :  { %2234 = vmatpush.bf16.msra.mxu1 %v4544_v58  ;;  %v4479_v58 = vld [vmem:[#allocation5 + $0x408] sm:$0xf]  ;;  %v6092_v45 = vld [vmem:[#allocation5 + $0x694] sm:$0xf0] }
  0xd6   :  { %2222 = vmatpush.bf16.msrb.mxu2 %v4400_v63  ;;  %v6044_v63 = vld [vmem:[#allocation5 + $0x514] sm:$0xf0]  ;;  %v5071_v42 = vld [vmem:[#allocation5 + $0x8a8] sm:$0xf] }
  0xd7   :  { %2247 = vmatpush.bf16.msra.mxu3 %v4672_v59  ;;  %v6711_v59 = vadd.f32 %v1967_v44, %v1955_v48  ;;  %v4799_v44 = vld [vmem:[#allocation5 + $0x688] sm:$0xf]  ;;  %v5072_v49 = vor.u32 %v6160_v43, %v5071_v42  ;;  %v6148_v30 = vld [vmem:[#allocation5 + $0x854] sm:$0xf0] }
  0xd8   :  { %2210 = vmatpush.bf16.msrb.mxu0 %v4256_v12  ;;  %v1956_v11 = vpop.f32.mrf.mxu2  ;;  %v4480_v12 = vor.u32 %v6012_v62, %v4479_v58  ;;  %v4927_v46 = vld [vmem:[#allocation5 + $0x788] sm:$0xf]  ;;  %v6088_v62 = vld [vmem:[#allocation5 + $0x674] sm:$0xf0] }
  0xd9   :  { %2235 = vmatpush.bf16.msra.mxu1 %v4528_v7  ;;  %v4831_v7 = vld [vmem:[#allocation5 + $0x6c8] sm:$0xf]  ;;  %v6152_v11 = vld [vmem:[#allocation5 + $0x874] sm:$0xf0] }
  0xda   :  { %2223 = vmatpush.bf16.msrb.mxu2 %v4384_v13  ;;  %v4608_v13 = vor.u32 %v6044_v63, %v4607_v50  ;;  %v5055_v58 = vld [vmem:[#allocation5 + $0x888] sm:$0xf]  ;;  %v6120_v63 = vld [vmem:[#allocation5 + $0x774] sm:$0xf0]  ;;  %v5040_v20 = vor.u32 %v6152_v11, %v5039_v10  ;;  %v6006_v11 = vld [vmem:[#allocation5 + $0x3ec] sm:$0xf] }
  0xdb   :  { %2248 = vmatpush.bf16.msra.mxu3 %v4656_v8  ;;  %v6100_v8 = vld [vmem:[#allocation5 + $0x6d4] sm:$0xf0]  ;;  %v4911_v50 = vld [vmem:[#allocation5 + $0x768] sm:$0xf] }
  0xdc   :  { %2211 = vmatpush.bf16.msrb.mxu0 %v4240_v34  ;;  %v4832_v21 = vor.u32 %v6100_v8, %v4831_v7  ;;  %v5970_v34 = vld [vmem:[#allocation5 + $0x2cc] sm:$0xf]  ;;  %v4289_v7 = vld [vmem:[#allocation5 + $0x298] sm:$0xf0]  ;;  %v4912_v9 = vor.u32 %v6120_v63, %v4911_v50  ;;  %v4751_v31 = vld [vmem:[#allocation5 + $0x628] sm:$0xf] }
  0xdd   :  { %2236 = vmatpush.bf16.msra.mxu1 %v4512_v28  ;;  %v4815_v28 = vld [vmem:[#allocation5 + $0x6a8] sm:$0xf]  ;;  %v4292_v19 = vor.u32 %v5962_v6, %v4289_v7  ;;  %v6144_v52 = vld [vmem:[#allocation5 + $0x834] sm:$0xf0]  ;;  %v5942_v50 = vld [vmem:[#allocation5 + $0x1ec] sm:$0xf] }
  0xde   :  { %2224 = vmatpush.bf16.msrb.mxu2 %v4368_v36  ;;  %v4321_v36 = vld [vmem:[#allocation5 + $0x2d8] sm:$0xf0]  ;;  %v4735_v54 = vld [vmem:[#allocation5 + $0x608] sm:$0xf] }
  0xdf   :  { %2249 = vmatpush.bf16.msra.mxu3 %v4640_v29  ;;  %v6096_v29 = vld [vmem:[#allocation5 + $0x6b4] sm:$0xf0]  ;;  %v4324_v48 = vor.u32 %v5970_v34, %v4321_v36  ;;  %v4209_v63 = vld [vmem:[#allocation5 + $0x1f8] sm:$0xf0]  ;;  %v4991_v7 = vld [vmem:[#allocation5 + $0x808] sm:$0xf] }
  0xe0   :  { %2212 = vmatpush.bf16.msrb.mxu0 %v4224_v60  ;;  %v4816_v37 = vor.u32 %v6096_v29, %v4815_v28  ;;  %v6156_v60 = vld [vmem:[#allocation5 + $0x894] sm:$0xf0]  ;;  %v5023_v29 = vld [vmem:[#allocation5 + $0x848] sm:$0xf]  ;;  %v4212_v10 = vor.u32 %v5942_v50, %v4209_v63  ;;  %v6094_v63 = vld [vmem:[#allocation5 + $0x6ac] sm:$0xf] }
  0xe1   :  { %2237 = vmatpush.bf16.msra.mxu1 %v4496_v51  ;;  %v4800_v51 = vor.u32 %v6092_v45, %v4799_v44  ;;  %v6112_v34 = vld [vmem:[#allocation5 + $0x734] sm:$0xf0]  ;;  %v5024_v43 = vor.u32 %v6148_v30, %v5023_v29  ;;  %v5954_v44 = vld [vmem:[#allocation5 + $0x24c] sm:$0xf]  ;;  %v4257_v45 = vld [vmem:[#allocation5 + $0x258] sm:$0xf0] }
  0xe2   :  { %2225 = vmatpush.bf16.msrb.mxu2 %v4352_v61  ;;  %v4783_v61 = vld [vmem:[#allocation5 + $0x668] sm:$0xf]  ;;  %v4849_v29 = vld [vmem:[#allocation5 + $0x6f8] sm:$0xf0] }
  0xe3   :  { %2250 = vmatpush.bf16.msra.mxu3 %v4624_v56  ;;  %2213 = vmatmul.bf16.vlgmr.msrb.gmra.mxu0 %v6654_v3  ;;  %v4928_v56 = vor.u32 %v6124_v47, %v4927_v46  ;;  %v1980_v1 = vpop.f32.mrf.mxu0  ;;  %v4784_v8 = vor.u32 %v6088_v62, %v4783_v61  ;;  %v5007_v46 = vld [vmem:[#allocation5 + $0x828] sm:$0xf]  ;;  %v4260_v61 = vor.u32 %v5954_v44, %v4257_v45  ;;  %v4081_v62 = vld [vmem:[#allocation5 + $0xf8] sm:$0xf0]  ;;  %v6098_v45 = vld [vmem:[#allocation5 + $0x6cc] sm:$0xf] }
  0xe4   :  { %2257 = vmatpush.bf16.msra.mxu0 %v4848_v2  ;;  %v1993_v2 = vpop.f32.mrf.mxu1  ;;  %v1981_v5 = vadd.f32 %v1980_v1, %v6711_v59  ;;  %v4273_v59 = vld [vmem:[#allocation5 + $0x278] sm:$0xf0]  ;;  %v5950_v1 = vld [vmem:[#allocation5 + $0x22c] sm:$0xf] }
  0xe5   :  { %2238 = vmatpush.bf16.msra.mxu1 %v4480_v12  ;;  %2226 = vmatmul.bf16.vlgmr.msrb.gmra.mxu2 %v6659_v17  ;;  %v4767_v12 = vld [vmem:[#allocation5 + $0x648] sm:$0xf] }
  0xe6   :  { %2270 = vmatpush.bf16.msra.mxu2 %v4976_v4  ;;  %v5056_v4 = vor.u32 %v6156_v60, %v5055_v58  ;;  %v6108_v58 = vld [vmem:[#allocation5 + $0x714] sm:$0xf0]  ;;  %v5910_v60 = vld [vmem:[#allocation5 + $0xec] sm:$0xf] }
  0xe7   :  { %2251 = vmatpush.bf16.msra.mxu3 %v4608_v13  ;;  %v1994_v13 = vadd.f32 %v1993_v2, %v1981_v5  ;;  %v4241_v2 = vld [vmem:[#allocation5 + $0x238] sm:$0xf0] }
  0xe8   :  { %2258 = vmatpush.bf16.msra.mxu0 %v4832_v21  ;;  %2239 = vmatmul.bf16.vlgmr.msra.gmra.mxu1 %v6675_v41  ;;  %v2006_v21 = vpop.f32.mrf.mxu2 }
  0xe9   :  { %2283 = vmatpush.bf16.msrb.mxu1 %v5104_v14  ;;  %v6084_v14 = vld [vmem:[#allocation5 + $0x654] sm:$0xf0]  ;;  %v2007_v28 = vadd.f32 %v2006_v21, %v1994_v13  ;;  %v5906_v13 = vld [vmem:[#allocation5 + $0xcc] sm:$0xf] }
  0xea   :  { %2271 = vmatpush.bf16.msra.mxu2 %v4960_v23  ;;  %2252 = vmatmul.bf16.vlgmr.msra.gmra.mxu3 %v6673_v40  ;;  %v5958_v23 = vld [vmem:[#allocation5 + $0x26c] sm:$0xf]  ;;  %v4768_v24 = vor.u32 %v6084_v14, %v4767_v12  ;;  %v4465_v12 = vld [vmem:[#allocation5 + $0x3f8] sm:$0xf0]  ;;  %v4244_v14 = vor.u32 %v5950_v1, %v4241_v2 }
  0xeb   :  { %2303 = vmatpush.bf16.msrb.mxu3 %v1914_v15  ;;  %v4895_v15 = vld [vmem:[#allocation5 + $0x748] sm:$0xf]  ;;  %v4276_v36 = vor.u32 %v5958_v23, %v4273_v59  ;;  %v2019_v42 = vpop.f32.mrf.mxu3  ;;  %v5946_v23 = vld [vmem:[#allocation5 + $0x20c] sm:$0xf]  ;;  %v4225_v59 = vld [vmem:[#allocation5 + $0x218] sm:$0xf0] }
  0xec   :  { %2259 = vmatpush.bf16.msra.mxu0 %v4816_v37  ;;  %v4896_v27 = vor.u32 %v6116_v18, %v4895_v15  ;;  %v1982_v37 = vpop.f32.mrf.mxu0  ;;  %v6719_v47 = vadd.f32 %v2019_v42, %v2007_v28  ;;  %v4065_v15 = vld [vmem:[#allocation5 + $0xd8] sm:$0xf0]  ;;  %v5938_v18 = vld [vmem:[#allocation5 + $0x1cc] sm:$0xf] }
  0xed   :  { %2284 = vmatpush.bf16.msrb.mxu1 %v5088_v33  ;;  %v4879_v33 = vld [vmem:[#allocation5 + $0x728] sm:$0xf]  ;;  %v6102_v28 = vld [vmem:[#allocation5 + $0x6ec] sm:$0xf]  ;;  %v4068_v30 = vor.u32 %v5906_v13, %v4065_v15  ;;  %v4049_v37 = vld [vmem:[#allocation5 + $0xb8] sm:$0xf0] }
  0xee   :  { %2272 = vmatpush.bf16.msra.mxu2 %v4944_v38  ;;  %v1995_v38 = vpop.f32.mrf.mxu1  ;;  %v4177_v42 = vld [vmem:[#allocation5 + $0x1b8] sm:$0xf0]  ;;  %v6090_v13 = vld [vmem:[#allocation5 + $0x68c] sm:$0xf] }
  0xef   :  { %2335 = vmatpush.bf16.msra.mxu3 %v4340_v32  ;;  %v6080_v32 = vld [vmem:[#allocation5 + $0x634] sm:$0xf0]  ;;  %v5934_v38 = vld [vmem:[#allocation5 + $0x1ac] sm:$0xf] }
  0xf0   :  { %2260 = vmatpush.bf16.msra.mxu0 %v4800_v51  ;;  %v6076_v51 = vld [vmem:[#allocation5 + $0x614] sm:$0xf0] }
  0xf1   :  { %2285 = vmatpush.bf16.msrb.mxu1 %v5072_v49  ;;  %v4880_v49 = vor.u32 %v6112_v34, %v4879_v33  ;;  %v4736_v5 = vor.u32 %v6076_v51, %v4735_v54  ;;  %v4449_v33 = vld [vmem:[#allocation5 + $0x3d8] sm:$0xf0]  ;;  %v5902_v34 = vld [vmem:[#allocation5 + $0xac] sm:$0xf] }
  0xf2   :  { %2273 = vmatpush.bf16.msra.mxu2 %v4928_v56  ;;  %v4863_v56 = vld [vmem:[#allocation5 + $0x708] sm:$0xf]  ;;  %v4433_v54 = vld [vmem:[#allocation5 + $0x3b8] sm:$0xf0]  ;;  %v5898_v51 = vld [vmem:[#allocation5 + $0x8c] sm:$0xf] }
  0xf3   :  { %2336 = vmatpush.bf16.msra.mxu3 %v4324_v48  ;;  %v4752_v48 = vor.u32 %v6080_v32, %v4751_v31  ;;  %v4864_v6 = vor.u32 %v6108_v58, %v4863_v56  ;;  %v6002_v32 = vld [vmem:[#allocation5 + $0x3cc] sm:$0xf]  ;;  %v4033_v56 = vld [vmem:[#allocation5 + $0x98] sm:$0xf0] }
  0xf4   :  { %2261 = vmatpush.bf16.msra.mxu0 %v4784_v8  ;;  %v6140_v8 = vld [vmem:[#allocation5 + $0x814] sm:$0xf0]  ;;  %v4452_v44 = vor.u32 %v6002_v32, %v4449_v33  ;;  %v5930_v58 = vld [vmem:[#allocation5 + $0x18c] sm:$0xf]  ;;  %v4036_v1 = vor.u32 %v5898_v51, %v4033_v56 }
  0xf5   :  { %2286 = vmatpush.bf16.msrb.mxu1 %v5056_v4  ;;  %v2008_v4 = vpop.f32.mrf.mxu2  ;;  %v4992_v21 = vor.u32 %v6140_v8, %v4991_v7  ;;  %v4017_v8 = vld [vmem:[#allocation5 + $0x78] sm:$0xf0]  ;;  %v5986_v33 = vld [vmem:[#allocation5 + $0x34c] sm:$0xf] }
  0xf6   :  { %2274 = vmatpush.bf16.msra.mxu2 %v4912_v9  ;;  %v4084_v9 = vor.u32 %v5910_v60, %v4081_v62  ;;  %v4161_v60 = vld [vmem:[#allocation5 + $0x198] sm:$0xf0]  ;;  %v5994_v4 = vld [vmem:[#allocation5 + $0x38c] sm:$0xf] }
  0xf7   :  { %2337 = vmatpush.bf16.msra.mxu3 %v4308_v0  ;;  %v5008_v0 = vor.u32 %v6144_v52, %v5007_v46  ;;  %v4833_v46 = vld [vmem:[#allocation5 + $0x6d8] sm:$0xf0]  ;;  %v5998_v52 = vld [vmem:[#allocation5 + $0x3ac] sm:$0xf]  ;;  %v4164_v2 = vor.u32 %v5930_v58, %v4161_v60 }
  0xf8   :  { %2262 = vmatpush.bf16.msra.mxu0 %v4768_v24  ;;  %v2021_v24 = vpop.f32.mrf.mxu3  ;;  %v4836_v62 = vor.u32 %v6098_v45, %v4833_v46  ;;  %v4436_v50 = vor.u32 %v5998_v52, %v4433_v54  ;;  %v6082_v52 = vld [vmem:[#allocation5 + $0x64c] sm:$0xf]  ;;  %v4769_v54 = vld [vmem:[#allocation5 + $0x658] sm:$0xf0] }
  0xf9   :  { %2287 = vmatpush.bf16.msrb.mxu1 %v5040_v20  ;;  %v6723_v20 = vpop.f32.mrf.mxu1  ;;  %v5922_v24 = vld [vmem:[#allocation5 + $0x14c] sm:$0xf]  ;;  %v4369_v60 = vld [vmem:[#allocation5 + $0x338] sm:$0xf0] }
  0xfa   :  { %2275 = vmatpush.bf16.msra.mxu2 %v4896_v27  ;;  %5111 = vmatmul.msk.bf16.vlgmr.msrb.gmra.mxu3 %vm1899_vm2, %v6683_v35  ;;  %v4468_v27 = vor.u32 %v6006_v11, %v4465_v12  ;;  %v5982_v51 = vld [vmem:[#allocation5 + $0x32c] sm:$0xf] }
  0xfb   :  { %2338 = vmatpush.bf16.msra.mxu3 %v4292_v19  ;;  %v4193_v19 = vld [vmem:[#allocation5 + $0x1d8] sm:$0xf0] }
  0xfc   :  { %2263 = vmatpush.bf16.msra.mxu0 %v4752_v48  ;;  %v4196_v31 = vor.u32 %v5938_v18, %v4193_v19  ;;  %v4052_v48 = vor.u32 %v5902_v34, %v4049_v37  ;;  %v5990_v19 = vld [vmem:[#allocation5 + $0x36c] sm:$0xf]  ;;  %v4385_v34 = vld [vmem:[#allocation5 + $0x358] sm:$0xf0] }
  0xfd   :  { %2288 = vmatpush.bf16.msrb.mxu1 %v5024_v43  ;;  %v4852_v43 = vor.u32 %v6102_v28, %v4849_v29  ;;  %v6086_v29 = vld [vmem:[#allocation5 + $0x66c] sm:$0xf] }
  0xfe   :  { %2276 = vmatpush.bf16.msra.mxu2 %v4880_v49  ;;  %v4180_v49 = vor.u32 %v5934_v38, %v4177_v42  ;;  %v3985_v42 = vld [vmem:[#allocation5 + $0x38] sm:$0xf0] }
  0xff   :  { %2339 = vmatpush.bf16.msra.mxu3 %v4276_v36  ;;  %v4228_v36 = vor.u32 %v5946_v23, %v4225_v59  ;;  %v5890_v23 = vld [vmem:[#allocation5 + $0x4c] sm:$0xf]  ;;  %v4001_v59 = vld [vmem:[#allocation5 + $0x58] sm:$0xf0] }
 0x100   :  { %2264 = vmatpush.bf16.msra.mxu0 %v4736_v5  ;;  %v4417_v5 = vld [vmem:[#allocation5 + $0x398] sm:$0xf0]  ;;  %v6728_v7 = vpop.f32.mrf.mxu0 }
 0x101   :  { %2289 = vmatpush.bf16.msrb.mxu1 %v5008_v0  ;;  %v4817_v0 = vld [vmem:[#allocation5 + $0x6b8] sm:$0xf0]  ;;  %v4420_v12 = vor.u32 %v5994_v4, %v4417_v5  ;;  %v6070_v4 = vld [vmem:[#allocation5 + $0x5ec] sm:$0xf] }
 0x102   :  { %2277 = vmatpush.bf16.msra.mxu2 %v4864_v6  ;;  %v5894_v6 = vld [vmem:[#allocation5 + $0x6c] sm:$0xf]  ;;  %v4820_v11 = vor.u32 %v6094_v63, %v4817_v0  ;;  %v4097_v63 = vld [vmem:[#allocation5 + $0x118] sm:$0xf0] }
 0x103   :  { %2340 = vmatpush.bf16.msra.mxu3 %v4260_v61  ;;  %2265 = vmatmul.bf16.vlgmr.msra.gmra.mxu0 %v6671_v39  ;;  %v2047_v61 = vpop.f32.mrf.mxu1  ;;  %v4020_v15 = vor.u32 %v5894_v6, %v4017_v8  ;;  %v6038_v0 = vld [vmem:[#allocation5 + $0x4ec] sm:$0xf]  ;;  %v4721_v5 = vld [vmem:[#allocation5 + $0x5f8] sm:$0xf0]  ;;  %v4372_v6 = vor.u32 %v5982_v51, %v4369_v60  ;;  %v5211_v60 = vld [vmem:[#allocation8 + $0xc0] sm:$0xf] }
 0x104   :  { %2309 = vmatpush.bf16.msrb.mxu0 %v4084_v9  ;;  %v5926_v9 = vld [vmem:[#allocation5 + $0x16c] sm:$0xf]  ;;  %v4689_v51 = vld [vmem:[#allocation5 + $0x5b8] sm:$0xf0] }
 0x105   :  { %2278 = vmatmul.bf16.vlgmr.msra.gmra.mxu2 %v6678_v53  ;;  %2290 = vmatpush.bf16.msrb.mxu1 %v4992_v21  ;;  %v4401_v21 = vld [vmem:[#allocation5 + $0x378] sm:$0xf0]  ;;  %v5882_v61 = vld [vmem:[#allocation5 + $0xc] sm:$0xf] }
 0x106   :  { %2322 = vmatpush.bf16.msrb.mxu2 %v4212_v10  ;;  %v4145_v10 = vld [vmem:[#allocation5 + $0x178] sm:$0xf0]  ;;  %v6078_v8 = vld [vmem:[#allocation5 + $0x62c] sm:$0xf] }
 0x107   :  { %2341 = vmatpush.bf16.msra.mxu3 %v4244_v14  ;;  %v4801_v14 = vld [vmem:[#allocation5 + $0x698] sm:$0xf0]  ;;  %v4148_v18 = vor.u32 %v5926_v9, %v4145_v10 }
 0x108   :  { %2310 = vmatpush.bf16.msrb.mxu0 %v4068_v30  ;;  %2291 = vmatmul.bf16.vlgmr.msrb.gmra.mxu1 %v6687_v25  ;;  %v4804_v28 = vor.u32 %v6090_v13, %v4801_v14  ;;  %v4785_v30 = vld [vmem:[#allocation5 + $0x678] sm:$0xf0]  ;;  %v2034_v45 = vpop.f32.mrf.mxu0  ;;  %v6735_v46 = vpop.f32.mrf.mxu2 }
 0x109   :  { %2348 = vmatpush.bf16.msra.mxu1 %v4468_v27  ;;  %v4129_v27 = vld [vmem:[#allocation5 + $0x158] sm:$0xf0]  ;;  %v6731_v37 = vpop.f32.mrf.mxu3 }
 0x10a   :  { %2323 = vmatpush.bf16.msrb.mxu2 %v4196_v31  ;;  %v4004_v31 = vor.u32 %v5890_v23, %v4001_v59  ;;  %v4132_v32 = vor.u32 %v5922_v24, %v4129_v27  ;;  %v4753_v9 = vld [vmem:[#allocation5 + $0x638] sm:$0xf0]  ;;  %v6034_v59 = vld [vmem:[#allocation5 + $0x4cc] sm:$0xf] }
 0x10b   :  { %2342 = vmatpush.bf16.msra.mxu3 %v4228_v36  ;;  %v5886_v36 = vld [vmem:[#allocation5 + $0x2c] sm:$0xf]  ;;  %v6733_v38 = vpop.f32.mrf.mxu1  ;;  %v4353_v13 = vld [vmem:[#allocation5 + $0x318] sm:$0xf0]  ;;  %v4756_v27 = vor.u32 %v6078_v8, %v4753_v9  ;;  %v5195_v8 = vld [vmem:[#allocation8 + $0xa0] sm:$0xf] }
 0x10c   :  { %2311 = vmatpush.bf16.msrb.mxu0 %v4052_v48  ;;  %v4788_v48 = vor.u32 %v6086_v29, %v4785_v30  ;;  %v3988_v56 = vor.u32 %v5886_v36, %v3985_v42  ;;  %v4977_v23 = vld [vmem:[#allocation5 + $0x7f8] sm:$0xf0]  ;;  %v6199_v36 = vld [vmem:[#allocation8 + $0xec] sm:$0xf0] }
 0x10d   :  { %2349 = vmatpush.bf16.msra.mxu1 %v4452_v44  ;;  %v4113_v44 = vld [vmem:[#allocation5 + $0x138] sm:$0xf0]  ;;  %v6191_v9 = vld [vmem:[#allocation8 + $0xac] sm:$0xf0] }
 0x10e   :  { %2324 = vmatpush.bf16.msrb.mxu2 %v4180_v49  ;;  %2343 = vmatmul.bf16.vlgmr.msra.gmra.mxu3 %v6654_v3  ;;  %v4404_v3 = vor.u32 %v5990_v19, %v4401_v21  ;;  %v4388_v49 = vor.u32 %v5986_v33, %v4385_v34  ;;  %v4724_v19 = vor.u32 %v6070_v4, %v4721_v5  ;;  %v6134_v21 = vld [vmem:[#allocation5 + $0x7ec] sm:$0xf]  ;;  %v4705_v29 = vld [vmem:[#allocation5 + $0x5d8] sm:$0xf0]  ;;  %v5227_v34 = vld [vmem:[#allocation8 + $0xe0] sm:$0xf] }
 0x10f   :  { %2387 = vmatpush.bf16.msrb.mxu3 %v4852_v43  ;;  %v5918_v43 = vld [vmem:[#allocation5 + $0x12c] sm:$0xf]  ;;  %v4980_v33 = vor.u32 %v6134_v21, %v4977_v23  ;;  %v4961_v45 = vld [vmem:[#allocation5 + $0x7d8] sm:$0xf0]  ;;  %v5179_v23 = vld [vmem:[#allocation8 + $0x80] sm:$0xf] }
 0x110   :  { %2312 = vmatpush.bf16.msrb.mxu0 %v4036_v1  ;;  %v4116_v58 = vor.u32 %v5918_v43, %v4113_v44  ;;  %v4772_v1 = vor.u32 %v6082_v52, %v4769_v54  ;;  %v2060_v24 = vpop.f32.mrf.mxu2  ;;  %v6130_v44 = vld [vmem:[#allocation5 + $0x7cc] sm:$0xf]  ;;  %v4561_v52 = vld [vmem:[#allocation5 + $0x4b8] sm:$0xf0] }
 0x111   :  { %2350 = vmatpush.bf16.msra.mxu1 %v4436_v50  ;;  %v5914_v50 = vld [vmem:[#allocation5 + $0x10c] sm:$0xf]  ;;  %v2073_v14 = vpop.f32.mrf.mxu3  ;;  %v4673_v5 = vld [vmem:[#allocation5 + $0x598] sm:$0xf0] }
 0x112   :  { %2325 = vmatpush.bf16.msrb.mxu2 %v4164_v2  ;;  %v4593_v2 = vld [vmem:[#allocation5 + $0x4f8] sm:$0xf0]  ;;  %v6062_v54 = vld [vmem:[#allocation5 + $0x5ac] sm:$0xf] }
 0x113   :  { %2388 = vmatpush.bf16.msrb.mxu3 %v4836_v62  ;;  %v3969_v62 = vld [vmem:[#allocation5 + $0x18] sm:$0xf0]  ;;  %v6058_v4 = vld [vmem:[#allocation5 + $0x58c] sm:$0xf] }
 0x114   :  { %2313 = vmatpush.bf16.msrb.mxu0 %v4020_v15  ;;  %v3972_v10 = vor.u32 %v5882_v61, %v3969_v62  ;;  %v2086_v15 = vpop.f32.mrf.mxu1  ;;  %v6195_v61 = vld [vmem:[#allocation8 + $0xcc] sm:$0xf0]  ;;  %v4529_v14 = vld [vmem:[#allocation5 + $0x478] sm:$0xf0] }
 0x115   :  { %2351 = vmatpush.bf16.msra.mxu1 %v4420_v12  ;;  %v5978_v12 = vld [vmem:[#allocation5 + $0x30c] sm:$0xf] }
 0x116   :  { %2326 = vmatpush.bf16.msrb.mxu2 %v4148_v18  ;;  %v4596_v18 = vor.u32 %v6038_v0, %v4593_v2  ;;  %v4356_v30 = vor.u32 %v5978_v12, %v4353_v13  ;;  %v4945_v0 = vld [vmem:[#allocation5 + $0x7b8] sm:$0xf0]  ;;  %v6022_v13 = vld [vmem:[#allocation5 + $0x46c] sm:$0xf] }
 0x117   :  { %2389 = vmatpush.bf16.msrb.mxu3 %v4820_v11  ;;  %v4100_v11 = vor.u32 %v5914_v50, %v4097_v63  ;;  %v4692_v50 = vor.u32 %v6062_v54, %v4689_v51  ;;  %v6126_v63 = vld [vmem:[#allocation5 + $0x7ac] sm:$0xf]  ;;  %v4545_v2 = vld [vmem:[#allocation5 + $0x498] sm:$0xf0]  ;;  %v4532_v24 = vor.u32 %v6022_v13, %v4529_v14  ;;  %v2033_v14 = vadd.f32 %v6728_v7, %v6719_v47 }
 0x118   :  { %2314 = vmatpush.bf16.msrb.mxu0 %v4004_v31  ;;  %v6074_v31 = vld [vmem:[#allocation5 + $0x60c] sm:$0xf]  ;;  %v4929_v12 = vld [vmem:[#allocation5 + $0x798] sm:$0xf0] }
 0x119   :  { %2352 = vmatpush.bf16.msra.mxu1 %v4404_v3  ;;  %v6066_v3 = vld [vmem:[#allocation5 + $0x5cc] sm:$0xf]  ;;  %v4497_v54 = vld [vmem:[#allocation5 + $0x438] sm:$0xf0] }
 0x11a   :  { %2327 = vmatpush.bf16.msrb.mxu2 %v4132_v32  ;;  %v4737_v32 = vld [vmem:[#allocation5 + $0x618] sm:$0xf0]  ;;  %v4708_v43 = vor.u32 %v6066_v3, %v4705_v29  ;;  %v6054_v15 = vld [vmem:[#allocation5 + $0x56c] sm:$0xf] }
 0x11b   :  { %2390 = vmatpush.bf16.msrb.mxu3 %v4804_v28  ;;  %v4577_v28 = vld [vmem:[#allocation5 + $0x4d8] sm:$0xf0]  ;;  %v6018_v29 = vld [vmem:[#allocation5 + $0x44c] sm:$0xf] }
 0x11c   :  { %2315 = vmatpush.bf16.msrb.mxu0 %v3988_v56  ;;  %v4580_v42 = vor.u32 %v6034_v59, %v4577_v28  ;;  %v5228_v56 = vor.u32 %v6199_v36, %v5227_v34  ;;  %v6187_v59 = vld [vmem:[#allocation8 + $0x8c] sm:$0xf0]  ;;  %v6118_v28 = vld [vmem:[#allocation5 + $0x76c] sm:$0xf]  ;;  %v4913_v3 = vld [vmem:[#allocation5 + $0x778] sm:$0xf0] }
 0x11d   :  { %2353 = vmatpush.bf16.msra.mxu1 %v4388_v49  ;;  %v4740_v49 = vor.u32 %v6074_v31, %v4737_v32  ;;  %v6050_v31 = vld [vmem:[#allocation5 + $0x54c] sm:$0xf]  ;;  %v4641_v32 = vld [vmem:[#allocation5 + $0x558] sm:$0xf0]  ;;  %v442_v34 = vperm.slane %v6705_v57, 1  ;;  %v4916_v36 = vor.u32 %v6118_v28, %v4913_v3 }
 0x11e   :  { %2328 = vmatpush.bf16.msrb.mxu2 %v4116_v58  ;;  %v4964_v58 = vor.u32 %v6130_v44, %v4961_v45  ;;  %v4644_v45 = vor.u32 %v6050_v31, %v4641_v32  ;;  %v6046_v51 = vld [vmem:[#allocation5 + $0x52c] sm:$0xf]  ;;  %v5105_v13 = vld [vmem:[#allocation5 + $0x8f8] sm:$0xf0]  ;;  %v5355_v28 = vld [vmem:[#allocation8 + $0x1e0] sm:$0xf] }
 0x11f   :  { %2391 = vmatpush.bf16.msrb.mxu3 %v4788_v48  ;;  %v6030_v48 = vld [vmem:[#allocation5 + $0x4ac] sm:$0xf]  ;;  %v6231_v3 = vld [vmem:[#allocation8 + $0x1ec] sm:$0xf0]  ;;  %v5089_v7 = vld [vmem:[#allocation5 + $0x8d8] sm:$0xf0] }
 0x120   :  { %2316 = vmatpush.bf16.msrb.mxu0 %v3972_v10  ;;  %v4564_v62 = vor.u32 %v6030_v48, %v4561_v52  ;;  %v4676_v10 = vor.u32 %v6058_v4, %v4673_v5  ;;  %v6114_v48 = vld [vmem:[#allocation5 + $0x74c] sm:$0xf]  ;;  %v4881_v4 = vld [vmem:[#allocation5 + $0x738] sm:$0xf0]  ;;  %v5483_v32 = vld [vmem:[#allocation8 + $0x2e0] sm:$0xf] }
 0x121   :  { %2354 = vmatpush.bf16.msra.mxu1 %v4372_v6  ;;  %v4948_v6 = vor.u32 %v6126_v63, %v4945_v0  ;;  %v6014_v52 = vld [vmem:[#allocation5 + $0x42c] sm:$0xf]  ;;  %v6179_v63 = vld [vmem:[#allocation8 + $0x4c] sm:$0xf0] }
 0x122   :  { %2329 = vmatpush.bf16.msrb.mxu2 %v4100_v11  ;;  %v6122_v11 = vld [vmem:[#allocation5 + $0x78c] sm:$0xf]  ;;  %v4500_v0 = vor.u32 %v6014_v52, %v4497_v54  ;;  %v5339_v52 = vld [vmem:[#allocation8 + $0x1c0] sm:$0xf]  ;;  %v6227_v54 = vld [vmem:[#allocation8 + $0x1cc] sm:$0xf0] }
 0x123   :  { %2392 = vmatpush.bf16.msrb.mxu3 %v4772_v1  ;;  %2317 = vmatmul.bf16.vlgmr.msrb.gmra.mxu0 %v6657_v16  ;;  %v6026_v1 = vld [vmem:[#allocation5 + $0x48c] sm:$0xf]  ;;  %v4932_v21 = vor.u32 %v6122_v11, %v4929_v12 }
 0x124   :  { %2361 = vmatpush.bf16.msra.mxu0 %v4596_v18  ;;  %v4548_v16 = vor.u32 %v6026_v1, %v4545_v2  ;;  %v4657_v18 = vld [vmem:[#allocation5 + $0x578] sm:$0xf0]  ;;  %v6110_v2 = vld [vmem:[#allocation5 + $0x72c] sm:$0xf] }
 0x125   :  { %2355 = vmatpush.bf16.msra.mxu1 %v4356_v30  ;;  %2330 = vmatmul.bf16.vlgmr.msrb.gmra.mxu2 %v6651_v55  ;;  %v5212_v55 = vor.u32 %v6195_v61, %v5211_v60  ;;  %v4513_v30 = vld [vmem:[#allocation5 + $0x458] sm:$0xf0]  ;;  %v1318_v60 = vunpack.c.h.b16 %v6708_v26  ;;  %v6010_v5 = vld [vmem:[#allocation5 + $0x40c] sm:$0xf] }
 0x126   :  { %2374 = vmatpush.bf16.msra.mxu2 %v4724_v19  ;;  %v6741_v19 = vpop.f32.mrf.mxu0  ;;  %v4516_v44 = vor.u32 %v6018_v29, %v4513_v30  ;;  %v6042_v26 = vld [vmem:[#allocation5 + $0x50c] sm:$0xf] }
 0x127   :  { %2393 = vmatpush.bf16.msrb.mxu3 %v4756_v27  ;;  %v4660_v27 = vor.u32 %v6054_v15, %v4657_v18  ;;  %v6166_v12 = vld [vmem:[#allocation5 + $0x8ec] sm:$0xf]  ;;  %v4884_v15 = vor.u32 %v6110_v2, %v4881_v4  ;;  %v5131_v18 = vld [vmem:[#allocation8 + $0x20] sm:$0xf] }
 0x128   :  { %2362 = vmatpush.bf16.msra.mxu0 %v4580_v42  ;;  %2356 = vmatmul.bf16.vlgmr.msra.gmra.mxu1 %v6659_v17  ;;  %v5196_v17 = vor.u32 %v6191_v9, %v5195_v8  ;;  %v5163_v42 = vld [vmem:[#allocation8 + $0x60] sm:$0xf]  ;;  %v4481_v8 = vld [vmem:[#allocation5 + $0x418] sm:$0xf0]  ;;  %v6162_v29 = vld [vmem:[#allocation5 + $0x8cc] sm:$0xf] }
 0x129   :  { %2400 = vmatpush.bf16.msrb.mxu1 %v4980_v33  ;;  %v6743_v33 = vpop.f32.mrf.mxu1  ;;  %v4609_v9 = vld [vmem:[#allocation5 + $0x518] sm:$0xf0]  ;;  %v5323_v4 = vld [vmem:[#allocation8 + $0x1a0] sm:$0xf] }
 0x12a   :  { %2375 = vmatpush.bf16.msra.mxu2 %v4708_v43  ;;  %v6183_v43 = vld [vmem:[#allocation8 + $0x6c] sm:$0xf0] }
 0x12b   :  { %2394 = vmatpush.bf16.msrb.mxu3 %v4740_v49  ;;  %v4897_v49 = vld [vmem:[#allocation5 + $0x758] sm:$0xf0]  ;;  %v5164_v57 = vor.u32 %v6183_v43, %v5163_v42  ;;  %v5115_v42 = vld [vmem:[#allocation8] sm:$0xf]  ;;  %v6171_v43 = vld [vmem:[#allocation8 + $0xc] sm:$0xf0] }
 0x12c   :  { %2363 = vmatpush.bf16.msra.mxu0 %v4564_v62  ;;  %v4900_v62 = vor.u32 %v6114_v48, %v4897_v49 }
 0x12d   :  { %2401 = vmatpush.bf16.msrb.mxu1 %v4964_v58  ;;  %v6746_v58 = vpop.f32.mrf.mxu3 }
 0x12e   :  { %2376 = vmatpush.bf16.msra.mxu2 %v4692_v50  ;;  %2395 = vmatmul.bf16.vlgmr.msrb.gmra.mxu3 %v6671_v39  ;;  %v5180_v39 = vor.u32 %v6187_v59, %v5179_v23  ;;  %v2099_v61 = vpop.f32.mrf.mxu0  ;;  %v5147_v50 = vld [vmem:[#allocation8 + $0x40] sm:$0xf]  ;;  %v6106_v23 = vld [vmem:[#allocation5 + $0x70c] sm:$0xf]  ;;  %v4865_v59 = vld [vmem:[#allocation5 + $0x718] sm:$0xf0] }
 0x12f   :  { %3225 = vmatpush.bf16.msra.mxu3 %v5228_v56  ;;  %v4625_v56 = vld [vmem:[#allocation5 + $0x538] sm:$0xf0]  ;;  %v5148_v11 = vor.u32 %v6179_v63, %v5147_v50  ;;  %v6259_v50 = vld [vmem:[#allocation8 + $0x2cc] sm:$0xf0]  ;;  %v6193_v63 = vld [vmem:[#allocation8 + $0xc4] sm:$0xf] }
 0x130   :  { %2364 = vmatpush.bf16.msra.mxu0 %v4548_v16  ;;  %v4628_v1 = vor.u32 %v6046_v51, %v4625_v56  ;;  %v1610_v16 = vpack.c.b16 %v1318_v60, %v1318_v60  ;;  %v6158_v56 = vld [vmem:[#allocation5 + $0x8ac] sm:$0xf]  ;;  %v5073_v60 = vld [vmem:[#allocation5 + $0x8b8] sm:$0xf0] }
 0x131   :  { %2402 = vmatpush.bf16.msrb.mxu1 %v4948_v6  ;;  %v2059_v6 = vadd.f32 %v6735_v46, %v442_v34  ;;  %v4612_v46 = vor.u32 %v6042_v26, %v4609_v9  ;;  %v2046_v34 = vadd.f32 %v6723_v20, %v2033_v14  ;;  %v5116_v20 = vor.u32 %v6171_v43, %v5115_v42  ;;  %v6247_v42 = vld [vmem:[#allocation8 + $0x26c] sm:$0xf0] }
 0x132   :  { %2377 = vmatpush.bf16.msra.mxu2 %v4676_v10  ;;  %v2138_v10 = vpop.f32.mrf.mxu1  ;;  %v1917_v31 = vand.u32 %v6668_v22, %v1610_v16  ;;  %v5092_v22 = vor.u32 %v6162_v29, %v5089_v7  ;;  %v5076_v2 = vor.u32 %v6158_v56, %v5073_v60  ;;  %v5451_v16 = vld [vmem:[#allocation8 + $0x2a0] sm:$0xf]  ;;  %v6146_v7 = vld [vmem:[#allocation5 + $0x84c] sm:$0xf] }
 0x133   :  { %3226 = vmatpush.bf16.msra.mxu3 %v5212_v55  ;;  %v6749_v55 = vpop.f32.mrf.mxu2  ;;  %v6255_v10 = vld [vmem:[#allocation8 + $0x2ac] sm:$0xf0] }
 0x134   :  { %2365 = vmatpush.bf16.msra.mxu0 %v4532_v24  ;;  %v2072_v24 = vadd.f32 %v6731_v37, %v2059_v6  ;;  %v5356_v37 = vor.u32 %v6231_v3, %v5355_v28  ;;  %v6185_v28 = vld [vmem:[#allocation8 + $0x84] sm:$0xf]  ;;  %v5181_v3 = vld [vmem:[#allocation8 + $0x90] sm:$0xf0] }
 0x135   :  { %2403 = vmatpush.bf16.msrb.mxu1 %v4932_v21  ;;  %v4484_v21 = vor.u32 %v6010_v5, %v4481_v8  ;;  %v2125_v30 = vpop.f32.mrf.mxu3  ;;  %v6223_v5 = vld [vmem:[#allocation8 + $0x1ac] sm:$0xf0]  ;;  %v5057_v8 = vld [vmem:[#allocation5 + $0x898] sm:$0xf0] }
 0x136   :  { %2378 = vmatpush.bf16.msra.mxu2 %v4660_v27  ;;  %v5108_v27 = vor.u32 %v6166_v12, %v5105_v13  ;;  %v2085_v49 = vadd.f32 %v6733_v38, %v2072_v24  ;;  %v5340_v38 = vor.u32 %v6227_v54, %v5339_v52  ;;  %v5197_v12 = vld [vmem:[#allocation8 + $0xb0] sm:$0xf0]  ;;  %v6251_v24 = vld [vmem:[#allocation8 + $0x28c] sm:$0xf0]  ;;  %v5291_v30 = vld [vmem:[#allocation8 + $0x160] sm:$0xf] }
 0x137   :  { %3227 = vmatpush.bf16.msra.mxu3 %v5196_v17  ;;  %v6175_v17 = vld [vmem:[#allocation8 + $0x2c] sm:$0xf0]  ;;  %v6142_v54 = vld [vmem:[#allocation5 + $0x82c] sm:$0xf] }
 0x138   :  { %2366 = vmatpush.bf16.msra.mxu0 %v4516_v44  ;;  %v5132_v47 = vor.u32 %v6175_v17, %v5131_v18  ;;  %v6197_v44 = vld [vmem:[#allocation8 + $0xe4] sm:$0xf]  ;;  %v6219_v18 = vld [vmem:[#allocation8 + $0x18c] sm:$0xf0]  ;;  %v5041_v17 = vld [vmem:[#allocation5 + $0x878] sm:$0xf0] }
 0x139   :  { %2404 = vmatpush.bf16.msrb.mxu1 %v4916_v36  ;;  %v4868_v36 = vor.u32 %v6106_v23, %v4865_v59  ;;  %v5435_v59 = vld [vmem:[#allocation8 + $0x280] sm:$0xf] }
 0x13a   :  { %2379 = vmatpush.bf16.msra.mxu2 %v4644_v45  ;;  %v5229_v45 = vld [vmem:[#allocation8 + $0xf0] sm:$0xf0] }
 0x13b   :  { %3228 = vmatpush.bf16.msra.mxu3 %v5180_v39  ;;  %v6263_v39 = vld [vmem:[#allocation8 + $0x2ec] sm:$0xf0]  ;;  %v2112_v48 = vpop.f32.mrf.mxu2  ;;  %v5232_v61 = vor.u32 %v6197_v44, %v5229_v45  ;;  %v6181_v44 = vld [vmem:[#allocation8 + $0x64] sm:$0xf]  ;;  %v5165_v45 = vld [vmem:[#allocation8 + $0x70] sm:$0xf0] }
 0x13c   :  { %2367 = vmatpush.bf16.msra.mxu0 %v4500_v0  ;;  %v5484_v51 = vor.u32 %v6263_v39, %v5483_v32  ;;  %v5213_v0 = vld [vmem:[#allocation8 + $0xd0] sm:$0xf0]  ;;  %v5025_v32 = vld [vmem:[#allocation5 + $0x858] sm:$0xf0]  ;;  %v5436_v39 = vor.u32 %v6251_v24, %v5435_v59  ;;  %v5168_v60 = vor.u32 %v6181_v44, %v5165_v45  ;;  %v5371_v59 = vld [vmem:[#allocation8 + $0x200] sm:$0xf] }
 0x13d   :  { %2405 = vmatpush.bf16.msrb.mxu1 %v4900_v62  ;;  %v5467_v62 = vld [vmem:[#allocation8 + $0x2c0] sm:$0xf]  ;;  %v6761_v6 = vpop.f32.mrf.mxu3  ;;  %v5028_v48 = vor.u32 %v6146_v7, %v5025_v32  ;;  %v6235_v24 = vld [vmem:[#allocation8 + $0x20c] sm:$0xf0]  ;;  %v6225_v7 = vld [vmem:[#allocation8 + $0x1c4] sm:$0xf] }
 0x13e   :  { %2380 = vmatpush.bf16.msra.mxu2 %v4628_v1  ;;  %v2098_v1 = vadd.f32 %v6741_v19, %v2085_v49  ;;  %v5468_v26 = vor.u32 %v6259_v50, %v5467_v62  ;;  %v5324_v19 = vor.u32 %v6223_v5, %v5323_v4  ;;  %v5275_v49 = vld [vmem:[#allocation8 + $0x140] sm:$0xf]  ;;  %v6243_v62 = vld [vmem:[#allocation8 + $0x24c] sm:$0xf0]  ;;  %v6177_v50 = vld [vmem:[#allocation8 + $0x44] sm:$0xf] }
 0x13f   :  { %3229 = vmatpush.bf16.msra.mxu3 %v5164_v57  ;;  %v2439_v57 = vmax.f32 %v2046_v34, 0.0  ;;  %v5184_v34 = vor.u32 %v6185_v28, %v5181_v3  ;;  %v6138_v5 = vld [vmem:[#allocation5 + $0x80c] sm:$0xf]  ;;  %v5117_v28 = vld [vmem:[#allocation8 + $0x10] sm:$0xf0] }
 0x140   :  { %2368 = vmatpush.bf16.msra.mxu0 %v4484_v21  ;;  %v2111_v13 = vadd.f32 %v6749_v55, %v2098_v1  ;;  %v5452_v21 = vor.u32 %v6255_v10, %v5451_v16  ;;  %v5259_v1 = vld [vmem:[#allocation8 + $0x120] sm:$0xf]  ;;  %v5235_v3 = vld [vmem:[#allocation8 + $0xe8] sm:$0xf]  ;;  %v5341_v32 = vld [vmem:[#allocation8 + $0x1d0] sm:$0xf0] }
 0x141   :  { %2406 = vmatpush.bf16.msrb.mxu1 %v4884_v15  ;;  %v6764_v9 = vpack.c.bf16 %v2439_v57, %v2439_v57  ;;  %v5307_v15 = vld [vmem:[#allocation8 + $0x180] sm:$0xf]  ;;  %v5344_v45 = vor.u32 %v6225_v7, %v5341_v32 }
 0x142   :  { %2381 = vmatpush.bf16.msra.mxu2 %v4612_v46  ;;  %v2149_v46 = vpop.f32.mrf.mxu0  ;;  %v2124_v55 = vadd.f32 %v6746_v58, %v2111_v13 }
 0x143   :  { %3230 = vmatpush.bf16.msra.mxu3 %v5148_v11  ;;  %2369 = vmatmul.bf16.vlgmr.msra.gmra.mxu0 %v6675_v41  ;;  %v5216_v41 = vor.u32 %v6193_v63, %v5213_v0  ;;  %v6189_v11 = vld [vmem:[#allocation8 + $0xa4] sm:$0xf] }
 0x144   :  { %2413 = vmatpush.bf16.msrb.mxu0 %v5108_v27  ;;  %v5200_v23 = vor.u32 %v6189_v11, %v5197_v12  ;;  %v5308_v27 = vor.u32 %v6219_v18, %v5307_v15  ;;  %v2137_v58 = vadd.f32 %v6743_v33, %v2124_v55  ;;  %v5133_v11 = vld [vmem:[#allocation8 + $0x30] sm:$0xf0]  ;;  %v6203_v15 = vld [vmem:[#allocation8 + $0x10c] sm:$0xf0]  ;;  %v6229_v18 = vld [vmem:[#allocation8 + $0x1e4] sm:$0xf] }
 0x145   :  { %2407 = vmatpush.bf16.msrb.mxu1 %v4868_v36  ;;  %2382 = vmatmul.bf16.vlgmr.msra.gmra.mxu2 %v6673_v40  ;;  %v6154_v40 = vld [vmem:[#allocation5 + $0x88c] sm:$0xf]  ;;  %v5419_v36 = vld [vmem:[#allocation8 + $0x260] sm:$0xf]  ;;  %v6769_v43 = vpop.f32.mrf.mxu1 }
 0x146   :  { %2433 = vmatpush.bf16.msrb.mxu2 %v1917_v31  ;;  %v5060_v14 = vor.u32 %v6154_v40, %v5057_v8  ;;  %v6215_v31 = vld [vmem:[#allocation8 + $0x16c] sm:$0xf0]  ;;  %v2150_v56 = vadd.f32 %v2149_v46, %v2137_v58  ;;  %v4993_v40 = vld [vmem:[#allocation5 + $0x818] sm:$0xf0]  ;;  %v6200_v55 = vld [vmem:[#allocation8 + $0xf4] sm:$0xf0] }
 0x147   :  { %3231 = vmatpush.bf16.msra.mxu3 %v5132_v47  ;;  %v2177_v47 = vpop.f32.mrf.mxu3  ;;  %v4996_v13 = vor.u32 %v6138_v5, %v4993_v40  ;;  %v6196_v58 = vld [vmem:[#allocation8 + $0xd4] sm:$0xf0]  ;;  %v6213_v5 = vld [vmem:[#allocation8 + $0x164] sm:$0xf]  ;;  %v5293_v40 = vld [vmem:[#allocation8 + $0x170] sm:$0xf0] }
 0x148   :  { %2414 = vmatpush.bf16.msrb.mxu0 %v5092_v22  ;;  %2408 = vmatmul.bf16.vlgmr.msrb.gmra.mxu1 %v6678_v53  ;;  %v6150_v53 = vld [vmem:[#allocation5 + $0x86c] sm:$0xf]  ;;  %v6211_v22 = vld [vmem:[#allocation8 + $0x14c] sm:$0xf0]  ;;  %v2162_v52 = vpop.f32.mrf.mxu2  ;;  %v5485_v47 = vld [vmem:[#allocation8 + $0x2f0] sm:$0xf0] }
 0x149   :  { %3238 = vmatpush.bf16.msra.mxu1 %v5356_v37  ;;  %v5044_v29 = vor.u32 %v6150_v53, %v5041_v17  ;;  %v5292_v37 = vor.u32 %v6215_v31, %v5291_v30  ;;  %v5276_v33 = vor.u32 %v6211_v22, %v5275_v49  ;;  %v2163_v63 = vadd.f32 %v2162_v52, %v2150_v56  ;;  %v5357_v53 = vld [vmem:[#allocation8 + $0x1f0] sm:$0xf0]  ;;  %v6261_v31 = vld [vmem:[#allocation8 + $0x2e4] sm:$0xf]  ;;  %v6192_v56 = vld [vmem:[#allocation8 + $0xb4] sm:$0xf0] }
 0x14a   :  { %3251 = vmatpush.bf16.msra.mxu2 %v5484_v51  ;;  %v5009_v51 = vld [vmem:[#allocation5 + $0x838] sm:$0xf0]  ;;  %v2151_v57 = vpop.f32.mrf.mxu0  ;;  %v5469_v49 = vld [vmem:[#allocation8 + $0x2d0] sm:$0xf0]  ;;  %v6221_v22 = vld [vmem:[#allocation8 + $0x1a4] sm:$0xf] }
 0x14b   :  { %3232 = vmatpush.bf16.msra.mxu3 %v5116_v20  ;;  %v5420_v20 = vor.u32 %v6247_v42, %v5419_v36  ;;  %v5012_v0 = vor.u32 %v6142_v54, %v5009_v51  ;;  %v2176_v12 = vadd.f32 %v6761_v6, %v2163_v63  ;;  %v5236_v36 = vor.u32 %v6200_v55, %v5235_v3  ;;  %v5219_v42 = vld [vmem:[#allocation8 + $0xc8] sm:$0xf]  ;;  %v5325_v52 = vld [vmem:[#allocation8 + $0x1b0] sm:$0xf0] }
 0x14c   :  { %2415 = vmatpush.bf16.msrb.mxu0 %v5076_v2  ;;  %v6207_v2 = vld [vmem:[#allocation8 + $0x12c] sm:$0xf0]  ;;  %v5220_v54 = vor.u32 %v6196_v58, %v5219_v42  ;;  %v5453_v57 = vld [vmem:[#allocation8 + $0x2b0] sm:$0xf0] }
 0x14d   :  { %3239 = vmatpush.bf16.msra.mxu1 %v5340_v38  ;;  %v5149_v38 = vld [vmem:[#allocation8 + $0x50] sm:$0xf0]  ;;  %v2190_v16 = vpop.f32.mrf.mxu1  ;;  %v5260_v10 = vor.u32 %v6207_v2, %v5259_v1  ;;  %v2440_v6 = vmax.f32 %v2176_v12, 0.0  ;;  %v6249_v1 = vld [vmem:[#allocation8 + $0x284] sm:$0xf] }
 0x14e   :  { %3233 = vmatmul.bf16.vlgmr.msra.gmra.mxu3 %v6764_v9  ;;  %3252 = vmatpush.bf16.msra.mxu2 %v5468_v26  ;;  %v5387_v26 = vld [vmem:[#allocation8 + $0x220] sm:$0xf]  ;;  %v5437_v2 = vld [vmem:[#allocation8 + $0x290] sm:$0xf0]  ;;  %v6245_v12 = vld [vmem:[#allocation8 + $0x264] sm:$0xf] }
 0x14f   :  { %3277 = vmatpush.bf16.msrb.mxu3 %v5232_v61  ;;  %v5403_v61 = vld [vmem:[#allocation8 + $0x240] sm:$0xf]  ;;  %v6774_v4 = vpop.f32.mrf.mxu3  ;;  %v6778_v44 = vpack.c.bf16 %v2440_v6, %v2440_v6  ;;  %v5440_v16 = vor.u32 %v6249_v1, %v5437_v2  ;;  %v5261_v3 = vld [vmem:[#allocation8 + $0x130] sm:$0xf0]  ;;  %v6194_v2 = vld [vmem:[#allocation8 + $0xcc] sm:$0xf] }
 0x150   :  { %2416 = vmatpush.bf16.msrb.mxu0 %v5060_v14  ;;  %v5404_v8 = vor.u32 %v6243_v62, %v5403_v61  ;;  %v5243_v14 = vld [vmem:[#allocation8 + $0x100] sm:$0xf]  ;;  %v2164_v17 = vpop.f32.mrf.mxu2  ;;  %v6217_v61 = vld [vmem:[#allocation8 + $0x184] sm:$0xf]  ;;  %v5309_v62 = vld [vmem:[#allocation8 + $0x190] sm:$0xf0] }
 0x151   :  { %3240 = vmatpush.bf16.msra.mxu1 %v5324_v19  ;;  %v6173_v19 = vld [vmem:[#allocation8 + $0x24] sm:$0xf]  ;;  %v5312_v63 = vor.u32 %v6217_v61, %v5309_v62  ;;  %v5245_v42 = vld [vmem:[#allocation8 + $0x110] sm:$0xf0]  ;;  %v5347_v62 = vld [vmem:[#allocation8 + $0x1c8] sm:$0xf] }
 0x152   :  { %3253 = vmatpush.bf16.msra.mxu2 %v5452_v21  ;;  %v5136_v46 = vor.u32 %v6173_v19, %v5133_v11  ;;  %v6184_v19 = vld [vmem:[#allocation8 + $0x74] sm:$0xf0]  ;;  %v5373_v61 = vld [vmem:[#allocation8 + $0x210] sm:$0xf0] }
 0x153   :  { %3278 = vmatpush.bf16.msrb.mxu3 %v5216_v41  ;;  %v6239_v41 = vld [vmem:[#allocation8 + $0x22c] sm:$0xf0] }
 0x154   :  { %2417 = vmatpush.bf16.msrb.mxu0 %v5044_v29  ;;  %v5388_v21 = vor.u32 %v6239_v41, %v5387_v26  ;;  %v5360_v29 = vor.u32 %v6229_v18, %v5357_v53  ;;  %v5171_v41 = vld [vmem:[#allocation8 + $0x68] sm:$0xf] }
 0x155   :  { %3241 = vmatpush.bf16.msra.mxu1 %v5308_v27  ;;  %5112 = vmatmul.msk.bf16.vlgmr.msrb.gmra.mxu2 %vm1899_vm2, %v6683_v35  ;;  %v5152_v35 = vor.u32 %v6177_v50, %v5149_v38  ;;  %v5244_v27 = vor.u32 %v6203_v15, %v5243_v14  ;;  %v5187_v50 = vld [vmem:[#allocation8 + $0x88] sm:$0xf]  ;;  %v6209_v14 = vld [vmem:[#allocation8 + $0x144] sm:$0xf]  ;;  %v5277_v15 = vld [vmem:[#allocation8 + $0x150] sm:$0xf0]  ;;  %v5172_v18 = vor.u32 %v6184_v19, %v5171_v41 }
 0x156   :  { %3254 = vmatpush.bf16.msra.mxu2 %v5436_v39  ;;  %v5372_v39 = vor.u32 %v6235_v24, %v5371_v59  ;;  %v5155_v53 = vld [vmem:[#allocation8 + $0x48] sm:$0xf]  ;;  %v6180_v59 = vld [vmem:[#allocation8 + $0x54] sm:$0xf0]  ;;  %v6241_v24 = vld [vmem:[#allocation8 + $0x244] sm:$0xf] }
 0x157   :  { %3279 = vmatpush.bf16.msrb.mxu3 %v5200_v23  ;;  %v6169_v23 = vld [vmem:[#allocation8 + $0x4] sm:$0xf]  ;;  %v2203_v30 = vpop.f32.mrf.mxu3  ;;  %v5205_v19 = vld [vmem:[#allocation8 + $0xb8] sm:$0xf0] }
 0x158   :  { %2418 = vmatpush.bf16.msrb.mxu0 %v5028_v48  ;;  %v6257_v48 = vld [vmem:[#allocation8 + $0x2c4] sm:$0xf]  ;;  %v5139_v30 = vld [vmem:[#allocation8 + $0x28] sm:$0xf] }
 0x159   :  { %3242 = vmatpush.bf16.msra.mxu1 %v5292_v37  ;;  %v5488_v37 = vor.u32 %v6261_v31, %v5485_v47  ;;  %v5472_v51 = vor.u32 %v6257_v48, %v5469_v49 }
 0x15a   :  { %3255 = vmatpush.bf16.msra.mxu2 %v5420_v20  ;;  %v5328_v20 = vor.u32 %v6221_v22, %v5325_v52 }
 0x15b   :  { %3280 = vmatpush.bf16.msrb.mxu3 %v5184_v34  ;;  %v5120_v34 = vor.u32 %v6169_v23, %v5117_v28  ;;  %v5280_v23 = vor.u32 %v6209_v14, %v5277_v15  ;;  %v6205_v28 = vld [vmem:[#allocation8 + $0x124] sm:$0xf] }
 0x15c   :  { %2419 = vmatpush.bf16.msrb.mxu0 %v5012_v0  ;;  %v6188_v0 = vld [vmem:[#allocation8 + $0x94] sm:$0xf0]  ;;  %v5264_v7 = vor.u32 %v6205_v28, %v5261_v3  ;;  %v6182_v28 = vld [vmem:[#allocation8 + $0x6c] sm:$0xf] }
 0x15d   :  { %3243 = vmatpush.bf16.msra.mxu1 %v5276_v33  ;;  %v5188_v26 = vor.u32 %v6188_v0, %v5187_v50 }
 0x15e   :  { %3256 = vmatpush.bf16.msra.mxu2 %v5404_v8  ;;  %v6782_v8 = vld [vmem:[#allocation7] sm:$0xf] }
 0x15f   :  { %3281 = vmatpush.bf16.msrb.mxu3 %v5168_v60  ;;  %v6253_v60 = vld [vmem:[#allocation8 + $0x2a4] sm:$0xf] }
 0x160   :  { %2420 = vmatpush.bf16.msrb.mxu0 %v4996_v13  ;;  %v5456_v38 = vor.u32 %v6253_v60, %v5453_v57  ;;  %v2214_v11 = vpop.f32.mrf.mxu0  ;;  %v5421_v13 = vld [vmem:[#allocation8 + $0x270] sm:$0xf0]  ;;  %v6233_v57 = vld [vmem:[#allocation8 + $0x204] sm:$0xf] }
 0x161   :  { %3244 = vmatpush.bf16.msra.mxu1 %v5260_v10  ;;  %v5296_v10 = vor.u32 %v6213_v5, %v5293_v40  ;;  %v5376_v0 = vor.u32 %v6233_v57, %v5373_v61  ;;  %v5221_v5 = vld [vmem:[#allocation8 + $0xd8] sm:$0xf0]  ;;  %v5331_v40 = vld [vmem:[#allocation8 + $0x1a8] sm:$0xf]  ;;  %v5579_v61 = vld [vmem:[#allocation8 + $0x3a0] sm:$0xf] }
 0x162   :  { %3257 = vmatpush.bf16.msra.mxu2 %v5388_v21  ;;  %v5424_v21 = vor.u32 %v6245_v12, %v5421_v13  ;;  %v5224_v41 = vor.u32 %v6194_v2, %v5221_v5  ;;  %v5315_v12 = vld [vmem:[#allocation8 + $0x188] sm:$0xf]  ;;  %v6220_v13 = vld [vmem:[#allocation8 + $0x194] sm:$0xf0]  ;;  %v5141_v57 = vld [vmem:[#allocation8 + $0x38] sm:$0xf0] }
 0x163   :  { %3282 = vmatpush.bf16.msrb.mxu3 %v5152_v35  ;;  %2421 = vmatmul.bf16.vlgmr.msrb.gmra.mxu0 %v6687_v25  ;;  %v5203_v25 = vld [vmem:[#allocation8 + $0xa8] sm:$0xf]  ;;  %v443_v35 = vperm.slane %v6782_v8, 2  ;;  %v6230_v2 = vld [vmem:[#allocation8 + $0x1ec] sm:$0xf] }
 0x164   :  { %v5204_v33 = vor.u32 %v6192_v56, %v5203_v25  ;;  %v6198_v25 = vld [vmem:[#allocation8 + $0xec] sm:$0xf]  ;;  %v5365_v5 = vld [vmem:[#allocation8 + $0x1f8] sm:$0xf0] }
 0x165   :  { %3245 = vmatpush.bf16.msra.mxu1 %v5244_v27  ;;  %v6785_v17 = vpop.f32.mrf.mxu1  ;;  %v5405_v27 = vld [vmem:[#allocation8 + $0x250] sm:$0xf0] }
 0x166   :  { %3258 = vmatpush.bf16.msra.mxu2 %v5372_v39  ;;  %v5408_v31 = vor.u32 %v6241_v24, %v5405_v27  ;;  %v6237_v39 = vld [vmem:[#allocation8 + $0x224] sm:$0xf] }
 0x167   :  { %3283 = vmatpush.bf16.msrb.mxu3 %v5136_v46  ;;  %v2189_v46 = vadd.f32 %v6769_v43, %v443_v35  ;;  %v6176_v43 = vld [vmem:[#allocation8 + $0x34] sm:$0xf0] }
 0x168   :  { %3246 = vmatmul.bf16.vlgmr.msra.gmra.mxu1 %v6778_v44  ;;  %v2227_v55 = vpop.f32.mrf.mxu2  ;;  %v2216_v32 = vpop.f32.mrf.mxu0  ;;  %v5140_v58 = vor.u32 %v6176_v43, %v5139_v30  ;;  %v6224_v35 = vld [vmem:[#allocation8 + $0x1b4] sm:$0xf0]  ;;  %v5611_v30 = vld [vmem:[#allocation8 + $0x3e0] sm:$0xf] }
 0x169   :  { %3290 = vmatpush.bf16.msrb.mxu1 %v5360_v29  ;;  %v5156_v29 = vor.u32 %v6180_v59, %v5155_v53  ;;  %v2202_v47 = vadd.f32 %v6774_v4, %v2189_v46  ;;  %v6172_v4 = vld [vmem:[#allocation8 + $0x14] sm:$0xf0]  ;;  %v6186_v53 = vld [vmem:[#allocation8 + $0x8c] sm:$0xf]  ;;  %v5299_v46 = vld [vmem:[#allocation8 + $0x168] sm:$0xf] }
 0x16a   :  { %3303 = vmatpush.bf16.msrb.mxu2 %v5488_v37  ;;  %v5363_v37 = vld [vmem:[#allocation8 + $0x1e8] sm:$0xf] }
 0x16b   :  { %3284 = vmatpush.bf16.msrb.mxu3 %v5120_v34  ;;  %v5389_v34 = vld [vmem:[#allocation8 + $0x230] sm:$0xf0]  ;;  %v2215_v22 = vadd.f32 %v2214_v11, %v2202_v47  ;;  %v6212_v47 = vld [vmem:[#allocation8 + $0x154] sm:$0xf0] }
 0x16c   :  { %v5392_v49 = vor.u32 %v6237_v39, %v5389_v34  ;;  %v6178_v34 = vld [vmem:[#allocation8 + $0x4c] sm:$0xf] }
 0x16d   :  { %3291 = vmatpush.bf16.msrb.mxu1 %v5344_v45  ;;  %v6788_v6 = vpop.f32.mrf.mxu3  ;;  %v6232_v45 = vld [vmem:[#allocation8 + $0x1f4] sm:$0xf0]  ;;  %v2242_v48 = vpop.f32.mrf.mxu1 }
 0x16e   :  { %3285 = vmatmul.bf16.vlgmr.msrb.gmra.mxu3 %v6764_v9  ;;  %3304 = vmatpush.bf16.msrb.mxu2 %v5472_v51  ;;  %v5364_v51 = vor.u32 %v6232_v45, %v5363_v37  ;;  %v5595_v37 = vld [vmem:[#allocation8 + $0x3c0] sm:$0xf]  ;;  %v6291_v45 = vld [vmem:[#allocation8 + $0x3cc] sm:$0xf0]  ;;  %v5267_v48 = vld [vmem:[#allocation8 + $0x128] sm:$0xf] }
 0x16f   :  { %3329 = vmatpush.bf16.msra.mxu3 %v5236_v36  ;;  %v6201_v36 = vld [vmem:[#allocation8 + $0x104] sm:$0xf] }
 0x170   :  { %v5248_v52 = vor.u32 %v6201_v36, %v5245_v42  ;;  %v2229_v56 = vpop.f32.mrf.mxu2  ;;  %v5157_v42 = vld [vmem:[#allocation8 + $0x58] sm:$0xf0] }
 0x171   :  { %3292 = vmatpush.bf16.msrb.mxu1 %v5328_v20  ;;  %v5237_v20 = vld [vmem:[#allocation8 + $0xf8] sm:$0xf0] }
 0x172   :  { %3305 = vmatpush.bf16.msrb.mxu2 %v5456_v38  ;;  %v2228_v38 = vadd.f32 %v2227_v55, %v2215_v22  ;;  %v5173_v55 = vld [vmem:[#allocation8 + $0x78] sm:$0xf0] }
 0x173   :  { %3330 = vmatpush.bf16.msra.mxu3 %v5220_v54  ;;  %v5123_v54 = vld [vmem:[#allocation8 + $0x8] sm:$0xf]  ;;  %v5176_v39 = vor.u32 %v6182_v28, %v5173_v55 }
 0x174   :  { %v5124_v50 = vor.u32 %v6172_v4, %v5123_v54  ;;  %v5160_v4 = vor.u32 %v6178_v34, %v5157_v42  ;;  %v5427_v34 = vld [vmem:[#allocation8 + $0x268] sm:$0xf]  ;;  %v5317_v42 = vld [vmem:[#allocation8 + $0x198] sm:$0xf0] }
 0x175   :  { %3293 = vmatpush.bf16.msrb.mxu1 %v5312_v63  ;;  %v2255_v60 = vpop.f32.mrf.mxu3  ;;  %v5240_v63 = vor.u32 %v6198_v25, %v5237_v20  ;;  %v5491_v25 = vld [vmem:[#allocation8 + $0x2e8] sm:$0xf]  ;;  %v6174_v20 = vld [vmem:[#allocation8 + $0x2c] sm:$0xf] }
 0x176   :  { %3306 = vmatpush.bf16.msrb.mxu2 %v5440_v16  ;;  %v5332_v16 = vor.u32 %v6224_v35, %v5331_v40 }
 0x177   :  { %3331 = vmatpush.bf16.msra.mxu3 %v5204_v33  ;;  %v6228_v33 = vld [vmem:[#allocation8 + $0x1d4] sm:$0xf0] }
 0x178   :  { %v5348_v1 = vor.u32 %v6228_v33, %v5347_v62  ;;  %v6287_v62 = vld [vmem:[#allocation8 + $0x3ac] sm:$0xf0] }
 0x179   :  { %3294 = vmatpush.bf16.msrb.mxu1 %v5296_v10  ;;  %v6190_v10 = vld [vmem:[#allocation8 + $0xac] sm:$0xf] }
 0x17a   :  { %3307 = vmatpush.bf16.msrb.mxu2 %v5424_v21  ;;  %v5208_v15 = vor.u32 %v6190_v10, %v5205_v19  ;;  %v6170_v10 = vld [vmem:[#allocation8 + $0xc] sm:$0xf] }
 0x17b   :  { %3332 = vmatpush.bf16.msra.mxu3 %v5188_v26  ;;  %v2241_v26 = vadd.f32 %v6785_v17, %v2228_v38  ;;  %v5189_v17 = vld [vmem:[#allocation8 + $0x98] sm:$0xf0]  ;;  %v6204_v38 = vld [vmem:[#allocation8 + $0x114] sm:$0xf0] }
 0x17c   :  { %v5192_v24 = vor.u32 %v6186_v53, %v5189_v17  ;;  %v6226_v53 = vld [vmem:[#allocation8 + $0x1cc] sm:$0xf]  ;;  %v5349_v17 = vld [vmem:[#allocation8 + $0x1d8] sm:$0xf0] }
 0x17d   :  { %3295 = vmatpush.bf16.msrb.mxu1 %v5280_v23  ;;  %v2305_v11 = vpop.f32.mrf.mxu3  ;;  %v2254_v14 = vadd.f32 %v6788_v6, %v2241_v26  ;;  %v6216_v23 = vld [vmem:[#allocation8 + $0x174] sm:$0xf0]  ;;  %v6295_v6 = vld [vmem:[#allocation8 + $0x3ec] sm:$0xf0]  ;;  %v5144_v26 = vor.u32 %v6174_v20, %v5141_v57  ;;  %v5499_v20 = vld [vmem:[#allocation8 + $0x300] sm:$0xf] }
 0x17e   :  { %3308 = vmatpush.bf16.msrb.mxu2 %v5408_v31  ;;  %v5300_v3 = vor.u32 %v6216_v23, %v5299_v46  ;;  %v5283_v31 = vld [vmem:[#allocation8 + $0x148] sm:$0xf]  ;;  %v6256_v23 = vld [vmem:[#allocation8 + $0x2b4] sm:$0xf0] }
 0x17f   :  { %3333 = vmatpush.bf16.msra.mxu3 %v5172_v18  ;;  %v5316_v18 = vor.u32 %v6220_v13, %v5315_v12  ;;  %v5284_v36 = vor.u32 %v6212_v47, %v5283_v31  ;;  %v5563_v12 = vld [vmem:[#allocation8 + $0x380] sm:$0xf]  ;;  %v6283_v13 = vld [vmem:[#allocation8 + $0x38c] sm:$0xf0]  ;;  %v5459_v46 = vld [vmem:[#allocation8 + $0x2a8] sm:$0xf] }
 0x180   :  { %v2266_v21 = vpop.f32.mrf.mxu0  ;;  %v5460_v55 = vor.u32 %v6256_v23, %v5459_v46  ;;  %v6252_v31 = vld [vmem:[#allocation8 + $0x294] sm:$0xf0]  ;;  %v5531_v47 = vld [vmem:[#allocation8 + $0x340] sm:$0xf]  ;;  %v5581_v46 = vld [vmem:[#allocation8 + $0x3b0] sm:$0xf0] }
 0x181   :  { %3296 = vmatpush.bf16.msrb.mxu1 %v5264_v7  ;;  %v2267_v59 = vadd.f32 %v2266_v21, %v2254_v14  ;;  %v5612_v7 = vor.u32 %v6295_v6, %v5611_v30  ;;  %v5368_v14 = vor.u32 %v6230_v2, %v5365_v5  ;;  %v6222_v30 = vld [vmem:[#allocation8 + $0x1ac] sm:$0xf]  ;;  %v5333_v6 = vld [vmem:[#allocation8 + $0x1b8] sm:$0xf0]  ;;  %v6240_v2 = vld [vmem:[#allocation8 + $0x234] sm:$0xf0] }
 0x182   :  { %3309 = vmatpush.bf16.msrb.mxu2 %v5392_v49  ;;  %v6208_v49 = vld [vmem:[#allocation8 + $0x134] sm:$0xf0] }
 0x183   :  { %3334 = vmatpush.bf16.msra.mxu3 %v5156_v29  ;;  %3264 = vmatpush.bf16.msra.mxu0 %v5612_v7  ;;  %v5268_v60 = vor.u32 %v6208_v49, %v5267_v48  ;;  %v6275_v7 = vld [vmem:[#allocation8 + $0x34c] sm:$0xf0] }
 0x185   :  { %3297 = vmatpush.bf16.msrb.mxu1 %v5248_v52  ;;  %v2292_v27 = vpop.f32.mrf.mxu1  ;;  %v2307_v29 = vpop.f32.mrf.mxu3  ;;  %v5596_v52 = vor.u32 %v6291_v45, %v5595_v37  ;;  %v6248_v37 = vld [vmem:[#allocation8 + $0x274] sm:$0xf0]  ;;  %v5515_v45 = vld [vmem:[#allocation8 + $0x320] sm:$0xf] }
 0x186   :  { %3310 = vmatpush.bf16.msrb.mxu2 %v5376_v0  ;;  %v5580_v0 = vor.u32 %v6287_v62, %v5579_v61  ;;  %v5443_v29 = vld [vmem:[#allocation8 + $0x288] sm:$0xf]  ;;  %v6293_v61 = vld [vmem:[#allocation8 + $0x3e4] sm:$0xf]  ;;  %v5613_v62 = vld [vmem:[#allocation8 + $0x3f0] sm:$0xf0] }
 0x187   :  { %3335 = vmatpush.bf16.msra.mxu3 %v5140_v58  ;;  %3265 = vmatpush.bf16.msra.mxu0 %v5596_v52  ;;  %v6214_v52 = vld [vmem:[#allocation8 + $0x16c] sm:$0xf] }
 0x188   :  { %3298 = vmatmul.bf16.vlgmr.msrb.gmra.mxu1 %v6778_v44  ;;  %v2279_v43 = vpop.f32.mrf.mxu2  ;;  %v2268_v22 = vpop.f32.mrf.mxu0 }
 0x189   :  { %3342 = vmatpush.bf16.msra.mxu1 %v5364_v51  ;;  %v2280_v32 = vadd.f32 %v2279_v43, %v2267_v59  ;;  %v6264_v51 = vld [vmem:[#allocation8 + $0x2f4] sm:$0xf0]  ;;  %v5547_v59 = vld [vmem:[#allocation8 + $0x360] sm:$0xf]  ;;  %v5532_v43 = vor.u32 %v6275_v7, %v5531_v47  ;;  %v5428_v22 = vor.u32 %v6248_v37, %v5427_v34  ;;  %v5565_v47 = vld [vmem:[#allocation8 + $0x390] sm:$0xf0] }
 0x18a   :  { %v6277_v34 = vld [vmem:[#allocation8 + $0x364] sm:$0xf] }
 0x18b   :  { %3336 = vmatpush.bf16.msra.mxu3 %v5124_v50  ;;  %v2293_v58 = vadd.f32 %v2292_v27, %v2280_v32  ;;  %v5251_v50 = vld [vmem:[#allocation8 + $0x108] sm:$0xf]  ;;  %3266 = vmatpush.bf16.msra.mxu0 %v5580_v0  ;;  %v5352_v27 = vor.u32 %v6226_v53, %v5349_v17  ;;  %v5336_v32 = vor.u32 %v6222_v30, %v5333_v6  ;;  %v5477_v30 = vld [vmem:[#allocation8 + $0x2d8] sm:$0xf0] }
 0x18c   :  { %v5252_v19 = vor.u32 %v6204_v38, %v5251_v50  ;;  %v6210_v50 = vld [vmem:[#allocation8 + $0x14c] sm:$0xf]  ;;  %v5285_v38 = vld [vmem:[#allocation8 + $0x158] sm:$0xf0]  ;;  %v5616_v0 = vor.u32 %v6293_v61, %v5613_v62 }
 0x18d   :  { %3343 = vmatpush.bf16.msra.mxu1 %v5348_v1  ;;  %v2306_v54 = vadd.f32 %v2305_v11, %v2293_v58  ;;  %v2294_v56 = vpop.f32.mrf.mxu1  ;;  %v5492_v1 = vor.u32 %v6264_v51, %v5491_v25  ;;  %v5125_v11 = vld [vmem:[#allocation8 + $0x18] sm:$0xf0]  ;;  %v6271_v58 = vld [vmem:[#allocation8 + $0x32c] sm:$0xf0]  ;;  %v5411_v25 = vld [vmem:[#allocation8 + $0x248] sm:$0xf] }
 0x18e   :  { %3337 = vmatmul.bf16.vlgmr.msra.gmra.mxu3 %v6764_v9  ;;  %v5128_v21 = vor.u32 %v6170_v10, %v5125_v11  ;;  %v5516_v48 = vor.u32 %v6271_v58, %v5515_v45  ;;  %v6244_v51 = vld [vmem:[#allocation8 + $0x254] sm:$0xf0]  ;;  %v6267_v56 = vld [vmem:[#allocation8 + $0x30c] sm:$0xf0]  ;;  %v6206_v10 = vld [vmem:[#allocation8 + $0x12c] sm:$0xf] }
 0x18f   :  { %3381 = vmatpush.bf16.msrb.mxu3 %v5240_v63  ;;  %v2441_v33 = vmax.f32 %v2306_v54, 0.0  ;;  %v5301_v54 = vld [vmem:[#allocation8 + $0x178] sm:$0xf0]  ;;  %v5500_v57 = vor.u32 %v6267_v56, %v5499_v20  ;;  %v6250_v58 = vld [vmem:[#allocation8 + $0x28c] sm:$0xf] }
 0x190   :  { %v2281_v40 = vpop.f32.mrf.mxu2  ;;  %v5429_v20 = vld [vmem:[#allocation8 + $0x278] sm:$0xf0]  ;;  %v6269_v56 = vld [vmem:[#allocation8 + $0x324] sm:$0xf] }
 0x191   :  { %3344 = vmatpush.bf16.msra.mxu1 %v5332_v16  ;;  %v6795_v63 = vpop.f32.mrf.mxu3  ;;  %v6797_v35 = vpack.c.bf16 %v2441_v33, %v2441_v33  ;;  %v6260_v16 = vld [vmem:[#allocation8 + $0x2d4] sm:$0xf0]  ;;  %v5412_v33 = vor.u32 %v6244_v51, %v5411_v25  ;;  %v5288_v40 = vor.u32 %v6210_v50, %v5285_v38  ;;  %v6246_v51 = vld [vmem:[#allocation8 + $0x26c] sm:$0xf]  ;;  %v5413_v50 = vld [vmem:[#allocation8 + $0x258] sm:$0xf0] }
 0x193   :  { %3382 = vmatpush.bf16.msrb.mxu3 %v5224_v41  ;;  %v5475_v41 = vld [vmem:[#allocation8 + $0x2c8] sm:$0xf]  ;;  %3259 = vmatmul.bf16.vlgmr.msra.gmra.mxu2 %v6797_v35 }
 0x194   :  { %3355 = vmatpush.bf16.msra.mxu2 %v5492_v1  ;;  %v5395_v1 = vld [vmem:[#allocation8 + $0x228] sm:$0xf] }
 0x195   :  { %3345 = vmatpush.bf16.msra.mxu1 %v5316_v18  ;;  %v5476_v18 = vor.u32 %v6260_v16, %v5475_v41  ;;  %v5597_v41 = vld [vmem:[#allocation8 + $0x3d0] sm:$0xf0]  ;;  %v5396_v16 = vor.u32 %v6240_v2, %v5395_v1 }
 0x197   :  { %3383 = vmatpush.bf16.msrb.mxu3 %v5208_v15  ;;  %v5564_v15 = vor.u32 %v6283_v13, %v5563_v12  ;;  %v5379_v13 = vld [vmem:[#allocation8 + $0x208] sm:$0xf] }
 0x198   :  { %3356 = vmatpush.bf16.msra.mxu2 %v5476_v18  ;;  %v5493_v18 = vld [vmem:[#allocation8 + $0x2f8] sm:$0xf0] }
 0x199   :  { %3346 = vmatpush.bf16.msra.mxu1 %v5300_v3  ;;  %3267 = vmatpush.bf16.msra.mxu0 %v5564_v15  ;;  %v2346_v28 = vpop.f32.mrf.mxu3  ;;  %v6262_v15 = vld [vmem:[#allocation8 + $0x2ec] sm:$0xf] }
 0x19b   :  { %3384 = vmatpush.bf16.msrb.mxu3 %v5192_v24  ;;  %v6279_v24 = vld [vmem:[#allocation8 + $0x36c] sm:$0xf0] }
 0x19c   :  { %v5548_v3 = vor.u32 %v6279_v24, %v5547_v59  ;;  %3357 = vmatpush.bf16.msra.mxu2 %v5460_v55  ;;  %v6202_v59 = vld [vmem:[#allocation8 + $0x10c] sm:$0xf]  ;;  %v5253_v24 = vld [vmem:[#allocation8 + $0x118] sm:$0xf0] }
 0x19d   :  { %3347 = vmatpush.bf16.msra.mxu1 %v5284_v36  ;;  %v6218_v36 = vld [vmem:[#allocation8 + $0x18c] sm:$0xf]  ;;  %v5256_v6 = vor.u32 %v6202_v59, %v5253_v24 }
 0x19e   :  { %3268 = vmatpush.bf16.msra.mxu0 %v5548_v3  ;;  %v5320_v49 = vor.u32 %v6218_v36, %v5317_v42  ;;  %v5496_v3 = vor.u32 %v6262_v15, %v5493_v18  ;;  %v5549_v36 = vld [vmem:[#allocation8 + $0x370] sm:$0xf0] }
 0x19f   :  { %3385 = vmatpush.bf16.msrb.mxu3 %v5176_v39  ;;  %v5444_v39 = vor.u32 %v6252_v31, %v5443_v29  ;;  %v6258_v29 = vld [vmem:[#allocation8 + $0x2cc] sm:$0xf]  ;;  %v6281_v31 = vld [vmem:[#allocation8 + $0x384] sm:$0xf]  ;;  %v5552_v37 = vor.u32 %v6277_v34, %v5549_v36 }
 0x1a0   :  { %v5568_v7 = vor.u32 %v6281_v31, %v5565_v47  ;;  %v6296_v31 = vld [vmem:[#allocation8 + $0x3f4] sm:$0xf0] }
 0x1a1   :  { %3348 = vmatpush.bf16.msra.mxu1 %v5268_v60  ;;  %3358 = vmatpush.bf16.msra.mxu2 %v5444_v39  ;;  %v5304_v60 = vor.u32 %v6214_v52, %v5301_v54  ;;  %v5461_v39 = vld [vmem:[#allocation8 + $0x2b8] sm:$0xf0]  ;;  %v444_v52 = vperm.slane %v6782_v8, 3  ;;  %v5501_v8 = vld [vmem:[#allocation8 + $0x310] sm:$0xf0] }
 0x1a2   :  { %3269 = vmatpush.bf16.msra.mxu0 %v5532_v43  ;;  %v5480_v43 = vor.u32 %v6258_v29, %v5477_v30 }
 0x1a3   :  { %3386 = vmatpush.bf16.msrb.mxu3 %v5160_v4  ;;  %v6802_v4 = vpop.f32.mrf.mxu0  ;;  %3311 = vmatmul.bf16.vlgmr.msrb.gmra.mxu2 %v6797_v35 }
 0x1a5   :  { %3349 = vmatpush.bf16.msra.mxu1 %v5252_v19  ;;  %3359 = vmatpush.bf16.msra.mxu2 %v5428_v22  ;;  %v5269_v19 = vld [vmem:[#allocation8 + $0x138] sm:$0xf0]  ;;  %v5533_v22 = vld [vmem:[#allocation8 + $0x350] sm:$0xf0] }
 0x1a6   :  { %3270 = vmatpush.bf16.msra.mxu0 %v5516_v48  ;;  %v5272_v17 = vor.u32 %v6206_v10, %v5269_v19  ;;  %v5445_v48 = vld [vmem:[#allocation8 + $0x298] sm:$0xf0] }
 0x1a7   :  { %3387 = vmatpush.bf16.msrb.mxu3 %v5144_v26  ;;  %v6289_v26 = vld [vmem:[#allocation8 + $0x3c4] sm:$0xf]  ;;  %v5448_v25 = vor.u32 %v6250_v58, %v5445_v48  ;;  %v5571_v48 = vld [vmem:[#allocation8 + $0x388] sm:$0xf] }
 0x1a8   :  { %3350 = vmatmul.bf16.vlgmr.msra.gmra.mxu1 %v6778_v44  ;;  %v6807_v5 = vpop.f32.mrf.mxu2  ;;  %v5600_v12 = vor.u32 %v6289_v26, %v5597_v41  ;;  %v6238_v41 = vld [vmem:[#allocation8 + $0x22c] sm:$0xf] }
 0x1a9   :  { %3394 = vmatpush.bf16.msrb.mxu1 %v5368_v14  ;;  %3360 = vmatpush.bf16.msra.mxu2 %v5412_v33  ;;  %v6236_v14 = vld [vmem:[#allocation8 + $0x214] sm:$0xf0]  ;;  %v6242_v33 = vld [vmem:[#allocation8 + $0x24c] sm:$0xf] }
 0x1aa   :  { %3271 = vmatpush.bf16.msra.mxu0 %v5500_v57  ;;  %v5380_v23 = vor.u32 %v6236_v14, %v5379_v13  ;;  %v2319_v57 = vadd.f32 %v6802_v4, %v444_v52  ;;  %v5555_v52 = vld [vmem:[#allocation8 + $0x368] sm:$0xf] }
 0x1ab   :  { %3388 = vmatpush.bf16.msrb.mxu3 %v5128_v21  ;;  %v2320_v11 = vpop.f32.mrf.mxu0  ;;  %v6285_v21 = vld [vmem:[#allocation8 + $0x3a4] sm:$0xf] }
 0x1ac   :  { %v5584_v28 = vor.u32 %v6285_v21, %v5581_v46  ;;  %v2332_v1 = vadd.f32 %v6807_v5, %v2319_v57  ;;  %v6234_v11 = vld [vmem:[#allocation8 + $0x20c] sm:$0xf] }
 0x1ad   :  { %3395 = vmatpush.bf16.msrb.mxu1 %v5352_v27  ;;  %3361 = vmatpush.bf16.msra.mxu2 %v5396_v16  ;;  %v5397_v16 = vld [vmem:[#allocation8 + $0x238] sm:$0xf0] }
 0x1ae   :  { %3389 = vmatmul.bf16.vlgmr.msrb.gmra.mxu3 %v6764_v9  ;;  %v6804_v9 = vpop.f32.mrf.mxu1  ;;  %3316 = vmatpush.bf16.msrb.mxu0 %v5616_v0  ;;  %v6265_v0 = vld [vmem:[#allocation8 + $0x304] sm:$0xf]  ;;  %v2345_v4 = vadd.f32 %v6795_v63, %v2332_v1  ;;  %v5400_v10 = vor.u32 %v6238_v41, %v5397_v16  ;;  %v5621_v1 = vld [vmem:[#allocation8 + $0x3f8] sm:$0xf0]  ;;  %v6290_v41 = vld [vmem:[#allocation8 + $0x3cc] sm:$0xf] }
 0x1af   :  { %v5504_v2 = vor.u32 %v6265_v0, %v5501_v8  ;;  %v6294_v8 = vld [vmem:[#allocation8 + $0x3ec] sm:$0xf]  ;;  %v5605_v16 = vld [vmem:[#allocation8 + $0x3d8] sm:$0xf0] }
 0x1b0   :  { %v2333_v55 = vpop.f32.mrf.mxu2  ;;  %v2358_v14 = vadd.f32 %v6804_v9, %v2345_v4  ;;  %v5608_v4 = vor.u32 %v6290_v41, %v5605_v16  ;;  %v5635_v41 = vld [vmem:[#allocation11 + $0x10] sm:$0xf]  ;;  %v6300_v16 = vld [vmem:[#allocation11 + $0x14] sm:$0xf0] }
 0x1b1   :  { %3396 = vmatpush.bf16.msrb.mxu1 %v5336_v32  ;;  %v6809_v27 = vpop.f32.mrf.mxu3  ;;  %3362 = vmatpush.bf16.msra.mxu2 %v5380_v23  ;;  %v6254_v32 = vld [vmem:[#allocation8 + $0x2ac] sm:$0xf]  ;;  %v6820_v23 = vld [vmem:[#allocation10] sm:$0xf] }
 0x1b2   :  { %3317 = vmatpush.bf16.msrb.mxu0 %v5600_v12  ;;  %v5464_v45 = vor.u32 %v6254_v32, %v5461_v39  ;;  %v5381_v12 = vld [vmem:[#allocation8 + $0x218] sm:$0xf0]  ;;  %v2577_v59 = vperm.slane %v6820_v23, 0  ;;  %v6292_v32 = vld [vmem:[#allocation8 + $0x3d4] sm:$0xf0]  ;;  %v2578_v57 = vperm.slane %v6820_v23, 1 }
 0x1b3   :  { %v5384_v5 = vor.u32 %v6234_v11, %v5381_v12  ;;  %v5589_v11 = vld [vmem:[#allocation8 + $0x3b8] sm:$0xf0] }
 0x1b4   :  { %3363 = vmatmul.bf16.vlgmr.msra.gmra.mxu2 %v6797_v35 }
 0x1b5   :  { %3397 = vmatpush.bf16.msrb.mxu1 %v5320_v49  ;;  %3407 = vmatpush.bf16.msrb.mxu2 %v5496_v3  ;;  %v6273_v49 = vld [vmem:[#allocation8 + $0x344] sm:$0xf] }
 0x1b6   :  { %v2359_v53 = vpop.f32.mrf.mxu1  ;;  %3318 = vmatpush.bf16.msrb.mxu0 %v5584_v28  ;;  %v5536_v54 = vor.u32 %v6273_v49, %v5533_v22  ;;  %v6284_v49 = vld [vmem:[#allocation8 + $0x394] sm:$0xf0] }
 0x1b7   :  { %v5572_v22 = vor.u32 %v6284_v49, %v5571_v48  ;;  %v5667_v48 = vld [vmem:[#allocation11 + $0x50] sm:$0xf]  ;;  %v6308_v49 = vld [vmem:[#allocation11 + $0x54] sm:$0xf0] }
 0x1b9   :  { %3398 = vmatpush.bf16.msrb.mxu1 %v5304_v60  ;;  %v2398_v42 = vpop.f32.mrf.mxu3  ;;  %3408 = vmatpush.bf16.msrb.mxu2 %v5480_v43  ;;  %v5517_v60 = vld [vmem:[#allocation8 + $0x330] sm:$0xf0] }
 0x1ba   :  { %3319 = vmatpush.bf16.msrb.mxu0 %v5568_v7  ;;  %v5520_v61 = vor.u32 %v6269_v56, %v5517_v60  ;;  %v5587_v42 = vld [vmem:[#allocation8 + $0x3a8] sm:$0xf]  ;;  %v6276_v56 = vld [vmem:[#allocation8 + $0x354] sm:$0xf0] }
 0x1bd   :  { %3399 = vmatpush.bf16.msrb.mxu1 %v5288_v40  ;;  %3409 = vmatpush.bf16.msrb.mxu2 %v5464_v45  ;;  %v5416_v40 = vor.u32 %v6242_v33, %v5413_v50  ;;  %v5507_v50 = vld [vmem:[#allocation8 + $0x308] sm:$0xf] }
 0x1be   :  { %3320 = vmatpush.bf16.msrb.mxu0 %v5552_v37  ;;  %v6288_v37 = vld [vmem:[#allocation8 + $0x3b4] sm:$0xf0] }
 0x1bf   :  { %v5588_v58 = vor.u32 %v6288_v37, %v5587_v42  ;;  %v6310_v42 = vld [vmem:[#allocation11 + $0x64] sm:$0xf0] }
 0x1c0   :  { %v2370_v62 = vpop.f32.mrf.mxu0 }
 0x1c1   :  { %3400 = vmatpush.bf16.msrb.mxu1 %v5272_v17  ;;  %3410 = vmatpush.bf16.msrb.mxu2 %v5448_v25  ;;  %v2371_v53 = vadd.f32 %v2370_v62, %v2358_v14  ;;  %v6282_v14 = vld [vmem:[#allocation8 + $0x38c] sm:$0xf] }
 0x1c2   :  { %3321 = vmatpush.bf16.msrb.mxu0 %v5536_v54  ;;  %v6280_v54 = vld [vmem:[#allocation8 + $0x374] sm:$0xf0] }
 0x1c5   :  { %3401 = vmatpush.bf16.msrb.mxu1 %v5256_v6  ;;  %v2409_v38 = vpop.f32.mrf.mxu1  ;;  %v5619_v6 = vld [vmem:[#allocation8 + $0x3e8] sm:$0xf] }
 0x1c6   :  { %3322 = vmatpush.bf16.msrb.mxu0 %v5520_v61  ;;  %v5620_v7 = vor.u32 %v6296_v31, %v5619_v6  ;;  %v5523_v61 = vld [vmem:[#allocation8 + $0x328] sm:$0xf] }
 0x1c8   :  { %3402 = vmatmul.bf16.vlgmr.msrb.gmra.mxu1 %v6778_v44  ;;  %v5432_v44 = vor.u32 %v6246_v51, %v5429_v20  ;;  %v2383_v26 = vpop.f32.mrf.mxu2  ;;  %v2372_v19 = vpop.f32.mrf.mxu0  ;;  %v5556_v51 = vor.u32 %v6280_v54, %v5555_v52  ;;  %v5539_v20 = vld [vmem:[#allocation8 + $0x348] sm:$0xf]  ;;  %v5659_v52 = vld [vmem:[#allocation11 + $0x40] sm:$0xf]  ;;  %v6306_v54 = vld [vmem:[#allocation11 + $0x44] sm:$0xf0] }
 0x1c9   :  { %v2384_v17 = vadd.f32 %v2383_v26, %v2371_v53  ;;  %v5540_v60 = vor.u32 %v6276_v56, %v5539_v20  ;;  %v5624_v26 = vor.u32 %v6294_v8, %v5621_v1  ;;  %v6286_v19 = vld [vmem:[#allocation8 + $0x3ac] sm:$0xf]  ;;  %v5557_v53 = vld [vmem:[#allocation8 + $0x378] sm:$0xf0]  ;;  %v5739_v56 = vld [vmem:[#allocation11 + $0xe0] sm:$0xf] }
 0x1ca   :  { %3411 = vmatpush.bf16.msrb.mxu2 %v5432_v44  ;;  %3323 = vmatpush.bf16.msrb.mxu0 %v5504_v2  ;;  %v6272_v44 = vld [vmem:[#allocation8 + $0x334] sm:$0xf0]  ;;  %v6302_v8 = vld [vmem:[#allocation11 + $0x24] sm:$0xf0] }
 0x1cb   :  { %v2397_v46 = vadd.f32 %v6809_v27, %v2384_v17  ;;  %v5603_v27 = vld [vmem:[#allocation8 + $0x3c8] sm:$0xf]  ;;  %v5524_v62 = vor.u32 %v6272_v44, %v5523_v61  ;;  %v5651_v44 = vld [vmem:[#allocation11 + $0x30] sm:$0xf] }
 0x1cc   :  { %v5604_v34 = vor.u32 %v6292_v32, %v5603_v27  ;;  %v5683_v27 = vld [vmem:[#allocation11 + $0x70] sm:$0xf]  ;;  %v6312_v32 = vld [vmem:[#allocation11 + $0x74] sm:$0xf0] }
 0x1cd   :  { %v2411_v13 = vpop.f32.mrf.mxu1  ;;  %v2410_v24 = vadd.f32 %v2409_v38, %v2397_v46  ;;  %v6268_v38 = vld [vmem:[#allocation8 + $0x314] sm:$0xf0]  ;;  %v5541_v46 = vld [vmem:[#allocation8 + $0x358] sm:$0xf0] }
 0x1ce   :  { %3412 = vmatpush.bf16.msrb.mxu2 %v5416_v40  ;;  %v5508_v40 = vor.u32 %v6268_v38, %v5507_v50  ;;  %v5592_v13 = vor.u32 %v6286_v19, %v5589_v11  ;;  %v6324_v19 = vld [vmem:[#allocation11 + $0xd4] sm:$0xf0] }
 0x1d0   :  { %v2385_v18 = vpop.f32.mrf.mxu2 }
 0x1d1   :  { %v3234_v15 = vpop.f32.mrf.mxu3  ;;  %v6278_v18 = vld [vmem:[#allocation8 + $0x36c] sm:$0xf] }
 0x1d2   :  { %3413 = vmatpush.bf16.msrb.mxu2 %v5400_v10  ;;  %v3235_v55 = vadd.f32 %v3234_v15, %v2577_v59  ;;  %v5573_v15 = vld [vmem:[#allocation8 + $0x398] sm:$0xf0] }
 0x1d6   :  { %3414 = vmatpush.bf16.msrb.mxu2 %v5384_v5  ;;  %v5576_v5 = vor.u32 %v6282_v14, %v5573_v15  ;;  %v5627_v14 = vld [vmem:[#allocation11] sm:$0xf]  ;;  %v6298_v15 = vld [vmem:[#allocation11 + $0x4] sm:$0xf0] }
 0x1d8   :  { %v2435_v63 = vpop.f32.mrf.mxu2 }
 0x1d9   :  { %3415 = vmatmul.bf16.vlgmr.msrb.gmra.mxu2 %v6797_v35  ;;  %v3236_v21 = vpop.f32.mrf.mxu3 }
 0x1da   :  { %v5560_v21 = vor.u32 %v6278_v18, %v5557_v53  ;;  %v5628_v18 = vor.u32 %v6298_v15, %v5627_v14  ;;  %v6322_v53 = vld [vmem:[#allocation11 + $0xc4] sm:$0xf0]  ;;  %v5771_v14 = vld [vmem:[#allocation11 + $0x120] sm:$0xf] }
 0x1db   :  { %v6334_v15 = vld [vmem:[#allocation11 + $0x124] sm:$0xf0] }
 0x1e0   :  { %v2422_v28 = vpop.f32.mrf.mxu0  ;;  %v2437_v3 = vpop.f32.mrf.mxu2 }
 0x1e1   :  { %v2423_v9 = vadd.f32 %v2422_v28, %v2410_v24  ;;  %v2579_v24 = vperm.slane %v6820_v23, 2  ;;  %v6270_v28 = vld [vmem:[#allocation8 + $0x32c] sm:$0xf] }
 0x1e3   :  { %v2436_v29 = vadd.f32 %v2435_v63, %v2423_v9  ;;  %v6274_v63 = vld [vmem:[#allocation8 + $0x34c] sm:$0xf]  ;;  %v5525_v9 = vld [vmem:[#allocation8 + $0x338] sm:$0xf0] }
 0x1e4   :  { %v5544_v59 = vor.u32 %v6274_v63, %v5541_v46  ;;  %v5528_v3 = vor.u32 %v6270_v28, %v5525_v9  ;;  %v6320_v28 = vld [vmem:[#allocation11 + $0xb4] sm:$0xf0]  ;;  %v5811_v9 = vld [vmem:[#allocation11 + $0x170] sm:$0xf] }
 0x1e5   :  { %v3247_v30 = vpop.f32.mrf.mxu1  ;;  %v2442_v35 = vmax.f32 %v2436_v29, 0.0  ;;  %v6266_v29 = vld [vmem:[#allocation8 + $0x30c] sm:$0xf] }
 0x1e6   :  { %v6823_v47 = vadd.f32 %v3247_v30, %v3235_v55  ;;  %v5509_v30 = vld [vmem:[#allocation8 + $0x318] sm:$0xf0] }
 0x1e7   :  { %v6825_v43 = vpack.c.bf16 %v2442_v35, %v2442_v35 }
 0x1e8   :  { %v2424_v39 = vpop.f32.mrf.mxu0 }
 0x1e9   :  { %3272 = vmatmul.bf16.vlgmr.msra.gmra.mxu0 %v6825_v43  ;;  %v5512_v39 = vor.u32 %v6266_v29, %v5509_v30  ;;  %v6309_v29 = vld [vmem:[#allocation11 + $0x64] sm:$0xf]  ;;  %v5677_v30 = vld [vmem:[#allocation11 + $0x68] sm:$0xf0] }
 0x1ea   :  { %3368 = vmatpush.bf16.msra.mxu0 %v5620_v7 }
 0x1ed   :  { %v3249_v36 = vpop.f32.mrf.mxu1 }
 0x1ee   :  { %3369 = vmatpush.bf16.msra.mxu0 %v5604_v34  ;;  %v5684_v34 = vor.u32 %v6312_v32, %v5683_v27  ;;  %v5675_v36 = vld [vmem:[#allocation11 + $0x60] sm:$0xf] }
 0x1ef   :  { %v5676_v37 = vor.u32 %v6310_v42, %v5675_v36  ;;  %v5707_v32 = vld [vmem:[#allocation11 + $0xa0] sm:$0xf]  ;;  %v6342_v36 = vld [vmem:[#allocation11 + $0x164] sm:$0xf0] }
 0x1f0   :  { %3831 = vmatpush.bf16.msra.mxu3 %v5684_v34  ;;  %v5803_v34 = vld [vmem:[#allocation11 + $0x160] sm:$0xf] }
 0x1f1   :  { %v3286_v45 = vpop.f32.mrf.mxu3  ;;  %v5804_v42 = vor.u32 %v6342_v36, %v5803_v34  ;;  %v5875_v34 = vld [vmem:[#allocation11 + $0x1f0] sm:$0xf]  ;;  %v6360_v36 = vld [vmem:[#allocation11 + $0x1f4] sm:$0xf0] }
 0x1f2   :  { %3370 = vmatpush.bf16.msra.mxu0 %v5588_v58  ;;  %v3287_v33 = vadd.f32 %v3286_v45, %v2578_v57  ;;  %v5660_v57 = vor.u32 %v6306_v54, %v5659_v52  ;;  %v6340_v54 = vld [vmem:[#allocation11 + $0x154] sm:$0xf0] }
 0x1f4   :  { %3832 = vmatpush.bf16.msra.mxu3 %v5676_v37  ;;  %v6307_v37 = vld [vmem:[#allocation11 + $0x54] sm:$0xf] }
 0x1f6   :  { %3371 = vmatpush.bf16.msra.mxu0 %v5572_v22  ;;  %v5668_v22 = vor.u32 %v6308_v49, %v5667_v48  ;;  %v5699_v49 = vld [vmem:[#allocation11 + $0x90] sm:$0xf] }
 0x1f8   :  { %3833 = vmatpush.bf16.msra.mxu3 %v5668_v22  ;;  %v5795_v22 = vld [vmem:[#allocation11 + $0x150] sm:$0xf] }
 0x1f9   :  { %v3288_v25 = vpop.f32.mrf.mxu3  ;;  %3324 = vmatmul.bf16.vlgmr.msrb.gmra.mxu0 %v6825_v43 }
 0x1fa   :  { %3372 = vmatpush.bf16.msra.mxu0 %v5556_v51  ;;  %v5747_v25 = vld [vmem:[#allocation11 + $0xf0] sm:$0xf]  ;;  %v6328_v51 = vld [vmem:[#allocation11 + $0xf4] sm:$0xf0] }
 0x1fb   :  { %v5748_v20 = vor.u32 %v6328_v51, %v5747_v25  ;;  %v6305_v25 = vld [vmem:[#allocation11 + $0x44] sm:$0xf]  ;;  %v5661_v51 = vld [vmem:[#allocation11 + $0x48] sm:$0xf0] }
 0x1fc   :  { %3834 = vmatpush.bf16.msra.mxu3 %v5660_v57  ;;  %v6314_v57 = vld [vmem:[#allocation11 + $0x84] sm:$0xf0] }
 0x1fd   :  { %3844 = vmatpush.bf16.msra.mxu1 %v5748_v20  ;;  %v5796_v20 = vor.u32 %v6340_v54, %v5795_v22  ;;  %v5867_v22 = vld [vmem:[#allocation11 + $0x1e0] sm:$0xf]  ;;  %v6317_v54 = vld [vmem:[#allocation11 + $0xa4] sm:$0xf] }
 0x1fe   :  { %3373 = vmatpush.bf16.msra.mxu0 %v5540_v60  ;;  %v6326_v60 = vld [vmem:[#allocation11 + $0xe4] sm:$0xf0] }
 0x1ff   :  { %v5740_v61 = vor.u32 %v6326_v60, %v5739_v56  ;;  %v5664_v56 = vor.u32 %v6305_v25, %v5661_v51  ;;  %v5691_v60 = vld [vmem:[#allocation11 + $0x80] sm:$0xf]  ;;  %v5709_v25 = vld [vmem:[#allocation11 + $0xa8] sm:$0xf0]  ;;  %v6341_v51 = vld [vmem:[#allocation11 + $0x164] sm:$0xf] }
 0x201   :  { %3845 = vmatpush.bf16.msra.mxu1 %v5740_v61  ;;  %v5787_v61 = vld [vmem:[#allocation11 + $0x140] sm:$0xf] }
 0x202   :  { %3374 = vmatpush.bf16.msra.mxu0 %v5524_v62  ;;  %v6304_v62 = vld [vmem:[#allocation11 + $0x34] sm:$0xf0] }
 0x203   :  { %v5652_v38 = vor.u32 %v6304_v62, %v5651_v44  ;;  %v5692_v44 = vor.u32 %v6314_v57, %v5691_v60  ;;  %v6338_v62 = vld [vmem:[#allocation11 + $0x144] sm:$0xf0]  ;;  %v5859_v57 = vld [vmem:[#allocation11 + $0x1d0] sm:$0xf] }
 0x205   :  { %v3299_v0 = vpop.f32.mrf.mxu1  ;;  %3835 = vmatpush.bf16.msra.mxu3 %v5652_v38  ;;  %v5788_v38 = vor.u32 %v6338_v62, %v5787_v61  ;;  %v6356_v61 = vld [vmem:[#allocation11 + $0x1d4] sm:$0xf0] }
 0x206   :  { %v6830_v2 = vadd.f32 %v3299_v0, %v3287_v33  ;;  %3375 = vmatpush.bf16.msra.mxu0 %v5508_v40  ;;  %v5643_v0 = vld [vmem:[#allocation11 + $0x20] sm:$0xf]  ;;  %v2580_v40 = vperm.slane %v6820_v23, 3  ;;  %v6311_v23 = vld [vmem:[#allocation11 + $0x74] sm:$0xf]  ;;  %v5860_v62 = vor.u32 %v6356_v61, %v5859_v57 }
 0x207   :  { %v5644_v1 = vor.u32 %v6302_v8, %v5643_v0  ;;  %v6327_v8 = vld [vmem:[#allocation11 + $0xf4] sm:$0xf]  ;;  %v6353_v57 = vld [vmem:[#allocation11 + $0x1c4] sm:$0xf]  ;;  %v5853_v61 = vld [vmem:[#allocation11 + $0x1c8] sm:$0xf0] }
 0x209   :  { %3376 = vmatmul.bf16.vlgmr.msra.gmra.mxu0 %v6825_v43  ;;  %3836 = vmatpush.bf16.msra.mxu3 %v5644_v1  ;;  %v5749_v1 = vld [vmem:[#allocation11 + $0xf8] sm:$0xf0] }
 0x20a   :  { %3420 = vmatpush.bf16.msrb.mxu0 %v5624_v26 }
 0x20d   :  { %v3301_v10 = vpop.f32.mrf.mxu1 }
 0x20e   :  { %3421 = vmatpush.bf16.msrb.mxu0 %v5608_v4  ;;  %v5731_v4 = vld [vmem:[#allocation11 + $0xd0] sm:$0xf]  ;;  %v5636_v10 = vor.u32 %v6300_v16, %v5635_v41  ;;  %v6336_v41 = vld [vmem:[#allocation11 + $0x134] sm:$0xf0]  ;;  %v6301_v16 = vld [vmem:[#allocation11 + $0x24] sm:$0xf] }
 0x210   :  { %3837 = vmatpush.bf16.msra.mxu3 %v5636_v10  ;;  %v5645_v10 = vld [vmem:[#allocation11 + $0x28] sm:$0xf0] }
 0x211   :  { %v3338_v12 = vpop.f32.mrf.mxu3 }
 0x212   :  { %3422 = vmatpush.bf16.msrb.mxu0 %v5592_v13  ;;  %v3339_v55 = vadd.f32 %v3338_v12, %v2579_v24  ;;  %v5715_v24 = vld [vmem:[#allocation11 + $0xb0] sm:$0xf] }
 0x214   :  { %3838 = vmatpush.bf16.msra.mxu3 %v5628_v18  ;;  %v6299_v18 = vld [vmem:[#allocation11 + $0x14] sm:$0xf] }
 0x216   :  { %3423 = vmatpush.bf16.msrb.mxu0 %v5576_v5  ;;  %v3260_v6 = vpop.f32.mrf.mxu2  ;;  %v5723_v5 = vld [vmem:[#allocation11 + $0xc0] sm:$0xf] }
 0x217   :  { %v6835_v35 = vadd.f32 %v3260_v6, %v6823_v47  ;;  %v5724_v63 = vor.u32 %v6322_v53, %v5723_v5  ;;  %v5772_v5 = vor.u32 %v6334_v15, %v5771_v14  ;;  %v5637_v53 = vld [vmem:[#allocation11 + $0x18] sm:$0xf0]  ;;  %v5789_v14 = vld [vmem:[#allocation11 + $0x148] sm:$0xf0] }
 0x219   :  { %v3340_v17 = vpop.f32.mrf.mxu3 }
 0x21a   :  { %3424 = vmatpush.bf16.msrb.mxu0 %v5560_v21  ;;  %v5685_v17 = vld [vmem:[#allocation11 + $0x78] sm:$0xf0] }
 0x21b   :  { %v5688_v46 = vor.u32 %v6311_v23, %v5685_v17  ;;  %v6323_v23 = vld [vmem:[#allocation11 + $0xd4] sm:$0xf]  ;;  %v5640_v17 = vor.u32 %v6299_v18, %v5637_v53  ;;  %v5843_v18 = vld [vmem:[#allocation11 + $0x1b0] sm:$0xf]  ;;  %v6352_v53 = vld [vmem:[#allocation11 + $0x1b4] sm:$0xf0] }
 0x21d   :  { %3883 = vmatpush.bf16.msrb.mxu3 %v5688_v46  ;;  %v5763_v46 = vld [vmem:[#allocation11 + $0x110] sm:$0xf] }
 0x21e   :  { %3425 = vmatpush.bf16.msrb.mxu0 %v5544_v59  ;;  %v3262_v45 = vpop.f32.mrf.mxu2 }
 0x21f   :  { %v5669_v45 = vld [vmem:[#allocation11 + $0x58] sm:$0xf0] }
 0x220   :  { %v5672_v48 = vor.u32 %v6307_v37, %v5669_v45  ;;  %v5717_v37 = vld [vmem:[#allocation11 + $0xb8] sm:$0xf0]  ;;  %v5876_v45 = vor.u32 %v6360_v36, %v5875_v34  ;;  %v5819_v34 = vld [vmem:[#allocation11 + $0x180] sm:$0xf]  ;;  %v6329_v36 = vld [vmem:[#allocation11 + $0x104] sm:$0xf] }
 0x222   :  { %3426 = vmatpush.bf16.msrb.mxu0 %v5528_v3  ;;  %v5716_v3 = vor.u32 %v6320_v28, %v5715_v24  ;;  %v6332_v24 = vld [vmem:[#allocation11 + $0x114] sm:$0xf0] }
 0x223   :  { %v5764_v28 = vor.u32 %v6332_v24, %v5763_v46  ;;  %v5835_v46 = vld [vmem:[#allocation11 + $0x1a0] sm:$0xf]  ;;  %v6350_v24 = vld [vmem:[#allocation11 + $0x1a4] sm:$0xf0] }
 0x225   :  { %v3351_v31 = vpop.f32.mrf.mxu1 }
 0x226   :  { %v6837_v7 = vadd.f32 %v3351_v31, %v3339_v55  ;;  %3427 = vmatpush.bf16.msrb.mxu0 %v5512_v39  ;;  %v3312_v33 = vpop.f32.mrf.mxu2  ;;  %v6344_v55 = vld [vmem:[#allocation11 + $0x174] sm:$0xf0]  ;;  %v5680_v31 = vor.u32 %v6309_v29, %v5677_v30  ;;  %v6318_v39 = vld [vmem:[#allocation11 + $0xa4] sm:$0xf0]  ;;  %v5725_v30 = vld [vmem:[#allocation11 + $0xc8] sm:$0xf0] }
 0x227   :  { %v6841_v50 = vadd.f32 %v3312_v33, %v6830_v2  ;;  %v5732_v2 = vor.u32 %v6324_v19, %v5731_v4  ;;  %v5812_v6 = vor.u32 %v6344_v55, %v5811_v9  ;;  %v6303_v33 = vld [vmem:[#allocation11 + $0x34] sm:$0xf]  ;;  %v6325_v19 = vld [vmem:[#allocation11 + $0xe4] sm:$0xf] }
 0x228   :  { %3884 = vmatpush.bf16.msrb.mxu3 %v5680_v31  ;;  %v6297_v9 = vld [vmem:[#allocation11 + $0x4] sm:$0xf] }
 0x229   :  { %3428 = vmatmul.bf16.vlgmr.msrb.gmra.mxu0 %v6825_v43  ;;  %3846 = vmatpush.bf16.msra.mxu1 %v5732_v2  ;;  %v5648_v2 = vor.u32 %v6301_v16, %v5645_v10  ;;  %v6321_v55 = vld [vmem:[#allocation11 + $0xc4] sm:$0xf]  ;;  %v6354_v16 = vld [vmem:[#allocation11 + $0x1c4] sm:$0xf0] }
 0x22a   :  { %3857 = vmatpush.bf16.msra.mxu2 %v5812_v6  ;;  %v5728_v31 = vor.u32 %v6321_v55, %v5725_v30  ;;  %3870 = vmatpush.bf16.msra.mxu0 %v5876_v45  ;;  %v6313_v10 = vld [vmem:[#allocation11 + $0x84] sm:$0xf]  ;;  %v6348_v30 = vld [vmem:[#allocation11 + $0x194] sm:$0xf0]  ;;  %v5877_v45 = vld [vmem:[#allocation11 + $0x1f8] sm:$0xf0] }
 0x22c   :  { %3885 = vmatpush.bf16.msrb.mxu3 %v5672_v48  ;;  %v6343_v48 = vld [vmem:[#allocation11 + $0x174] sm:$0xf] }
 0x22d   :  { %v3353_v58 = vpop.f32.mrf.mxu1  ;;  %3847 = vmatpush.bf16.msra.mxu1 %v5724_v63 }
 0x22e   :  { %v3314_v26 = vpop.f32.mrf.mxu2  ;;  %3858 = vmatpush.bf16.msra.mxu2 %v5804_v42  ;;  %v6319_v42 = vld [vmem:[#allocation11 + $0xb4] sm:$0xf] }
 0x22f   :  { %v5779_v26 = vld [vmem:[#allocation11 + $0x130] sm:$0xf] }
 0x230   :  { %3886 = vmatpush.bf16.msrb.mxu3 %v5664_v56  ;;  %v5780_v4 = vor.u32 %v6336_v41, %v5779_v26  ;;  %v5712_v56 = vor.u32 %v6317_v54, %v5709_v25  ;;  %v5851_v41 = vld [vmem:[#allocation11 + $0x1c0] sm:$0xf]  ;;  %v5869_v25 = vld [vmem:[#allocation11 + $0x1e8] sm:$0xf0] }
 0x231   :  { %v3390_v47 = vpop.f32.mrf.mxu3  ;;  %3848 = vmatpush.bf16.msra.mxu1 %v5716_v3  ;;  %v5629_v3 = vld [vmem:[#allocation11 + $0x8] sm:$0xf0] }
 0x232   :  { %v3391_v11 = vadd.f32 %v3390_v47, %v2580_v40  ;;  %v6316_v47 = vld [vmem:[#allocation11 + $0x94] sm:$0xf0]  ;;  %3859 = vmatpush.bf16.msra.mxu2 %v5796_v20  ;;  %v5752_v40 = vor.u32 %v6327_v8, %v5749_v1  ;;  %v5632_v29 = vor.u32 %v6297_v9, %v5629_v3  ;;  %v5805_v20 = vld [vmem:[#allocation11 + $0x168] sm:$0xf0]  ;;  %v5797_v8 = vld [vmem:[#allocation11 + $0x158] sm:$0xf0]  ;;  %v5836_v9 = vor.u32 %v6350_v24, %v5835_v46 }
 0x233   :  { %v5700_v52 = vor.u32 %v6316_v47, %v5699_v49  ;;  %v5813_v49 = vld [vmem:[#allocation11 + $0x178] sm:$0xf0]  ;;  %v5808_v60 = vor.u32 %v6341_v51, %v5805_v20  ;;  %v5773_v3 = vld [vmem:[#allocation11 + $0x128] sm:$0xf0] }
 0x234   :  { %v5816_v47 = vor.u32 %v6343_v48, %v5813_v49 }
 0x236   :  { %3860 = vmatpush.bf16.msra.mxu2 %v5788_v38  ;;  %v6339_v38 = vld [vmem:[#allocation11 + $0x154] sm:$0xf] }
 0x237   :  { %v3364_v21 = vpop.f32.mrf.mxu2 }
 0x238   :  { %v6847_v59 = vadd.f32 %v3364_v21, %v6837_v7  ;;  %v5708_v7 = vor.u32 %v6318_v39, %v5707_v32  ;;  %v5733_v21 = vld [vmem:[#allocation11 + $0xd8] sm:$0xf0]  ;;  %v5755_v32 = vld [vmem:[#allocation11 + $0x100] sm:$0xf]  ;;  %v6330_v39 = vld [vmem:[#allocation11 + $0x104] sm:$0xf0] }
 0x239   :  { %v3392_v43 = vpop.f32.mrf.mxu3  ;;  %v5736_v63 = vor.u32 %v6323_v23, %v5733_v21  ;;  %v6335_v23 = vld [vmem:[#allocation11 + $0x134] sm:$0xf] }
 0x23a   :  { %3849 = vmatpush.bf16.msra.mxu1 %v5708_v7  ;;  %v5653_v43 = vld [vmem:[#allocation11 + $0x38] sm:$0xf0]  ;;  %3861 = vmatpush.bf16.msra.mxu2 %v5780_v4  ;;  %v5756_v7 = vor.u32 %v6330_v39, %v5755_v32  ;;  %v5852_v4 = vor.u32 %v6354_v16, %v5851_v41  ;;  %v6347_v16 = vld [vmem:[#allocation11 + $0x194] sm:$0xf] }
 0x23b   :  { %v5656_v0 = vor.u32 %v6303_v33, %v5653_v43  ;;  %v6315_v33 = vld [vmem:[#allocation11 + $0x94] sm:$0xf]  ;;  %v5701_v43 = vld [vmem:[#allocation11 + $0x98] sm:$0xf0] }
 0x23d   :  { %3887 = vmatpush.bf16.msrb.mxu3 %v5656_v0  ;;  %v5704_v0 = vor.u32 %v6315_v33, %v5701_v43  ;;  %v6351_v43 = vld [vmem:[#allocation11 + $0x1b4] sm:$0xf] }
 0x23e   :  { %3850 = vmatpush.bf16.msra.mxu1 %v5700_v52  ;;  %3862 = vmatpush.bf16.msra.mxu2 %v5772_v5  ;;  %v6358_v52 = vld [vmem:[#allocation11 + $0x1e4] sm:$0xf0] }
 0x23f   :  { %v3366_v58 = vpop.f32.mrf.mxu2 }
 0x240   :  { %v5720_v58 = vor.u32 %v6319_v42, %v5717_v37  ;;  %v5757_v42 = vld [vmem:[#allocation11 + $0x108] sm:$0xf0]  ;;  %v6359_v37 = vld [vmem:[#allocation11 + $0x1f4] sm:$0xf] }
 0x241   :  { %3888 = vmatpush.bf16.msrb.mxu3 %v5648_v2 }
 0x242   :  { %3851 = vmatpush.bf16.msra.mxu1 %v5692_v44  ;;  %3863 = vmatpush.bf16.msra.mxu2 %v5764_v28  ;;  %v6333_v28 = vld [vmem:[#allocation11 + $0x124] sm:$0xf] }
 0x243   :  { %v5776_v55 = vor.u32 %v6333_v28, %v5773_v3  ;;  %v3505_v3 = vld [vmem:[#allocation13] sm:$0x3] }
 0x245   :  { %v3403_v12 = vpop.f32.mrf.mxu1  ;;  %3889 = vmatpush.bf16.msrb.mxu3 %v5640_v17  ;;  %v5781_v17 = vld [vmem:[#allocation11 + $0x138] sm:$0xf0] }
 0x246   :  { %v6844_v13 = vadd.f32 %v3403_v12, %v3391_v11  ;;  %v5741_v11 = vld [vmem:[#allocation11 + $0xe8] sm:$0xf0]  ;;  %3896 = vmatpush.bf16.msrb.mxu1 %v5752_v40  ;;  %3864 = vmatpush.bf16.msra.mxu2 %v5756_v7  ;;  %v5800_v40 = vor.u32 %v6339_v38, %v5797_v8  ;;  %v5784_v21 = vor.u32 %v6335_v23, %v5781_v17  ;;  %v6346_v7 = vld [vmem:[#allocation11 + $0x184] sm:$0xf0]  ;;  %v5845_v38 = vld [vmem:[#allocation11 + $0x1b8] sm:$0xf0] }
 0x247   :  { %v5744_v12 = vor.u32 %v6325_v19, %v5741_v11  ;;  %v5693_v19 = vld [vmem:[#allocation11 + $0x88] sm:$0xf0]  ;;  %v6337_v11 = vld [vmem:[#allocation11 + $0x144] sm:$0xf]  ;;  %v5820_v49 = vor.u32 %v6346_v7, %v5819_v34  ;;  %v5848_v8 = vor.u32 %v6351_v43, %v5845_v38  ;;  %v3508_v34 = vperm.slane %v3505_v3, 1 }
 0x248   :  { %v5792_v15 = vor.u32 %v6337_v11, %v5789_v14  ;;  %v6345_v11 = vld [vmem:[#allocation11 + $0x184] sm:$0xf] }
 0x249   :  { %3890 = vmatpush.bf16.msrb.mxu3 %v5632_v29  ;;  %v5827_v29 = vld [vmem:[#allocation11 + $0x190] sm:$0xf] }
 0x24a   :  { %3897 = vmatpush.bf16.msrb.mxu1 %v5744_v12  ;;  %3909 = vmatpush.bf16.msrb.mxu2 %v5816_v47  ;;  %v5696_v12 = vor.u32 %v6313_v10, %v5693_v19  ;;  %v5828_v32 = vor.u32 %v6348_v30, %v5827_v29  ;;  %v5760_v47 = vor.u32 %v6329_v36, %v5757_v42 }
 0x24d   :  { %v3405_v27 = vpop.f32.mrf.mxu1 }
 0x24e   :  { %3898 = vmatpush.bf16.msrb.mxu1 %v5736_v63  ;;  %3910 = vmatpush.bf16.msrb.mxu2 %v5808_v60  ;;  %v5861_v60 = vld [vmem:[#allocation11 + $0x1d8] sm:$0xf0] }
 0x252   :  { %3899 = vmatpush.bf16.msrb.mxu1 %v5728_v31  ;;  %3911 = vmatpush.bf16.msrb.mxu2 %v5800_v40  ;;  %v5765_v31 = vld [vmem:[#allocation11 + $0x118] sm:$0xf0]  ;;  %v6349_v40 = vld [vmem:[#allocation11 + $0x1a4] sm:$0xf] }
 0x256   :  { %3900 = vmatpush.bf16.msrb.mxu1 %v5720_v58  ;;  %3912 = vmatpush.bf16.msrb.mxu2 %v5792_v15 }
 0x25a   :  { %3901 = vmatpush.bf16.msrb.mxu1 %v5712_v56  ;;  %3913 = vmatpush.bf16.msrb.mxu2 %v5784_v21  ;;  %v6355_v56 = vld [vmem:[#allocation11 + $0x1d4] sm:$0xf] }
 0x25c   :  { %v3416_v6 = vpop.f32.mrf.mxu2 }
 0x25d   :  { %v6850_v27 = vadd.f32 %v3416_v6, %v6844_v13  ;;  %v5868_v13 = vor.u32 %v6358_v52, %v5867_v22  ;;  %v6331_v6 = vld [vmem:[#allocation11 + $0x114] sm:$0xf]  ;;  %v5880_v22 = vor.u32 %v6359_v37, %v5877_v45 }
 0x25e   :  { %3902 = vmatpush.bf16.msrb.mxu1 %v5704_v0  ;;  %3914 = vmatpush.bf16.msrb.mxu2 %v5776_v55  ;;  %v5768_v39 = vor.u32 %v6331_v6, %v5765_v31  ;;  %v3507_v55 = vperm.slane %v3505_v3, 0 }
 0x25f   :  { %3871 = vmatpush.bf16.msra.mxu0 %v5868_v13  ;;  %v6357_v13 = vld [vmem:[#allocation11 + $0x1e4] sm:$0xf] }
 0x260   :  { %v5872_v51 = vor.u32 %v6357_v13, %v5869_v25 }
 0x262   :  { %3903 = vmatpush.bf16.msrb.mxu1 %v5696_v12  ;;  %3915 = vmatpush.bf16.msrb.mxu2 %v5768_v39 }
 0x263   :  { %3872 = vmatpush.bf16.msra.mxu0 %v5860_v62 }
 0x264   :  { %v3418_v44 = vpop.f32.mrf.mxu2 }
 0x265   :  { %v5856_v44 = vor.u32 %v6353_v57, %v5853_v61 }
 0x266   :  { %v3273_v1 = vpop.f32.mrf.mxu0  ;;  %3916 = vmatpush.bf16.msrb.mxu2 %v5760_v47 }
 0x267   :  { %v3274_v26 = vadd.f32 %v3273_v1, %v6835_v35  ;;  %3873 = vmatpush.bf16.msra.mxu0 %v5852_v4  ;;  %v5844_v35 = vor.u32 %v6352_v53, %v5843_v18  ;;  %v5829_v4 = vld [vmem:[#allocation11 + $0x198] sm:$0xf0] }
 0x268   :  { %v5832_v19 = vor.u32 %v6347_v16, %v5829_v4 }
 0x269   :  { %v3433_v2 = vmax.f32 %v3274_v26, 0.0  ;;  %v5837_v26 = vld [vmem:[#allocation11 + $0x1a8] sm:$0xf0] }
 0x26a   :  { %v5840_v41 = vor.u32 %v6349_v40, %v5837_v26 }
 0x26b   :  { %v3437_v5 = vpack.c.bf16 %v3433_v2, %v3433_v2  ;;  %3874 = vmatpush.bf16.msra.mxu0 %v5844_v35  ;;  %v5821_v2 = vld [vmem:[#allocation11 + $0x188] sm:$0xf0] }
 0x26d   :  { %3839 = vmatmul.bf16.vlgmr.msra.gmra.mxu3 %v3437_v5 }
 0x26e   :  { %v3275_v63 = vpop.f32.mrf.mxu0 }
 0x26f   :  { %3875 = vmatpush.bf16.msra.mxu0 %v5836_v9 }
 0x273   :  { %3876 = vmatpush.bf16.msra.mxu0 %v5828_v32 }
 0x276   :  { %v3325_v58 = vpop.f32.mrf.mxu0 }
 0x277   :  { %v3326_v48 = vadd.f32 %v3325_v58, %v6841_v50  ;;  %3877 = vmatpush.bf16.msra.mxu0 %v5820_v49  ;;  %v5864_v50 = vor.u32 %v6355_v56, %v5861_v60 }
 0x279   :  { %v3434_v52 = vmax.f32 %v3326_v48, 0.0 }
 0x27b   :  { %v3438_v54 = vpack.c.bf16 %v3434_v52, %v3434_v52  ;;  %3922 = vmatpush.bf16.msrb.mxu0 %v5880_v22 }
 0x27d   :  { %3852 = vmatmul.bf16.vlgmr.msra.gmra.mxu1 %v3438_v54  ;;  %3891 = vmatmul.bf16.vlgmr.msrb.gmra.mxu3 %v3437_v5 }
 0x27e   :  { %v3327_v20 = vpop.f32.mrf.mxu0 }
 0x27f   :  { %3923 = vmatpush.bf16.msrb.mxu0 %v5872_v51 }
 0x283   :  { %3924 = vmatpush.bf16.msrb.mxu0 %v5864_v50 }
 0x286   :  { %v3377_v62 = vpop.f32.mrf.mxu0 }
 0x287   :  { %v3378_v33 = vadd.f32 %v3377_v62, %v6847_v59  ;;  %3925 = vmatpush.bf16.msrb.mxu0 %v5856_v44  ;;  %v5824_v59 = vor.u32 %v6345_v11, %v5821_v2 }
 0x289   :  { %v3435_v0 = vmax.f32 %v3378_v33, 0.0 }
 0x28b   :  { %v3439_v1 = vpack.c.bf16 %v3435_v0, %v3435_v0  ;;  %3926 = vmatpush.bf16.msrb.mxu0 %v5848_v8 }
 0x28d   :  { %3865 = vmatmul.bf16.vlgmr.msra.gmra.mxu2 %v3439_v1  ;;  %3904 = vmatmul.bf16.vlgmr.msrb.gmra.mxu1 %v3438_v54 }
 0x28e   :  { %v3379_v10 = vpop.f32.mrf.mxu0 }
 0x28f   :  { %3927 = vmatpush.bf16.msrb.mxu0 %v5840_v41 }
 0x293   :  { %3928 = vmatpush.bf16.msrb.mxu0 %v5832_v19 }
 0x297   :  { %3929 = vmatpush.bf16.msrb.mxu0 %v5824_v59 }
 0x29d   :  { %3917 = vmatmul.bf16.vlgmr.msrb.gmra.mxu2 %v3439_v1 }
 0x2a6   :  { %v3429_v12 = vpop.f32.mrf.mxu0 }
 0x2a7   :  { %v3430_v14 = vadd.f32 %v3429_v12, %v6850_v27 }
 0x2a9   :  { %v3436_v15 = vmax.f32 %v3430_v14, 0.0 }
 0x2ab   :  { %v3440_v5 = vpack.c.bf16 %v3436_v15, %v3436_v15 }
 0x2ad   :  { %3878 = vmatmul.bf16.vlgmr.msra.gmra.mxu0 %v3440_v5 }
 0x2ae   :  { %v3431_v18 = vpop.f32.mrf.mxu0 }
 0x2bd   :  { %3930 = vmatmul.bf16.vlgmr.msrb.gmra.mxu0 %v3440_v5 }
 0x2f0   :  { %v3840_v53 = vpop.f32.mrf.mxu3 }
 0x2f1   :  { %v3841_v30 = vadd.f32 %v3840_v53, %v3507_v55 }
 0x2f8   :  { %v3842_v35 = vpop.f32.mrf.mxu3 }
 0x2fa   :  { %v3853_v23 = vpop.f32.mrf.mxu1 }
 0x2fb   :  { %v3854_v27 = vadd.f32 %v3853_v23, %v3841_v30 }
 0x300   :  { %v3892_v17 = vpop.f32.mrf.mxu3 }
 0x301   :  { %v3893_v36 = vadd.f32 %v3892_v17, %v3508_v34 }
 0x302   :  { %v3855_v21 = vpop.f32.mrf.mxu1 }
 0x308   :  { %v3894_v63 = vpop.f32.mrf.mxu3 }
 0x30a   :  { %v3905_v46 = vpop.f32.mrf.mxu1 }
 0x30b   :  { %v3906_v42 = vadd.f32 %v3905_v46, %v3893_v36 }
 0x310   :  { %v3866_v24 = vpop.f32.mrf.mxu2 }
 0x311   :  { %v3867_v6 = vadd.f32 %v3866_v24, %v3854_v27 }
 0x312   :  { %v3907_v28 = vpop.f32.mrf.mxu1 }
 0x318   :  { %v3868_v9 = vpop.f32.mrf.mxu2 }
 0x320   :  { %v3918_v29 = vpop.f32.mrf.mxu2 }
 0x321   :  { %v3919_v37 = vadd.f32 %v3918_v29, %v3906_v42 }
 0x328   :  { %v3920_v39 = vpop.f32.mrf.mxu2 }
 0x32a   :  { %v3879_v31 = vpop.f32.mrf.mxu0 }
 0x32b   :  { %v3880_v32 = vadd.f32 %v3879_v31, %v3867_v6 }
 0x32d   :  { %3935 = vst [vmem:[#allocation14] sm:$0xff] %v3880_v32 }
 0x332   :  { %v3881_v7 = vpop.f32.mrf.mxu0 }
 0x33a   :  { %v3931_v45 = vpop.f32.mrf.mxu0 }
 0x33b   :  { %v3932_v58 = vadd.f32 %v3931_v45, %v3919_v37 }
 0x33d   :  { %3936 = vst [vmem:[#allocation14 + $0x8] sm:$0xff] %v3932_v58 }
 0x33e   :  { %3947 = dma.vmem_to_hbm [thread:$0]  %s3943_s6, 256, %s3945_s14, [#allocation4]  }
 0x342   :  { %v3933_v48 = vpop.f32.mrf.mxu0 }
 0x343   :  { %6575 = dma.done.wait [#allocation4], 256  }
 0x344   :  { %6576 = vsyncadd [#allocation4], 4294967040 }
 0x345   :  { %3952 = vsyncpa [#allocation3], 1 }
 0x346   :  { %3953 = vsyncpa [#allocation6], 1 }
 0x347   :  { %3954 = vsyncpa [#allocation9], 1 }
 0x348   :  { %3955 = vsyncpa [#allocation12], 1 }
 0x349   :  { %3956 = vsyncpa [#allocation4], 1 }

</bundles_post_ra>
